<compile_context>
chip_gen: v7x
topology: tpu7x:2x2x1
jax: 0.10.0
libtpu: 0.0.40
codegen_flags: <defaults>
</compile_context>

<pallas_src>
import jax
import jax.numpy as jnp
from jax import lax
from jax.experimental import pallas as pl
from jax.experimental.pallas import tpu as pltpu


def _convgru_kernel(gx_ref, cx_ref, wgh_ref, wch_ref, o_ref,
                    hpad_ref, rpad_ref, col_ref):
    B, Hp, Wp, C = hpad_ref.shape
    H, W = Hp - 2, Wp - 2
    N = B * H * W
    t = pl.program_id(0)

    # Zero hidden state and the zero border of the reset*h buffer at t == 0.
    @pl.when(t == 0)
    def _init():
        hpad_ref[...] = jnp.zeros_like(hpad_ref)
        rpad_ref[...] = jnp.zeros_like(rpad_ref)

    # ---- gates: [reset, update] = sigmoid(conv_gh(h) + (conv_gx(x_t) + b_g)) ----
    hpad = hpad_ref[...]                                       # (B, Hp, Wp, C)
    h_cur = hpad[:, 1:1 + H, 1:1 + W, :].reshape(N, C)         # center tap == h_t
    for k in range(9):                                         # build im2col of h
        ky, kx = k // 3, k % 3
        col_ref[:, k * C:(k + 1) * C] = (
            hpad[:, ky:ky + H, kx:kx + W, :].reshape(N, C))
    g = jnp.dot(col_ref[...], wgh_ref[...],
                preferred_element_type=jnp.float32) + gx_ref[...]   # (N, 2C)
    reset_gate = jax.nn.sigmoid(g[:, :C])
    update_gate = jax.nn.sigmoid(g[:, C:])

    # ---- candidate: cnm = tanh(conv_ch(reset*h) + (conv_cx(x_t) + b_c)) ----
    rpad_ref[:, 1:1 + H, 1:1 + W, :] = (reset_gate * h_cur).reshape(B, H, W, C)
    rpad = rpad_ref[...]
    for k in range(9):                                         # im2col of reset*h
        ky, kx = k // 3, k % 3
        col_ref[:, k * C:(k + 1) * C] = (
            rpad[:, ky:ky + H, kx:kx + W, :].reshape(N, C))
    cnm = jnp.tanh(jnp.dot(col_ref[...], wch_ref[...],
                           preferred_element_type=jnp.float32) + cx_ref[...])

    # ---- GRU update ----
    h_next = (1.0 - update_gate) * h_cur + update_gate * cnm   # (N, C)
    hpad_ref[:, 1:1 + H, 1:1 + W, :] = h_next.reshape(B, H, W, C)

    # Output block is resident across the time grid: write only at the last step.
    @pl.when(t == pl.num_programs(0) - 1)
    def _store():
        o_ref[...] = h_next


def rnn_encoder_forward(x_nchw, params):
    """x_nchw: (B, T, C, H, W). Returns (B, C, H, W) == rnn_encoder.forward(x)."""
    B, T, C, H, W = x_nchw.shape
    wg, bg, wc, bc = params["wg"], params["bg"], params["wc"], params["bc"]
    N = B * H * W

    # time-major NHWC
    x = jnp.transpose(x_nchw, (1, 0, 3, 4, 2)).astype(jnp.float32)   # (T,B,H,W,C)
    x_tb = x.reshape(T * B, H, W, C)

    def conv_same(inp, w_oihw, b):
        w_hwio = jnp.transpose(w_oihw, (2, 3, 1, 0)).astype(jnp.float32)
        y = lax.conv_general_dilated(
            inp, w_hwio, (1, 1), "SAME",
            dimension_numbers=("NHWC", "HWIO", "NHWC"),
            precision=lax.Precision.HIGHEST)
        return y + b.astype(jnp.float32)

    # Precompute the x-dependent conv halves (+ bias) for all T at once (parallel).
    gx = conv_same(x_tb, wg[:, :C], bg).reshape(T, N, 2 * C)   # (T, N, 2C)
    cx = conv_same(x_tb, wc[:, :C], bc).reshape(T, N, C)       # (T, N, C)

    # Pack h-halves of the conv weights as im2col matrices: (9*C, Cout),
    # tap-major (ky, kx) then input channel — matches the in-kernel col layout.
    def pack_h(w_oihw):
        return jnp.transpose(w_oihw, (2, 3, 1, 0)).reshape(
            9 * w_oihw.shape[1], w_oihw.shape[0]).astype(jnp.float32)

    wgh = pack_h(wg[:, C:])   # (9C, 2C)
    wch = pack_h(wc[:, C:])   # (9C, C)

    Hp, Wp = H + 2, W + 2
    out_flat = pl.pallas_call(
        _convgru_kernel,
        out_shape=jax.ShapeDtypeStruct((N, C), jnp.float32),
        grid_spec=pltpu.PrefetchScalarGridSpec(
            num_scalar_prefetch=0,
            grid=(T,),
            in_specs=[
                pl.BlockSpec((None, N, 2 * C), lambda t: (t, 0, 0)),   # gx_t
                pl.BlockSpec((None, N, C), lambda t: (t, 0, 0)),       # cx_t
                pl.BlockSpec((9 * C, 2 * C), lambda t: (0, 0)),        # W_gh
                pl.BlockSpec((9 * C, C), lambda t: (0, 0)),            # W_ch
            ],
            out_specs=pl.BlockSpec((N, C), lambda t: (0, 0)),
            scratch_shapes=[
                pltpu.VMEM((B, Hp, Wp, C), jnp.float32),   # zero-padded hidden state
                pltpu.VMEM((B, Hp, Wp, C), jnp.float32),   # zero-padded reset*h
                pltpu.VMEM((N, 9 * C), jnp.float32),       # shared im2col buffer
            ],
        ),
        compiler_params=pltpu.CompilerParams(
            dimension_semantics=("arbitrary",)),           # sequential time recurrence
    )(gx, cx, wgh, wch)

    h_last = out_flat.reshape(B, H, W, C)
    return jnp.transpose(h_last, (0, 3, 1, 2))             # back to NCHW


def _reference(x_nchw, params):
    """Pure-JAX reference matching the PyTorch ConvGRU cell semantics."""
    B, T, C, H, W = x_nchw.shape
    wg, bg, wc, bc = params["wg"], params["bg"], params["wc"], params["bc"]

    def conv(x_nhwc, w_oihw, b):
        w_hwio = jnp.transpose(w_oihw, (2, 3, 1, 0))
        y = lax.conv_general_dilated(
            x_nhwc, w_hwio, (1, 1), "SAME",
            dimension_numbers=("NHWC", "HWIO", "NHWC"),
            precision=lax.Precision.HIGHEST)
        return y + b

    x = jnp.transpose(x_nchw, (0, 1, 3, 4, 2)).astype(jnp.float32)  # (B,T,H,W,C)
    h = jnp.zeros((B, H, W, C), jnp.float32)
    for t in range(T):
        xt = x[:, t]
        g = conv(jnp.concatenate([xt, h], axis=-1), wg, bg)
        reset = jax.nn.sigmoid(g[..., :C])
        update = jax.nn.sigmoid(g[..., C:])
        cnm = jnp.tanh(conv(jnp.concatenate([xt, reset * h], axis=-1), wc, bc))
        h = (1.0 - update) * h + update * cnm
    return jnp.transpose(h, (0, 3, 1, 2))


if __name__ == "__main__":
    # Small synthetic config: height = width = 8, channels = hidden_dim = 32,
    # kernel (3,3), num_layers = 1, batch_first = True.
    B, T, C, H, W = 2, 4, 32, 8, 8
    key = jax.random.PRNGKey(0)
    k1, k2, k3, k4, k5 = jax.random.split(key, 5)
    x = jax.random.normal(k1, (B, T, C, H, W), jnp.float32)
    scale = 0.1
    params = dict(
        wg=scale * jax.random.normal(k2, (2 * C, 2 * C, 3, 3), jnp.float32),  # conv_gates
        bg=scale * jax.random.normal(k3, (2 * C,), jnp.float32),
        wc=scale * jax.random.normal(k4, (C, 2 * C, 3, 3), jnp.float32),      # conv_can
        bc=scale * jax.random.normal(k5, (C,), jnp.float32),
    )

    out = jax.block_until_ready(rnn_encoder_forward(x, params))
    ref = jax.block_until_ready(_reference(x, params))

    assert out.shape == (B, C, H, W), out.shape
    max_err = float(jnp.max(jnp.abs(out - ref)))
    assert max_err < 1e-3, f"max_err={max_err}"
    print("KERNEL_OK")
</pallas_src>

<mosaic_0001>
module attributes {stable_mosaic.version = 11 : i64} {
  func.func @_convgru_kernel(%arg0: i32, %arg1: memref<1x128x64xf32, #tpu.memory_space<vmem>>, %arg2: memref<1x128x32xf32, #tpu.memory_space<vmem>>, %arg3: memref<288x64xf32, #tpu.memory_space<vmem>>, %arg4: memref<288x32xf32, #tpu.memory_space<vmem>>, %arg5: memref<128x32xf32, #tpu.memory_space<vmem>>, %arg6: memref<2x10x10x32xf32, #tpu.memory_space<vmem>>, %arg7: memref<2x10x10x32xf32, #tpu.memory_space<vmem>>, %arg8: memref<128x288xf32, #tpu.memory_space<vmem>>) attributes {dimension_semantics = [#tpu.dimension_semantics<arbitrary>], iteration_bounds = array<i64: 4>, scalar_prefetch = 0 : i64, scratch_operands = 3 : i64, tpu.core_type = #tpu.core_type<tc>, window_params = [{transform_indices = @transform_0, window_bounds = array<i64: 1, 128, 64>}, {transform_indices = @transform_1, window_bounds = array<i64: 1, 128, 32>}, {pipeline_mode = #tpu.pipeline_mode<synchronous>, transform_indices = @transform_2, window_bounds = array<i64: 288, 64>}, {pipeline_mode = #tpu.pipeline_mode<synchronous>, transform_indices = @transform_3, window_bounds = array<i64: 288, 32>}, {pipeline_mode = #tpu.pipeline_mode<synchronous>, transform_indices = @transform_4, window_bounds = array<i64: 128, 32>}]} {
    %c0_i32 = arith.constant 0 : i32
    %0 = arith.cmpi eq, %arg0, %c0_i32 : i32
    %1 = arith.extui %0 : i1 to i32
    %c0_i32_0 = arith.constant 0 : i32
    %2 = arith.cmpi ne, %1, %c0_i32_0 : i32
    scf.if %2 {
      %cst_62 = arith.constant 0.000000e+00 : f32
      %99 = vector.broadcast %cst_62 : f32 to vector<2x10x10x32xf32>
      %c0_63 = arith.constant 0 : index
      %c0_64 = arith.constant 0 : index
      %c0_65 = arith.constant 0 : index
      %c0_66 = arith.constant 0 : index
      %100 = vector.load %arg6[%c0_63, %c0_64, %c0_65, %c0_66] : memref<2x10x10x32xf32, #tpu.memory_space<vmem>>, vector<2x10x10x32xf32>
      tpu.vector_store %arg6[%c0_63, %c0_64, %c0_65, %c0_66], %99 {strides = array<i32>} : memref<2x10x10x32xf32, #tpu.memory_space<vmem>>, vector<2x10x10x32xf32>,
      %cst_67 = arith.constant 0.000000e+00 : f32
      %101 = vector.broadcast %cst_67 : f32 to vector<2x10x10x32xf32>
      %c0_68 = arith.constant 0 : index
      %c0_69 = arith.constant 0 : index
      %c0_70 = arith.constant 0 : index
      %c0_71 = arith.constant 0 : index
      %102 = vector.load %arg7[%c0_68, %c0_69, %c0_70, %c0_71] : memref<2x10x10x32xf32, #tpu.memory_space<vmem>>, vector<2x10x10x32xf32>
      tpu.vector_store %arg7[%c0_68, %c0_69, %c0_70, %c0_71], %101 {strides = array<i32>} : memref<2x10x10x32xf32, #tpu.memory_space<vmem>>, vector<2x10x10x32xf32>,
    } else {
    }
    %c0 = arith.constant 0 : index
    %c0_1 = arith.constant 0 : index
    %c0_2 = arith.constant 0 : index
    %c0_3 = arith.constant 0 : index
    %3 = vector.load %arg6[%c0, %c0_1, %c0_2, %c0_3] : memref<2x10x10x32xf32, #tpu.memory_space<vmem>>, vector<2x10x10x32xf32>
    %4 = vector.extract_strided_slice %3 {offsets = [0, 1, 1, 0], sizes = [2, 8, 8, 32], strides = [1, 1, 1, 1]} : vector<2x10x10x32xf32> to vector<2x8x8x32xf32>
    %5 = vector.shape_cast %4 : vector<2x8x8x32xf32> to vector<128x32xf32>
    %6 = vector.extract_strided_slice %3 {offsets = [0, 0, 0, 0], sizes = [2, 8, 8, 32], strides = [1, 1, 1, 1]} : vector<2x10x10x32xf32> to vector<2x8x8x32xf32>
    %7 = vector.shape_cast %6 : vector<2x8x8x32xf32> to vector<128x32xf32>
    %c0_4 = arith.constant 0 : index
    %c0_5 = arith.constant 0 : index
    %8 = vector.load %arg8[%c0_4, %c0_5] : memref<128x288xf32, #tpu.memory_space<vmem>>, vector<128x32xf32>
    tpu.vector_store %arg8[%c0_4, %c0_5], %7 {strides = array<i32>} : memref<128x288xf32, #tpu.memory_space<vmem>>, vector<128x32xf32>,
    %9 = vector.extract_strided_slice %3 {offsets = [0, 0, 1, 0], sizes = [2, 8, 8, 32], strides = [1, 1, 1, 1]} : vector<2x10x10x32xf32> to vector<2x8x8x32xf32>
    %10 = vector.shape_cast %9 : vector<2x8x8x32xf32> to vector<128x32xf32>
    %c0_6 = arith.constant 0 : index
    %c32 = arith.constant 32 : index
    %11 = vector.load %arg8[%c0_6, %c32] : memref<128x288xf32, #tpu.memory_space<vmem>>, vector<128x32xf32>
    tpu.vector_store %arg8[%c0_6, %c32], %10 {strides = array<i32>} : memref<128x288xf32, #tpu.memory_space<vmem>>, vector<128x32xf32>,
    %12 = vector.extract_strided_slice %3 {offsets = [0, 0, 2, 0], sizes = [2, 8, 8, 32], strides = [1, 1, 1, 1]} : vector<2x10x10x32xf32> to vector<2x8x8x32xf32>
    %13 = vector.shape_cast %12 : vector<2x8x8x32xf32> to vector<128x32xf32>
    %c0_7 = arith.constant 0 : index
    %c64 = arith.constant 64 : index
    %14 = vector.load %arg8[%c0_7, %c64] : memref<128x288xf32, #tpu.memory_space<vmem>>, vector<128x32xf32>
    tpu.vector_store %arg8[%c0_7, %c64], %13 {strides = array<i32>} : memref<128x288xf32, #tpu.memory_space<vmem>>, vector<128x32xf32>,
    %15 = vector.extract_strided_slice %3 {offsets = [0, 1, 0, 0], sizes = [2, 8, 8, 32], strides = [1, 1, 1, 1]} : vector<2x10x10x32xf32> to vector<2x8x8x32xf32>
    %16 = vector.shape_cast %15 : vector<2x8x8x32xf32> to vector<128x32xf32>
    %c0_8 = arith.constant 0 : index
    %c96 = arith.constant 96 : index
    %17 = vector.load %arg8[%c0_8, %c96] : memref<128x288xf32, #tpu.memory_space<vmem>>, vector<128x32xf32>
    tpu.vector_store %arg8[%c0_8, %c96], %16 {strides = array<i32>} : memref<128x288xf32, #tpu.memory_space<vmem>>, vector<128x32xf32>,
    %18 = vector.extract_strided_slice %3 {offsets = [0, 1, 1, 0], sizes = [2, 8, 8, 32], strides = [1, 1, 1, 1]} : vector<2x10x10x32xf32> to vector<2x8x8x32xf32>
    %19 = vector.shape_cast %18 : vector<2x8x8x32xf32> to vector<128x32xf32>
    %c0_9 = arith.constant 0 : index
    %c128 = arith.constant 128 : index
    %20 = vector.load %arg8[%c0_9, %c128] : memref<128x288xf32, #tpu.memory_space<vmem>>, vector<128x32xf32>
    tpu.vector_store %arg8[%c0_9, %c128], %19 {strides = array<i32>} : memref<128x288xf32, #tpu.memory_space<vmem>>, vector<128x32xf32>,
    %21 = vector.extract_strided_slice %3 {offsets = [0, 1, 2, 0], sizes = [2, 8, 8, 32], strides = [1, 1, 1, 1]} : vector<2x10x10x32xf32> to vector<2x8x8x32xf32>
    %22 = vector.shape_cast %21 : vector<2x8x8x32xf32> to vector<128x32xf32>
    %c0_10 = arith.constant 0 : index
    %c160 = arith.constant 160 : index
    %23 = vector.load %arg8[%c0_10, %c160] : memref<128x288xf32, #tpu.memory_space<vmem>>, vector<128x32xf32>
    tpu.vector_store %arg8[%c0_10, %c160], %22 {strides = array<i32>} : memref<128x288xf32, #tpu.memory_space<vmem>>, vector<128x32xf32>,
    %24 = vector.extract_strided_slice %3 {offsets = [0, 2, 0, 0], sizes = [2, 8, 8, 32], strides = [1, 1, 1, 1]} : vector<2x10x10x32xf32> to vector<2x8x8x32xf32>
    %25 = vector.shape_cast %24 : vector<2x8x8x32xf32> to vector<128x32xf32>
    %c0_11 = arith.constant 0 : index
    %c192 = arith.constant 192 : index
    %26 = vector.load %arg8[%c0_11, %c192] : memref<128x288xf32, #tpu.memory_space<vmem>>, vector<128x32xf32>
    tpu.vector_store %arg8[%c0_11, %c192], %25 {strides = array<i32>} : memref<128x288xf32, #tpu.memory_space<vmem>>, vector<128x32xf32>,
    %27 = vector.extract_strided_slice %3 {offsets = [0, 2, 1, 0], sizes = [2, 8, 8, 32], strides = [1, 1, 1, 1]} : vector<2x10x10x32xf32> to vector<2x8x8x32xf32>
    %28 = vector.shape_cast %27 : vector<2x8x8x32xf32> to vector<128x32xf32>
    %c0_12 = arith.constant 0 : index
    %c224 = arith.constant 224 : index
    %29 = vector.load %arg8[%c0_12, %c224] : memref<128x288xf32, #tpu.memory_space<vmem>>, vector<128x32xf32>
    tpu.vector_store %arg8[%c0_12, %c224], %28 {strides = array<i32>} : memref<128x288xf32, #tpu.memory_space<vmem>>, vector<128x32xf32>,
    %30 = vector.extract_strided_slice %3 {offsets = [0, 2, 2, 0], sizes = [2, 8, 8, 32], strides = [1, 1, 1, 1]} : vector<2x10x10x32xf32> to vector<2x8x8x32xf32>
    %31 = vector.shape_cast %30 : vector<2x8x8x32xf32> to vector<128x32xf32>
    %c0_13 = arith.constant 0 : index
    %c256 = arith.constant 256 : index
    %32 = vector.load %arg8[%c0_13, %c256] : memref<128x288xf32, #tpu.memory_space<vmem>>, vector<128x32xf32>
    tpu.vector_store %arg8[%c0_13, %c256], %31 {strides = array<i32>} : memref<128x288xf32, #tpu.memory_space<vmem>>, vector<128x32xf32>,
    %c0_14 = arith.constant 0 : index
    %c0_15 = arith.constant 0 : index
    %33 = vector.load %arg8[%c0_14, %c0_15] : memref<128x288xf32, #tpu.memory_space<vmem>>, vector<128x288xf32>
    %c0_16 = arith.constant 0 : index
    %c0_17 = arith.constant 0 : index
    %34 = vector.load %arg3[%c0_16, %c0_17] : memref<288x64xf32, #tpu.memory_space<vmem>>, vector<288x64xf32>
    %cst = arith.constant dense<0.000000e+00> : vector<128x64xf32>
    %35 = tpu.matmul %33, %34, %cst {dimension_numbers = #tpu.dot_dimension_numbers<[1], [0], [0], [1], [0, 0, 1, 1], [], []>} : vector<128x288xf32>, vector<288x64xf32>, vector<128x64xf32> -> vector<128x64xf32>
    %c0_18 = arith.constant 0 : index
    %c0_19 = arith.constant 0 : index
    %c0_20 = arith.constant 0 : index
    %36 = vector.load %arg1[%c0_18, %c0_19, %c0_20] : memref<1x128x64xf32, #tpu.memory_space<vmem>>, vector<1x128x64xf32>
    %37 = vector.shape_cast %36 : vector<1x128x64xf32> to vector<128x64xf32>
    %38 = arith.addf %35, %37 : vector<128x64xf32>
    %39 = vector.extract_strided_slice %38 {offsets = [0, 0], sizes = [128, 32], strides = [1, 1]} : vector<128x64xf32> to vector<128x32xf32>
    %40 = arith.negf %39 : vector<128x32xf32>
    %41 = math.exp %40 : vector<128x32xf32>
    %cst_21 = arith.constant 1.000000e+00 : f32
    %42 = vector.broadcast %cst_21 : f32 to vector<128x32xf32>
    %43 = arith.addf %42, %41 : vector<128x32xf32>
    %44 = arith.divf %42, %43 : vector<128x32xf32>
    %45 = vector.extract_strided_slice %38 {offsets = [0, 32], sizes = [128, 32], strides = [1, 1]} : vector<128x64xf32> to vector<128x32xf32>
    %46 = arith.negf %45 : vector<128x32xf32>
    %47 = math.exp %46 : vector<128x32xf32>
    %cst_22 = arith.constant 1.000000e+00 : f32
    %48 = vector.broadcast %cst_22 : f32 to vector<128x32xf32>
    %49 = arith.addf %48, %47 : vector<128x32xf32>
    %50 = arith.divf %48, %49 : vector<128x32xf32>
    %51 = arith.mulf %44, %5 : vector<128x32xf32>
    %52 = vector.shape_cast %51 : vector<128x32xf32> to vector<2x8x8x32xf32>
    %c0_23 = arith.constant 0 : index
    %c1 = arith.constant 1 : index
    %c1_24 = arith.constant 1 : index
    %c0_25 = arith.constant 0 : index
    %53 = vector.load %arg7[%c0_23, %c1, %c1_24, %c0_25] : memref<2x10x10x32xf32, #tpu.memory_space<vmem>>, vector<2x8x8x32xf32>
    tpu.vector_store %arg7[%c0_23, %c1, %c1_24, %c0_25], %52 {strides = array<i32>} : memref<2x10x10x32xf32, #tpu.memory_space<vmem>>, vector<2x8x8x32xf32>,
    %c0_26 = arith.constant 0 : index
    %c0_27 = arith.constant 0 : index
    %c0_28 = arith.constant 0 : index
    %c0_29 = arith.constant 0 : index
    %54 = vector.load %arg7[%c0_26, %c0_27, %c0_28, %c0_29] : memref<2x10x10x32xf32, #tpu.memory_space<vmem>>, vector<2x10x10x32xf32>
    %55 = vector.extract_strided_slice %54 {offsets = [0, 0, 0, 0], sizes = [2, 8, 8, 32], strides = [1, 1, 1, 1]} : vector<2x10x10x32xf32> to vector<2x8x8x32xf32>
    %56 = vector.shape_cast %55 : vector<2x8x8x32xf32> to vector<128x32xf32>
    %c0_30 = arith.constant 0 : index
    %c0_31 = arith.constant 0 : index
    %57 = vector.load %arg8[%c0_30, %c0_31] : memref<128x288xf32, #tpu.memory_space<vmem>>, vector<128x32xf32>
    tpu.vector_store %arg8[%c0_30, %c0_31], %56 {strides = array<i32>} : memref<128x288xf32, #tpu.memory_space<vmem>>, vector<128x32xf32>,
    %58 = vector.extract_strided_slice %54 {offsets = [0, 0, 1, 0], sizes = [2, 8, 8, 32], strides = [1, 1, 1, 1]} : vector<2x10x10x32xf32> to vector<2x8x8x32xf32>
    %59 = vector.shape_cast %58 : vector<2x8x8x32xf32> to vector<128x32xf32>
    %c0_32 = arith.constant 0 : index
    %c32_33 = arith.constant 32 : index
    %60 = vector.load %arg8[%c0_32, %c32_33] : memref<128x288xf32, #tpu.memory_space<vmem>>, vector<128x32xf32>
    tpu.vector_store %arg8[%c0_32, %c32_33], %59 {strides = array<i32>} : memref<128x288xf32, #tpu.memory_space<vmem>>, vector<128x32xf32>,
    %61 = vector.extract_strided_slice %54 {offsets = [0, 0, 2, 0], sizes = [2, 8, 8, 32], strides = [1, 1, 1, 1]} : vector<2x10x10x32xf32> to vector<2x8x8x32xf32>
    %62 = vector.shape_cast %61 : vector<2x8x8x32xf32> to vector<128x32xf32>
    %c0_34 = arith.constant 0 : index
    %c64_35 = arith.constant 64 : index
    %63 = vector.load %arg8[%c0_34, %c64_35] : memref<128x288xf32, #tpu.memory_space<vmem>>, vector<128x32xf32>
    tpu.vector_store %arg8[%c0_34, %c64_35], %62 {strides = array<i32>} : memref<128x288xf32, #tpu.memory_space<vmem>>, vector<128x32xf32>,
    %64 = vector.extract_strided_slice %54 {offsets = [0, 1, 0, 0], sizes = [2, 8, 8, 32], strides = [1, 1, 1, 1]} : vector<2x10x10x32xf32> to vector<2x8x8x32xf32>
    %65 = vector.shape_cast %64 : vector<2x8x8x32xf32> to vector<128x32xf32>
    %c0_36 = arith.constant 0 : index
    %c96_37 = arith.constant 96 : index
    %66 = vector.load %arg8[%c0_36, %c96_37] : memref<128x288xf32, #tpu.memory_space<vmem>>, vector<128x32xf32>
    tpu.vector_store %arg8[%c0_36, %c96_37], %65 {strides = array<i32>} : memref<128x288xf32, #tpu.memory_space<vmem>>, vector<128x32xf32>,
    %67 = vector.extract_strided_slice %54 {offsets = [0, 1, 1, 0], sizes = [2, 8, 8, 32], strides = [1, 1, 1, 1]} : vector<2x10x10x32xf32> to vector<2x8x8x32xf32>
    %68 = vector.shape_cast %67 : vector<2x8x8x32xf32> to vector<128x32xf32>
    %c0_38 = arith.constant 0 : index
    %c128_39 = arith.constant 128 : index
    %69 = vector.load %arg8[%c0_38, %c128_39] : memref<128x288xf32, #tpu.memory_space<vmem>>, vector<128x32xf32>
    tpu.vector_store %arg8[%c0_38, %c128_39], %68 {strides = array<i32>} : memref<128x288xf32, #tpu.memory_space<vmem>>, vector<128x32xf32>,
    %70 = vector.extract_strided_slice %54 {offsets = [0, 1, 2, 0], sizes = [2, 8, 8, 32], strides = [1, 1, 1, 1]} : vector<2x10x10x32xf32> to vector<2x8x8x32xf32>
    %71 = vector.shape_cast %70 : vector<2x8x8x32xf32> to vector<128x32xf32>
    %c0_40 = arith.constant 0 : index
    %c160_41 = arith.constant 160 : index
    %72 = vector.load %arg8[%c0_40, %c160_41] : memref<128x288xf32, #tpu.memory_space<vmem>>, vector<128x32xf32>
    tpu.vector_store %arg8[%c0_40, %c160_41], %71 {strides = array<i32>} : memref<128x288xf32, #tpu.memory_space<vmem>>, vector<128x32xf32>,
    %73 = vector.extract_strided_slice %54 {offsets = [0, 2, 0, 0], sizes = [2, 8, 8, 32], strides = [1, 1, 1, 1]} : vector<2x10x10x32xf32> to vector<2x8x8x32xf32>
    %74 = vector.shape_cast %73 : vector<2x8x8x32xf32> to vector<128x32xf32>
    %c0_42 = arith.constant 0 : index
    %c192_43 = arith.constant 192 : index
    %75 = vector.load %arg8[%c0_42, %c192_43] : memref<128x288xf32, #tpu.memory_space<vmem>>, vector<128x32xf32>
    tpu.vector_store %arg8[%c0_42, %c192_43], %74 {strides = array<i32>} : memref<128x288xf32, #tpu.memory_space<vmem>>, vector<128x32xf32>,
    %76 = vector.extract_strided_slice %54 {offsets = [0, 2, 1, 0], sizes = [2, 8, 8, 32], strides = [1, 1, 1, 1]} : vector<2x10x10x32xf32> to vector<2x8x8x32xf32>
    %77 = vector.shape_cast %76 : vector<2x8x8x32xf32> to vector<128x32xf32>
    %c0_44 = arith.constant 0 : index
    %c224_45 = arith.constant 224 : index
    %78 = vector.load %arg8[%c0_44, %c224_45] : memref<128x288xf32, #tpu.memory_space<vmem>>, vector<128x32xf32>
    tpu.vector_store %arg8[%c0_44, %c224_45], %77 {strides = array<i32>} : memref<128x288xf32, #tpu.memory_space<vmem>>, vector<128x32xf32>,
    %79 = vector.extract_strided_slice %54 {offsets = [0, 2, 2, 0], sizes = [2, 8, 8, 32], strides = [1, 1, 1, 1]} : vector<2x10x10x32xf32> to vector<2x8x8x32xf32>
    %80 = vector.shape_cast %79 : vector<2x8x8x32xf32> to vector<128x32xf32>
    %c0_46 = arith.constant 0 : index
    %c256_47 = arith.constant 256 : index
    %81 = vector.load %arg8[%c0_46, %c256_47] : memref<128x288xf32, #tpu.memory_space<vmem>>, vector<128x32xf32>
    tpu.vector_store %arg8[%c0_46, %c256_47], %80 {strides = array<i32>} : memref<128x288xf32, #tpu.memory_space<vmem>>, vector<128x32xf32>,
    %c0_48 = arith.constant 0 : index
    %c0_49 = arith.constant 0 : index
    %82 = vector.load %arg8[%c0_48, %c0_49] : memref<128x288xf32, #tpu.memory_space<vmem>>, vector<128x288xf32>
    %c0_50 = arith.constant 0 : index
    %c0_51 = arith.constant 0 : index
    %83 = vector.load %arg4[%c0_50, %c0_51] : memref<288x32xf32, #tpu.memory_space<vmem>>, vector<288x32xf32>
    %cst_52 = arith.constant dense<0.000000e+00> : vector<128x32xf32>
    %84 = tpu.matmul %82, %83, %cst_52 {dimension_numbers = #tpu.dot_dimension_numbers<[1], [0], [0], [1], [0, 0, 1, 1], [], []>} : vector<128x288xf32>, vector<288x32xf32>, vector<128x32xf32> -> vector<128x32xf32>
    %c0_53 = arith.constant 0 : index
    %c0_54 = arith.constant 0 : index
    %c0_55 = arith.constant 0 : index
    %85 = vector.load %arg2[%c0_53, %c0_54, %c0_55] : memref<1x128x32xf32, #tpu.memory_space<vmem>>, vector<1x128x32xf32>
    %86 = vector.shape_cast %85 : vector<1x128x32xf32> to vector<128x32xf32>
    %87 = arith.addf %84, %86 : vector<128x32xf32>
    %88 = math.tanh %87 : vector<128x32xf32>
    %cst_56 = arith.constant 1.000000e+00 : f32
    %89 = vector.broadcast %cst_56 : f32 to vector<128x32xf32>
    %90 = arith.subf %89, %50 : vector<128x32xf32>
    %91 = arith.mulf %90, %5 : vector<128x32xf32>
    %92 = arith.mulf %50, %88 : vector<128x32xf32>
    %93 = arith.addf %91, %92 : vector<128x32xf32>
    %94 = vector.shape_cast %93 : vector<128x32xf32> to vector<2x8x8x32xf32>
    %c0_57 = arith.constant 0 : index
    %c1_58 = arith.constant 1 : index
    %c1_59 = arith.constant 1 : index
    %c0_60 = arith.constant 0 : index
    %95 = vector.load %arg6[%c0_57, %c1_58, %c1_59, %c0_60] : memref<2x10x10x32xf32, #tpu.memory_space<vmem>>, vector<2x8x8x32xf32>
    tpu.vector_store %arg6[%c0_57, %c1_58, %c1_59, %c0_60], %94 {strides = array<i32>} : memref<2x10x10x32xf32, #tpu.memory_space<vmem>>, vector<2x8x8x32xf32>,
    %c3_i32 = arith.constant 3 : i32
    %96 = arith.cmpi eq, %arg0, %c3_i32 : i32
    %97 = arith.extui %96 : i1 to i32
    %c0_i32_61 = arith.constant 0 : i32
    %98 = arith.cmpi ne, %97, %c0_i32_61 : i32
    scf.if %98 {
      %c0_62 = arith.constant 0 : index
      %c0_63 = arith.constant 0 : index
      %99 = vector.load %arg5[%c0_62, %c0_63] : memref<128x32xf32, #tpu.memory_space<vmem>>, vector<128x32xf32>
      tpu.vector_store %arg5[%c0_62, %c0_63], %93 {strides = array<i32>} : memref<128x32xf32, #tpu.memory_space<vmem>>, vector<128x32xf32>,
    } else {
    }
    return
  }
  func.func @transform_0(%arg0: i32) -> (i32, i32, i32) {
    %c0_i32 = arith.constant 0 : i32
    %c0_i32_0 = arith.constant 0 : i32
    %c0_i32_1 = arith.constant 0 : i32
    return %arg0, %c0_i32, %c0_i32_0 : i32, i32, i32
  }
  func.func @transform_1(%arg0: i32) -> (i32, i32, i32) {
    %c0_i32 = arith.constant 0 : i32
    %c0_i32_0 = arith.constant 0 : i32
    %c0_i32_1 = arith.constant 0 : i32
    return %arg0, %c0_i32, %c0_i32_0 : i32, i32, i32
  }
  func.func @transform_2(%arg0: i32) -> (i32, i32) {
    %c0_i32 = arith.constant 0 : i32
    %c0_i32_0 = arith.constant 0 : i32
    %c0_i32_1 = arith.constant 0 : i32
    return %c0_i32, %c0_i32_0 : i32, i32
  }
  func.func @transform_3(%arg0: i32) -> (i32, i32) {
    %c0_i32 = arith.constant 0 : i32
    %c0_i32_0 = arith.constant 0 : i32
    %c0_i32_1 = arith.constant 0 : i32
    return %c0_i32, %c0_i32_0 : i32, i32
  }
  func.func @transform_4(%arg0: i32) -> (i32, i32) {
    %c0_i32 = arith.constant 0 : i32
    %c0_i32_0 = arith.constant 0 : i32
    %c0_i32_1 = arith.constant 0 : i32
    return %c0_i32, %c0_i32_0 : i32, i32
  }
}

</mosaic_0001>

<bundles_post_ra>
// kernel: tpu_custom_call.1
= control target key start
LH: loop header
LB: loop body
LE: loop exit
PB: predicated region body
PF: predicated region fallthrough
CT: control target
= control target key end

     0   :  { %s3474_s15 = smov 0   ;;  %s5190_s0 = inlined_call_operand.vmem [shape: f32[4,128,64], index: 0, kind: input, shape index: {}]   ;;  %s5191_s1 = inlined_call_operand.vmem [shape: f32[4,128,32], index: 1, kind: input, shape index: {}]   ;;  %s5192_s2 = inlined_call_operand.vmem [shape: f32[288,64], index: 2, kind: input, shape index: {}]   ;;  %s5193_s3 = inlined_call_operand.vmem [shape: f32[288,32], index: 3, kind: input, shape index: {}]   ;;  %s5194_s4 = inlined_call_operand.vmem [shape: f32[128,32], index: 4, kind: output, shape index: {}]  }
   0x1 LB: > { %s3480_s16 = sadd.s32 4294967295, %s3443_s15   ;;  %p2922_p0 = scmp.ge.s32.totalorder %s3443_s15, 1  ;;  %s3443_s15 = sphi %s3474_s15, %s14_s15  }
   0x2   : > { %p167_p1 = scmp.lt.s32.totalorder %s3443_s15, 5 }
   0x4   : > { %p168_p2 = pnand %p2922_p0, %p167_p1 }
   0x5   : > { %p193_p3 = scmp.lt.s32.totalorder (!%p168_p2), %s3480_s16, 3  ;;  %p2927_p4 = scmp.ne.s32.totalorder (!%p168_p2), %s3480_s16, 0 }
   0x6   : > { %171 = sbr.rel (%p168_p2) target bundleno = 1238 (0x4d6), region = 36 }
   0xd   : > { %s194_s17 = scalar_select %p193_p3, %s3480_s16, 3 }
   0xe   : > { %206 = sbr.rel (%p2927_p4) target bundleno = 55 (0x37), region = 40  ;;  %vm207_vm0 = vcmask (!%p2927_p4), 261120   ;;  %vm209_vm1 = vcmask (!%p2927_p4), 254976   ;;  %v3445_v0 = vmov (!%p2927_p4), 0.0  }
   0xf   : > { %s2979_s18 = sshll.u32 %s194_s17, 7  ;;  %208 = vst.msk [vmem:[#allocation2] sm:$0xff] (!%p2927_p4), %vm207_vm0, %v3445_v0  ;;  %211 = vst.msk [vmem:[#allocation2 + $0x10] sm:$0xff] (!%p2927_p4), %vm207_vm0, %v3445_v0 }
  0x10   : > { %s3489_s21 = scalar_lea.vmem %s5190_s0, %s2979_s18  ;;  %s3494_s24 = scalar_lea.vmem %s5191_s1, %s2979_s18  ;;  %213 = vst.msk [vmem:[#allocation2 + $0x20] sm:$0xff] (!%p2927_p4), %vm207_vm0, %v3445_v0  ;;  %215 = vst.msk [vmem:[#allocation2 + $0x30] sm:$0xff] (!%p2927_p4), %vm207_vm0, %v3445_v0 }
  0x11   : > { %217 = vst.msk [vmem:[#allocation2 + $0x40] sm:$0xff] (!%p2927_p4), %vm207_vm0, %v3445_v0  ;;  %219 = vst.msk [vmem:[#allocation2 + $0x50] sm:$0xff] (!%p2927_p4), %vm207_vm0, %v3445_v0 }
  0x12   : > { %221 = vst.msk [vmem:[#allocation2 + $0x60] sm:$0xff] (!%p2927_p4), %vm207_vm0, %v3445_v0  ;;  %223 = vst.msk [vmem:[#allocation2 + $0x70] sm:$0xff] (!%p2927_p4), %vm207_vm0, %v3445_v0 }
  0x13   : > { %225 = vst.msk [vmem:[#allocation2 + $0x80] sm:$0xff] (!%p2927_p4), %vm207_vm0, %v3445_v0  ;;  %227 = vst.msk [vmem:[#allocation2 + $0x90] sm:$0xff] (!%p2927_p4), %vm207_vm0, %v3445_v0 }
  0x14   : > { %229 = vst.msk [vmem:[#allocation2 + $0xa0] sm:$0xff] (!%p2927_p4), %vm207_vm0, %v3445_v0  ;;  %231 = vst.msk [vmem:[#allocation2 + $0xb0] sm:$0xff] (!%p2927_p4), %vm207_vm0, %v3445_v0 }
  0x15   : > { %233 = vst.msk [vmem:[#allocation2 + $0xc0] sm:$0xff] %vm207_vm0, %v3445_v0  ;;  %235 = vst.msk [vmem:[#allocation2 + $0xd0] sm:$0xff] %vm207_vm0, %v3445_v0 }
  0x16   : > { %237 = vst.msk [vmem:[#allocation2 + $0xe0] sm:$0xff] %vm207_vm0, %v3445_v0  ;;  %239 = vst.msk [vmem:[#allocation2 + $0xf0] sm:$0xff] %vm207_vm0, %v3445_v0 }
  0x17   : > { %241 = vst.msk [vmem:[#allocation2 + $0x100] sm:$0xff] %vm207_vm0, %v3445_v0  ;;  %243 = vst.msk [vmem:[#allocation2 + $0x110] sm:$0xff] %vm207_vm0, %v3445_v0 }
  0x18   : > { %245 = vst.msk [vmem:[#allocation2 + $0x120] sm:$0xff] %vm207_vm0, %v3445_v0  ;;  %247 = vst.msk [vmem:[#allocation2 + $0x130] sm:$0xff] %vm207_vm0, %v3445_v0 }
  0x19   : > { %249 = vst.msk [vmem:[#allocation3] sm:$0xff] %vm207_vm0, %v3445_v0  ;;  %251 = vst.msk [vmem:[#allocation3 + $0x10] sm:$0xff] %vm207_vm0, %v3445_v0 }
  0x1a   : > { %253 = vst.msk [vmem:[#allocation3 + $0x20] sm:$0xff] %vm207_vm0, %v3445_v0  ;;  %255 = vst.msk [vmem:[#allocation3 + $0x30] sm:$0xff] %vm207_vm0, %v3445_v0 }
  0x1b   : > { %257 = vst.msk [vmem:[#allocation3 + $0x40] sm:$0xff] %vm207_vm0, %v3445_v0  ;;  %259 = vst.msk [vmem:[#allocation3 + $0x50] sm:$0xff] %vm207_vm0, %v3445_v0 }
  0x1c   : > { %261 = vst.msk [vmem:[#allocation3 + $0x60] sm:$0xff] %vm207_vm0, %v3445_v0  ;;  %263 = vst.msk [vmem:[#allocation3 + $0x70] sm:$0xff] %vm207_vm0, %v3445_v0 }
  0x1d   : > { %265 = vst.msk [vmem:[#allocation3 + $0x80] sm:$0xff] %vm207_vm0, %v3445_v0  ;;  %267 = vst.msk [vmem:[#allocation3 + $0x90] sm:$0xff] %vm207_vm0, %v3445_v0 }
  0x1e   : > { %269 = vst.msk [vmem:[#allocation3 + $0xa0] sm:$0xff] %vm207_vm0, %v3445_v0  ;;  %271 = vst.msk [vmem:[#allocation3 + $0xb0] sm:$0xff] %vm207_vm0, %v3445_v0 }
  0x1f   : > { %273 = vst.msk [vmem:[#allocation3 + $0xc0] sm:$0xff] %vm207_vm0, %v3445_v0  ;;  %275 = vst.msk [vmem:[#allocation3 + $0xd0] sm:$0xff] %vm207_vm0, %v3445_v0 }
  0x20   : > { %277 = vst.msk [vmem:[#allocation3 + $0xe0] sm:$0xff] %vm207_vm0, %v3445_v0  ;;  %279 = vst.msk [vmem:[#allocation3 + $0xf0] sm:$0xff] %vm207_vm0, %v3445_v0 }
  0x21   : > { %281 = vst.msk [vmem:[#allocation3 + $0x100] sm:$0xff] %vm207_vm0, %v3445_v0  ;;  %283 = vst.msk [vmem:[#allocation3 + $0x110] sm:$0xff] %vm207_vm0, %v3445_v0 }
  0x22   : > { %285 = vst.msk [vmem:[#allocation3 + $0x120] sm:$0xff] %vm207_vm0, %v3445_v0  ;;  %287 = vst.msk [vmem:[#allocation3 + $0x130] sm:$0xff] %vm207_vm0, %v3445_v0 }
  0x23   : > { %210 = vst.msk [vmem:[#allocation2 + $0x8] sm:$0x3] %vm209_vm1, %v3445_v0  ;;  %212 = vst.msk [vmem:[#allocation2 + $0x18] sm:$0x3] %vm209_vm1, %v3445_v0 }
  0x24   : > { %214 = vst.msk [vmem:[#allocation2 + $0x28] sm:$0x3] %vm209_vm1, %v3445_v0  ;;  %216 = vst.msk [vmem:[#allocation2 + $0x38] sm:$0x3] %vm209_vm1, %v3445_v0 }
  0x25   : > { %218 = vst.msk [vmem:[#allocation2 + $0x48] sm:$0x3] %vm209_vm1, %v3445_v0  ;;  %220 = vst.msk [vmem:[#allocation2 + $0x58] sm:$0x3] %vm209_vm1, %v3445_v0 }
  0x26   : > { %222 = vst.msk [vmem:[#allocation2 + $0x68] sm:$0x3] %vm209_vm1, %v3445_v0  ;;  %224 = vst.msk [vmem:[#allocation2 + $0x78] sm:$0x3] %vm209_vm1, %v3445_v0 }
  0x27   : > { %226 = vst.msk [vmem:[#allocation2 + $0x88] sm:$0x3] %vm209_vm1, %v3445_v0  ;;  %228 = vst.msk [vmem:[#allocation2 + $0x98] sm:$0x3] %vm209_vm1, %v3445_v0 }
  0x28   : > { %230 = vst.msk [vmem:[#allocation2 + $0xa8] sm:$0x3] %vm209_vm1, %v3445_v0  ;;  %232 = vst.msk [vmem:[#allocation2 + $0xb8] sm:$0x3] %vm209_vm1, %v3445_v0 }
  0x29   : > { %234 = vst.msk [vmem:[#allocation2 + $0xc8] sm:$0x3] %vm209_vm1, %v3445_v0  ;;  %236 = vst.msk [vmem:[#allocation2 + $0xd8] sm:$0x3] %vm209_vm1, %v3445_v0 }
  0x2a   : > { %238 = vst.msk [vmem:[#allocation2 + $0xe8] sm:$0x3] %vm209_vm1, %v3445_v0  ;;  %240 = vst.msk [vmem:[#allocation2 + $0xf8] sm:$0x3] %vm209_vm1, %v3445_v0 }
  0x2b   : > { %242 = vst.msk [vmem:[#allocation2 + $0x108] sm:$0x3] %vm209_vm1, %v3445_v0  ;;  %244 = vst.msk [vmem:[#allocation2 + $0x118] sm:$0x3] %vm209_vm1, %v3445_v0 }
  0x2c   : > { %246 = vst.msk [vmem:[#allocation2 + $0x128] sm:$0x3] %vm209_vm1, %v3445_v0  ;;  %248 = vst.msk [vmem:[#allocation2 + $0x138] sm:$0x3] %vm209_vm1, %v3445_v0 }
  0x2d   : > { %250 = vst.msk [vmem:[#allocation3 + $0x8] sm:$0x3] %vm209_vm1, %v3445_v0  ;;  %252 = vst.msk [vmem:[#allocation3 + $0x18] sm:$0x3] %vm209_vm1, %v3445_v0 }
  0x2e   : > { %254 = vst.msk [vmem:[#allocation3 + $0x28] sm:$0x3] %vm209_vm1, %v3445_v0  ;;  %256 = vst.msk [vmem:[#allocation3 + $0x38] sm:$0x3] %vm209_vm1, %v3445_v0 }
  0x2f   : > { %258 = vst.msk [vmem:[#allocation3 + $0x48] sm:$0x3] %vm209_vm1, %v3445_v0  ;;  %260 = vst.msk [vmem:[#allocation3 + $0x58] sm:$0x3] %vm209_vm1, %v3445_v0 }
  0x30   : > { %262 = vst.msk [vmem:[#allocation3 + $0x68] sm:$0x3] %vm209_vm1, %v3445_v0  ;;  %264 = vst.msk [vmem:[#allocation3 + $0x78] sm:$0x3] %vm209_vm1, %v3445_v0 }
  0x31   : > { %266 = vst.msk [vmem:[#allocation3 + $0x88] sm:$0x3] %vm209_vm1, %v3445_v0  ;;  %268 = vst.msk [vmem:[#allocation3 + $0x98] sm:$0x3] %vm209_vm1, %v3445_v0 }
  0x32   : > { %270 = vst.msk [vmem:[#allocation3 + $0xa8] sm:$0x3] %vm209_vm1, %v3445_v0  ;;  %272 = vst.msk [vmem:[#allocation3 + $0xb8] sm:$0x3] %vm209_vm1, %v3445_v0 }
  0x33   : > { %274 = vst.msk [vmem:[#allocation3 + $0xc8] sm:$0x3] %vm209_vm1, %v3445_v0  ;;  %276 = vst.msk [vmem:[#allocation3 + $0xd8] sm:$0x3] %vm209_vm1, %v3445_v0 }
  0x34   : > { %278 = vst.msk [vmem:[#allocation3 + $0xe8] sm:$0x3] %vm209_vm1, %v3445_v0  ;;  %280 = vst.msk [vmem:[#allocation3 + $0xf8] sm:$0x3] %vm209_vm1, %v3445_v0 }
  0x35   : > { %282 = vst.msk [vmem:[#allocation3 + $0x108] sm:$0x3] %vm209_vm1, %v3445_v0  ;;  %284 = vst.msk [vmem:[#allocation3 + $0x118] sm:$0x3] %vm209_vm1, %v3445_v0 }
  0x36   : > { %286 = vst.msk [vmem:[#allocation3 + $0x128] sm:$0x3] %vm209_vm1, %v3445_v0  ;;  %288 = vst.msk [vmem:[#allocation3 + $0x138] sm:$0x3] %vm209_vm1, %v3445_v0 }
  0x37 PF: > { %v292_v2 = vld [vmem:[#allocation2 + $0x18] sm:$0x3]  ;;  %vm518_vm2 = vcmask 1045504   ;;  %v290_v7 = vld [vmem:[#allocation2 + $0x8] sm:$0x3]  ;;  %s3446_s25 = smov 64  }
  0x38   : > { %v3657_v1 = vld [vmem:[#allocation2 + $0x10] sm:$0xff]  ;;  %v523_v5 = vrot.slane %v292_v2, 2  ;;  %v289_v6 = vld [vmem:[#allocation2] sm:$0xff]  ;;  %vm361_vm3 = vcmask 1046528   ;;  %v448_v9 = vrot.slane %v290_v7, 1  ;;  %v520_v13 = vrot.slane %v290_v7, 2 }
  0x39   : > { %v3659_v3 = vld [vmem:[#allocation2 + $0x20] sm:$0xff]  ;;  %v522_v4 = vrot.slane %v3657_v1, 2  ;;  %v447_v8 = vrot.slane %v289_v6, 1  ;;  %v519_v10 = vrot.slane %v289_v6, 2  ;;  %v294_v11 = vld [vmem:[#allocation2 + $0x28] sm:$0x3] }
  0x3a   : > { %785 = vrot.lane.b32.xlu1 %v3659_v3, %s3446_s25  ;;  %v365_v14 = vrot.slane %v3659_v3, 1  ;;  %v366_v15 = vrot.slane %v294_v11, 1  ;;  %v3668_v16 = vld [vmem:[#allocation2 + $0x30] sm:$0xff]  ;;  %v3670_v17 = vld [vmem:[#allocation2 + $0x40] sm:$0xff]  ;;  %s3447_s26 = smov 32   ;;  %vm426_vm4 = vcmask 261120  }
  0x3b   : > { %v3665_v12 = vsel %vm518_vm2, %v522_v4, %v523_v5  ;;  %v449_v18 = vsel %vm361_vm3, %v447_v8, %v448_v9  ;;  %v525_v19 = vrot.slane %v3659_v3, 2  ;;  %v526_v20 = vrot.slane %v294_v11, 2  ;;  %v296_v21 = vld [vmem:[#allocation2 + $0x38] sm:$0x3]  ;;  %v3676_v22 = vld [vmem:[#allocation2 + $0x50] sm:$0xff]  ;;  %427 = vst.msk [vmem:[#allocation4] sm:$0xff] %vm426_vm4, %v289_v6 }
  0x3c   : > { %719 = vrot.lane.b32.xlu0 %v3665_v12, %s3447_s26  ;;  %v521_v23 = vsel %vm518_vm2, %v519_v10, %v520_v13  ;;  %v3680_v24 = vsel %vm361_vm3, %v365_v14, %v366_v15  ;;  %428 = vst.msk [vmem:[#allocation4 + $0x18] sm:$0xff] %vm426_vm4, %v3657_v1  ;;  %429 = vst.msk [vmem:[#allocation4 + $0x30] sm:$0xff] %vm426_vm4, %v3659_v3  ;;  %v362_v25 = vrot.slane %v3657_v1, 1  ;;  %v363_v26 = vrot.slane %v292_v2, 1  ;;  %v298_v27 = vld [vmem:[#allocation2 + $0x48] sm:$0x3] }
  0x3d   : > { %430 = vst.msk [vmem:[#allocation4 + $0x48] sm:$0xff] %vm426_vm4, %v3668_v16  ;;  %431 = vst.msk [vmem:[#allocation4 + $0x60] sm:$0xff] %vm426_vm4, %v3670_v17  ;;  %v3696_v28 = vsel %vm518_vm2, %v525_v19, %v526_v20  ;;  %v368_v29 = vrot.slane %v3668_v16, 1  ;;  %v369_v30 = vrot.slane %v296_v21, 1  ;;  %v528_v31 = vrot.slane %v3668_v16, 2  ;;  %v3702_v33 = vld [vmem:[#allocation2 + $0x60] sm:$0xff] }
  0x3e   : > { %432 = vst.msk [vmem:[#allocation4 + $0x78] sm:$0xff] %vm426_vm4, %v3676_v22  ;;  %567 = vrot.lane.b32.xlu1 %v521_v23, %s3446_s25  ;;  %698 = vst.msk [vmem:[#allocation4 + $0x20] sm:$0xff] %vm426_vm4, %v3680_v24  ;;  %v300_v32 = vld [vmem:[#allocation2 + $0x58] sm:$0x3]  ;;  %v3707_v34 = vsel %vm361_vm3, %v362_v25, %v363_v26  ;;  %v529_v35 = vrot.slane %v296_v21, 2  ;;  %v371_v36 = vrot.slane %v3670_v17, 1 }
  0x3f   : > { %943 = vst.msk [vmem:[#allocation4 + $0x10] sm:$0xff] %vm426_vm4, %v3696_v28  ;;  %v372_v37 = vrot.slane %v298_v27, 1  ;;  %433 = vst.msk [vmem:[#allocation4 + $0x90] sm:$0xff] %vm426_vm4, %v3702_v33  ;;  %v302_v38 = vld [vmem:[#allocation2 + $0x68] sm:$0x3]  ;;  %v3712_v39 = vld [vmem:[#allocation2 + $0x70] sm:$0xff]  ;;  %v3718_v40 = vsel %vm361_vm3, %v368_v29, %v369_v30 }
  0x40   : > { %453 = vrot.lane.b32.xlu0 %v449_v18, %s3447_s26  ;;  %697 = vst.msk [vmem:[#allocation4 + $0x8] sm:$0xff] %vm426_vm4, %v3707_v34  ;;  %v531_v41 = vrot.slane %v3670_v17, 2  ;;  %v532_v42 = vrot.slane %v298_v27, 2  ;;  %v374_v43 = vrot.slane %v3676_v22, 1  ;;  %434 = vst.msk [vmem:[#allocation4 + $0xa8] sm:$0xff] %vm426_vm4, %v3712_v39  ;;  %v3727_v44 = vsel %vm518_vm2, %v528_v31, %v529_v35  ;;  %v3733_v49 = vld [vmem:[#allocation2 + $0x80] sm:$0xff] }
  0x41   : > { %699 = vst.msk [vmem:[#allocation4 + $0x38] sm:$0xff] %vm426_vm4, %v3718_v40  ;;  %v3730_v45 = vsel %vm361_vm3, %v371_v36, %v372_v37  ;;  %v375_v46 = vrot.slane %v300_v32, 1  ;;  %v534_v47 = vrot.slane %v3676_v22, 2  ;;  %v304_v48 = vld [vmem:[#allocation2 + $0x78] sm:$0x3]  ;;  %v3735_v50 = vld [vmem:[#allocation2 + $0xb0] sm:$0xff] }
  0x42   : > { %s3448_s27 = smov 96   ;;  %944 = vst.msk [vmem:[#allocation4 + $0x28] sm:$0xff] %vm426_vm4, %v3727_v44  ;;  %700 = vst.msk [vmem:[#allocation4 + $0x50] sm:$0xff] %vm426_vm4, %v3730_v45  ;;  %v3744_v51 = vsel %vm518_vm2, %v531_v41, %v532_v42  ;;  %v535_v52 = vrot.slane %v300_v32, 2  ;;  %v377_v53 = vrot.slane %v3702_v33, 1  ;;  %v378_v54 = vrot.slane %v302_v38, 1 }
  0x43   : > { %632 = vrot.lane.b32.xlu1 %v3657_v1, %s3448_s27  ;;  %v306_v55 = vld [vmem:[#allocation2 + $0x88] sm:$0x3]  ;;  %436 = vst.msk [vmem:[#allocation4 + $0xd8] sm:$0xff] %vm426_vm4, %v3735_v50  ;;  %v3749_v56 = vld [vmem:[#allocation2 + $0xa0] sm:$0xff]  ;;  %945 = vst.msk [vmem:[#allocation4 + $0x40] sm:$0xff] %vm426_vm4, %v3744_v51  ;;  %v3754_v57 = vsel %vm361_vm3, %v374_v43, %v375_v46  ;;  %v537_v58 = vrot.slane %v3702_v33, 2 }
  0x44   : > { %v538_v59 = vrot.slane %v302_v38, 2  ;;  %v380_v60 = vrot.slane %v3712_v39, 1  ;;  %435 = vst.msk [vmem:[#allocation4 + $0xc0] sm:$0xff] %vm426_vm4, %v3749_v56  ;;  %857 = vrot.lane.b32.xlu0 %v3680_v24, %s3448_s27  ;;  %701 = vst.msk [vmem:[#allocation4 + $0x68] sm:$0xff] %vm426_vm4, %v3754_v57  ;;  %v3765_v61 = vsel %vm518_vm2, %v534_v47, %v535_v52  ;;  %v3768_v62 = vsel %vm361_vm3, %v377_v53, %v378_v54  ;;  %v3771_v1 = vld [vmem:[#allocation2 + $0xc0] sm:$0xff]  ;;  %v3791_v10 = vld [vmem:[#allocation2 + $0x90] sm:$0xff] }
  0x45   : > { %v381_v63 = vrot.slane %v304_v48, 1  ;;  %v540_v0 = vrot.slane %v3712_v39, 2  ;;  %946 = vst.msk [vmem:[#allocation4 + $0x58] sm:$0xff] %vm426_vm4, %v3765_v61  ;;  %702 = vst.msk [vmem:[#allocation4 + $0x80] sm:$0xff] %vm426_vm4, %v3768_v62  ;;  %v541_v4 = vrot.slane %v304_v48, 2  ;;  %v383_v5 = vrot.slane %v3733_v49, 1 }
  0x46   : > { %v3778_v2 = vsel %vm518_vm2, %v537_v58, %v538_v59  ;;  %v384_v6 = vrot.slane %v306_v55, 1  ;;  %437 = vst.msk [vmem:[#allocation4 + $0xf0] sm:$0xff] %vm426_vm4, %v3771_v1  ;;  %v713_v8 = vrot.slane %v3733_v49, 2  ;;  %v714_v9 = vrot.slane %v306_v55, 2  ;;  %v1023_v11 = vld [vmem:[%s5192_s2 + $0x80] sm:$0xff]  ;;  %v1024_v13 = vld [vmem:[%s5192_s2 + $0x88] sm:$0xff] }
  0x47   : > { %455 = vrot.lane.b32.xlu1 %v3707_v34, %s3447_s26  ;;  %947 = vst.msk [vmem:[#allocation4 + $0x70] sm:$0xff] %vm426_vm4, %v3778_v2  ;;  %v3788_v7 = vsel %vm361_vm3, %v380_v60, %v381_v63  ;;  %v3802_v14 = vsel %vm518_vm2, %v540_v0, %v541_v4  ;;  %v921_v18 = vrot.slane %v3791_v10, 2  ;;  %v3808_v19 = vld [vmem:[#allocation2 + $0x98] sm:$0x3]  ;;  %v1007_v20 = vld [vmem:[%s5192_s2] sm:$0xff]  ;;  %v1008_v21 = vld [vmem:[%s5192_s2 + $0x8] sm:$0xff]  ;;  %v3245_v30 = vpack.c.bf16 %v1024_v13, %v1023_v11 }
  0x48   : > { %703 = vst.msk [vmem:[#allocation4 + $0x98] sm:$0xff] %vm426_vm4, %v3788_v7  ;;  %v3805_v15 = vsel %vm361_vm3, %v383_v5, %v384_v6  ;;  %721 = vrot.lane.b32.xlu0 %v3696_v28, %s3447_s26  ;;  %948 = vst.msk [vmem:[#allocation4 + $0x88] sm:$0xff] %vm426_vm4, %v3802_v14  ;;  %v3823_v23 = vsel %vm518_vm2, %v713_v8, %v714_v9  ;;  %v922_v25 = vrot.slane %v3808_v19, 2  ;;  %v1025_v26 = vld [vmem:[%s5192_s2 + $0x90] sm:$0xff]  ;;  %v1026_v27 = vld [vmem:[%s5192_s2 + $0x98] sm:$0xff]  ;;  %v549_v48 = vrot.slane %v3771_v1, 2 }
  0x49   : > { %704 = vst.msk [vmem:[#allocation4 + $0xb0] sm:$0xff] %vm426_vm4, %v3805_v15  ;;  %v314_v29 = vld [vmem:[#allocation2 + $0xc8] sm:$0x3]  ;;  %949 = vst.msk [vmem:[#allocation4 + $0xa0] sm:$0xff] %vm426_vm4, %v3823_v23  ;;  %v1009_v31 = vld [vmem:[%s5192_s2 + $0x10] sm:$0xff]  ;;  %v3247_v37 = vpack.c.bf16 %v1008_v21, %v1007_v20  ;;  %3246 = vmatprep.subr.bf16.mxu0 %v3245_v30  ;;  %v3249_v42 = vpack.c.bf16 %v1026_v27, %v1025_v26  ;;  %v386_v58 = vrot.slane %v3735_v50, 1 }
  0x4a   : > { %v1010_v32 = vld [vmem:[%s5192_s2 + $0x18] sm:$0xff]  ;;  %v3840_v35 = vld [vmem:[#allocation2 + $0xd0] sm:$0xff]  ;;  %v923_v36 = vsel %vm518_vm2, %v921_v18, %v922_v25  ;;  %v1027_v38 = vld [vmem:[%s5192_s2 + $0xa0] sm:$0xff]  ;;  %v390_v46 = vrot.slane %v314_v29, 1  ;;  %v550_v53 = vrot.slane %v314_v29, 2  ;;  %vm501_vm5 = vcmask 523520  }
  0x4b   : > { %569 = vrot.lane.b32.xlu1 %v3665_v12, %s3446_s25  ;;  %v1028_v41 = vld [vmem:[%s5192_s2 + $0xa8] sm:$0xff]  ;;  %438 = vst.msk [vmem:[#allocation4 + $0x108] sm:$0xff] %vm426_vm4, %v3840_v35  ;;  %950 = vst.msk [vmem:[#allocation4 + $0xb8] sm:$0xff] %vm426_vm4, %v923_v36  ;;  %v389_v12 = vrot.slane %v3771_v1, 1  ;;  %v3857_v43 = vld [vmem:[#allocation2 + $0xb8] sm:$0x3]  ;;  %3248 = vmatpush3.bf16.msra.mxu0 %v3247_v37  ;;  %v3251_v47 = vpack.c.bf16 %v1010_v32, %v1009_v31 }
  0x4c   : > { %787 = vrot.lane.b32.xlu0 %v3668_v16, %s3446_s25  ;;  %3250 = vmatprep.subr.bf16.mxu0 %v3249_v42  ;;  %v3253_v52 = vpack.c.bf16 %v1028_v41, %v1027_v38  ;;  %v1011_v54 = vld [vmem:[%s5192_s2 + $0x20] sm:$0xff]  ;;  %v1012_v55 = vld [vmem:[%s5192_s2 + $0x28] sm:$0xff]  ;;  %v316_v59 = vld [vmem:[#allocation2 + $0xd8] sm:$0x3]  ;;  %v387_v63 = vrot.slane %v3857_v43, 1  ;;  %v392_v20 = vrot.slane %v3840_v35, 1 }
  0x4d   : > { %v3870_v60 = vsel %vm361_vm3, %v389_v12, %v390_v46  ;;  %v1029_v0 = vld [vmem:[%s5192_s2 + $0xb0] sm:$0xff]  ;;  %v1030_v4 = vld [vmem:[%s5192_s2 + $0xb8] sm:$0xff]  ;;  %v3879_v5 = vld [vmem:[#allocation2 + $0xe0] sm:$0xff]  ;;  %v3255_v11 = vpack.c.bf16 %v1012_v55, %v1011_v54  ;;  %v393_v21 = vrot.slane %v316_v59, 1  ;;  %v552_v29 = vrot.slane %v3840_v35, 2  ;;  %p2976_p5 = scmp.ne.s32.totalorder %s3480_s16, 3 }
  0x4e   : > { %706 = vst.msk [vmem:[#allocation4 + $0xe0] sm:$0xff] %vm426_vm4, %v3870_v60  ;;  %v3889_v6 = vld [vmem:[%s5192_s2 + $0x30] sm:$0xff]  ;;  %v3894_v8 = vld [vmem:[%s5192_s2 + $0x38] sm:$0xff]  ;;  %v3899_v9 = vld [vmem:[%s5192_s2 + $0xc0] sm:$0xff]  ;;  %v3908_v13 = vsel %vm361_vm3, %v386_v58, %v387_v63  ;;  %v3257_v27 = vpack.c.bf16 %v1030_v4, %v1029_v0  ;;  %v553_v30 = vrot.slane %v316_v59, 2  ;;  %v555_v59 = vrot.slane %v3879_v5, 2 }
  0x4f   : > { %634 = vrot.lane.b32.xlu1 %v3659_v3, %s3448_s27  ;;  %v3884_v3 = vsel %vm518_vm2, %v549_v48, %v550_v53  ;;  %439 = vst.msk [vmem:[#allocation4 + $0x120] sm:$0xff] %vm426_vm4, %v3879_v5  ;;  %3252 = vmatpush3.bf16.msra.mxu0 %v3251_v47  ;;  %v3913_v18 = vld [vmem:[%s5192_s2 + $0xc8] sm:$0xff]  ;;  %v1039_v25 = vld [vmem:[%s5192_s2 + $0x100] sm:$0xff]  ;;  %705 = vst.msk [vmem:[#allocation4 + $0xc8] sm:$0xff] %vm426_vm4, %v3908_v13  ;;  %v3934_v37 = vsel %vm361_vm3, %v392_v20, %v393_v21  ;;  %v395_v47 = vrot.slane %v3879_v5, 1  ;;  %vm615_vm6 = vcmask 785920  }
  0x50   : > { %859 = vrot.lane.b32.xlu0 %v3718_v40, %s3448_s27  ;;  %951 = vst.msk [vmem:[#allocation4 + $0xd0] sm:$0xff] %vm426_vm4, %v3884_v3  ;;  %v1040_v26 = vld [vmem:[%s5192_s2 + $0x108] sm:$0xff]  ;;  %3254 = vmatprep.subr.bf16.mxu0 %v3253_v52  ;;  %v1041_v32 = vld [vmem:[%s5192_s2 + $0x110] sm:$0xff]  ;;  %v1042_v36 = vld [vmem:[%s5192_s2 + $0x118] sm:$0xff]  ;;  %v3259_v42 = vpack.c.bf16 %v3894_v8, %v3889_v6  ;;  %v3943_v12 = vsel %vm518_vm2, %v552_v29, %v553_v30  ;;  %vm680_vm7 = vcmask 1048320  }
  0x51   : > { %v318_v31 = vld [vmem:[#allocation2 + $0xe8] sm:$0x3]  ;;  %v961_v38 = vld [vmem:[#allocation4 + $0x10] sm:$0xff]  ;;  %707 = vst.msk [vmem:[#allocation4 + $0xf8] sm:$0xff] %vm426_vm4, %v3934_v37  ;;  %v3277_v46 = vpack.c.bf16 %v1040_v26, %v1039_v25  ;;  %v320_v48 = vld [vmem:[#allocation2 + $0xf8] sm:$0x3]  ;;  %v3261_v54 = vpack.c.bf16 %v3913_v18, %v3899_v9  ;;  %v3281_v58 = vpack.c.bf16 %v1042_v36, %v1041_v32 }
  0x52   : > { %v3936_v41 = vld [vmem:[#allocation2 + $0xf0] sm:$0xff]  ;;  %3189 = vmatprep.mubr.msk.f32.mxu1 %vm426_vm4, %v961_v38  ;;  %v3949_v52 = vld [vmem:[#allocation2 + $0x100] sm:$0xff]  ;;  %v322_v53 = vld [vmem:[#allocation2 + $0x108] sm:$0x3]  ;;  %952 = vst.msk [vmem:[#allocation4 + $0xe8] sm:$0xff] %vm426_vm4, %v3943_v12  ;;  %v396_v55 = vrot.slane %v318_v31, 1 }
  0x53   : > { %457 = vrot.lane.b32.xlu1 %v3680_v24, %s3447_s26  ;;  %440 = vst.msk [vmem:[#allocation4 + $0x138] sm:$0xff] %vm426_vm4, %v3936_v41  ;;  %3256 = vmatpush3.bf16.msra.mxu0 %v3255_v11  ;;  %441 = vst.msk [vmem:[#allocation4 + $0x150] sm:$0xff] %vm426_vm4, %v3949_v52  ;;  %v1015_v63 = vld [vmem:[%s5192_s2 + $0x40] sm:$0xff]  ;;  %v1016_v0 = vld [vmem:[%s5192_s2 + $0x48] sm:$0xff]  ;;  %v556_v4 = vrot.slane %v318_v31, 2  ;;  %v398_v6 = vrot.slane %v3936_v41, 1 }
  0x54   : > { %723 = vrot.lane.b32.xlu0 %v3727_v44, %s3447_s26  ;;  %3258 = vmatprep.subr.bf16.mxu0 %v3257_v27  ;;  %v399_v8 = vrot.slane %v320_v48, 1  ;;  %v558_v9 = vrot.slane %v3936_v41, 2  ;;  %v1033_v11 = vld [vmem:[%s5192_s2 + $0xd0] sm:$0xff]  ;;  %v1034_v18 = vld [vmem:[%s5192_s2 + $0xd8] sm:$0xff]  ;;  %v3977_v20 = vsel %vm361_vm3, %v395_v47, %v396_v55  ;;  %v559_v21 = vrot.slane %v320_v48, 2  ;;  %v1035_v48 = vld [vmem:[%s5192_s2 + $0xe0] sm:$0xff] }
  0x55   : > { %3278 = vmatprep.subr.bf16.mxu1 %v3277_v46  ;;  %v401_v25 = vrot.slane %v3949_v52, 1  ;;  %v402_v26 = vrot.slane %v322_v53, 1  ;;  %708 = vst.msk [vmem:[#allocation4 + $0x110] sm:$0xff] %vm426_vm4, %v3977_v20  ;;  %v561_v29 = vrot.slane %v3949_v52, 2  ;;  %v562_v30 = vrot.slane %v322_v53, 2  ;;  %v1036_v53 = vld [vmem:[%s5192_s2 + $0xe8] sm:$0xff] }
  0x56   : > { %3280 = vmatpush3.bf16.msra.mxu1 %v3277_v46  ;;  %v3986_v27 = vsel %vm361_vm3, %v398_v6, %v399_v8  ;;  %v3263_v31 = vpack.c.bf16 %v1016_v0, %v1015_v63  ;;  %v3996_v32 = vsel %vm518_vm2, %v558_v9, %v559_v21  ;;  %v3265_v38 = vpack.c.bf16 %v1034_v18, %v1033_v11  ;;  %v1017_v46 = vld [vmem:[%s5192_s2 + $0x50] sm:$0xff]  ;;  %v967_v55 = vld [vmem:[#allocation4 + $0x40] sm:$0xff]  ;;  %v324_v63 = vld [vmem:[#allocation2 + $0x118] sm:$0x3] }
  0x57   : > { %571 = vrot.lane.b32.xlu1 %v3696_v28, %s3446_s25  ;;  %3282 = vmatprep.subr.bf16.mxu1 %v3281_v58  ;;  %v3983_v28 = vsel %vm518_vm2, %v555_v59, %v556_v4  ;;  %709 = vst.msk [vmem:[#allocation4 + $0x128] sm:$0xff] %vm426_vm4, %v3986_v27  ;;  %v3999_v36 = vsel %vm361_vm3, %v401_v25, %v402_v26  ;;  %954 = vst.msk [vmem:[#allocation4 + $0x118] sm:$0xff] %vm426_vm4, %v3996_v32  ;;  %v4024_v59 = vld [vmem:[#allocation2 + $0x110] sm:$0xff]  ;;  %v1020_v4 = vld [vmem:[%s5192_s2 + $0x68] sm:$0xff]  ;;  %v405_v8 = vrot.slane %v324_v63, 1 }
  0x58   : > { %789 = vrot.lane.b32.xlu0 %v3670_v17, %s3446_s25  ;;  %3260 = vmatpush3.bf16.msra.mxu0 %v3259_v42  ;;  %953 = vst.msk [vmem:[#allocation4 + $0x100] sm:$0xff] %vm426_vm4, %v3983_v28  ;;  %v1018_v42 = vld [vmem:[%s5192_s2 + $0x58] sm:$0xff]  ;;  %710 = vst.msk [vmem:[#allocation4 + $0x140] sm:$0xff] %vm426_vm4, %v3999_v36  ;;  %v4012_v47 = vsel %vm518_vm2, %v561_v29, %v562_v30  ;;  %v3269_v0 = vpack.c.bf16 %v1036_v53, %v1035_v48  ;;  %v404_v6 = vrot.slane %v4024_v59, 1  ;;  %v1037_v9 = vld [vmem:[%s5192_s2 + $0xf0] sm:$0xff] }
  0x59   : > { %3262 = vmatprep.subr.bf16.mxu0 %v3261_v54  ;;  %v964_v54 = vld [vmem:[#allocation4 + $0x28] sm:$0xff]  ;;  %955 = vst.msk [vmem:[#allocation4 + $0x130] sm:$0xff] %vm426_vm4, %v4012_v47  ;;  %442 = vst.msk [vmem:[#allocation4 + $0x168] sm:$0xff] %vm426_vm4, %v4024_v59  ;;  %v1038_v11 = vld [vmem:[%s5192_s2 + $0xf8] sm:$0xff] }
  0x5a   : > { %3284 = vmatpush3.bf16.msra.mxu1 %v3281_v58  ;;  %v1019_v58 = vld [vmem:[%s5192_s2 + $0x60] sm:$0xff]  ;;  %v970_v18 = vld [vmem:[#allocation4 + $0x58] sm:$0xff]  ;;  %v4048_v21 = vsel %vm361_vm3, %v404_v6, %v405_v8  ;;  %v3273_v26 = vpack.c.bf16 %v1038_v11, %v1037_v9  ;;  %v1021_v29 = vld [vmem:[%s5192_s2 + $0x70] sm:$0xff]  ;;  %v851_v9 = vrot.slane %v3791_v10, 1  ;;  %v450_v11 = vrot.slane %v3749_v56, 1 }
  0x5b   : > { %636 = vrot.lane.b32.xlu1 %v3668_v16, %s3448_s27  ;;  %v3267_v16 = vpack.c.bf16 %v1018_v42, %v1017_v46  ;;  %v3271_v25 = vpack.c.bf16 %v1020_v4, %v1019_v58  ;;  %711 = vst.msk [vmem:[#allocation4 + $0x158] sm:$0xff] %vm426_vm4, %v4048_v21  ;;  %v1022_v30 = vld [vmem:[%s5192_s2 + $0x78] sm:$0xff]  ;;  %v4073_v48 = vld [vmem:[#allocation2 + $0x120] sm:$0xff]  ;;  %v976_v58 = vld [vmem:[#allocation4 + $0x88] sm:$0xff] }
  0x5c   : > { %861 = vrot.lane.b32.xlu0 %v3730_v45, %s3448_s27  ;;  %3264 = vmatpush3.bf16.msra.mxu0 %v3263_v31  ;;  %v564_v31 = vrot.slane %v4024_v59, 2  ;;  %v3275_v42 = vpack.c.bf16 %v1022_v30, %v1021_v29  ;;  %v407_v53 = vrot.slane %v4073_v48, 1  ;;  %v4108_v6 = vld [vmem:[#allocation2 + $0x138] sm:$0x3]  ;;  %v543_v29 = vrot.slane %v3749_v56, 2  ;;  %v988_v56 = vld [vmem:[#allocation4 + $0xe8] sm:$0xff] }
  0x5d   : > { %3266 = vmatprep.subr.bf16.mxu0 %v3265_v38  ;;  %3190 = vmatmul.mubr.msk.f32.vlgmr.msra.gmra.mrb[0].mxu1 %vm426_vm4, %v964_v54  ;;  %v565_v38 = vrot.slane %v324_v63, 2 }
  0x5e   : > { %3192 = vmatprep.mubr.msk.f32.mxu1 %vm426_vm4, %v967_v55 }
  0x5f   : > { %459 = vrot.lane.b32.xlu1 %v3718_v40, %s3447_s26  ;;  %v4065_v46 = vsel %vm518_vm2, %v564_v31, %v565_v38 }
  0x60   : > { %725 = vrot.lane.b32.xlu0 %v3744_v51, %s3447_s26  ;;  %3268 = vmatpush3.bf16.msra.mxu0 %v3267_v16  ;;  %956 = vst.msk [vmem:[#allocation4 + $0x148] sm:$0xff] %vm426_vm4, %v4065_v46 }
  0x61   : > { %3270 = vmatprep.subr.bf16.mxu0 %v3269_v0  ;;  %3193 = vmatmul.mubr.msk.f32.gmra.mrb[2].mxu1 %vm426_vm4, %v970_v18  ;;  %v973_v0 = vld [vmem:[#allocation4 + $0x70] sm:$0xff] }
  0x62   : > { %3195 = vmatprep.mubr.msk.f32.mxu1 %vm426_vm4, %v973_v0 }
  0x63   : > { %573 = vrot.lane.b32.xlu1 %v3727_v44, %s3446_s25  ;;  %v326_v44 = vld [vmem:[#allocation2 + $0x128] sm:$0x3] }
  0x64   : > { %791 = vrot.lane.b32.xlu0 %v3676_v22, %s3446_s25  ;;  %3272 = vmatpush3.bf16.msra.mxu0 %v3271_v25  ;;  %v408_v54 = vrot.slane %v326_v44, 1  ;;  %v717_v16 = vrot.slane %v326_v44, 2 }
  0x65   : > { %3274 = vmatprep.subr.bf16.mxu0 %v3273_v26  ;;  %3196 = vmatmul.mubr.msk.f32.gmra.mrb[4].mxu1 %vm426_vm4, %v976_v58  ;;  %v546_v26 = vrot.slane %v3735_v50, 2 }
  0x66   : > { %v4081_v55 = vsel %vm361_vm3, %v407_v53, %v408_v54  ;;  %v991_v53 = vld [vmem:[#allocation4 + $0x100] sm:$0xff] }
  0x67   : > { %638 = vrot.lane.b32.xlu1 %v3670_v17, %s3448_s27  ;;  %712 = vst.msk [vmem:[#allocation4 + $0x170] sm:$0xff] %vm426_vm4, %v4081_v55  ;;  %v716_v17 = vrot.slane %v4073_v48, 2 }
  0x68   : > { %863 = vrot.lane.b32.xlu0 %v3754_v57, %s3448_s27  ;;  %3276 = vmatpush3.bf16.msra.mxu0 %v3275_v42 }
  0x69   : > { %v4091_v63 = vsel %vm518_vm2, %v716_v17, %v717_v16  ;;  %v994_v17 = vld [vmem:[#allocation4 + $0x118] sm:$0xff] }
  0x6a   : > { %957 = vst.msk [vmem:[#allocation4 + $0x160] sm:$0xff] %vm426_vm4, %v4091_v63 }
  0x6b   : > { %461 = vrot.lane.b32.xlu1 %v3730_v45, %s3447_s26 }
  0x6c   : > { %727 = vrot.lane.b32.xlu0 %v3765_v61, %s3447_s26 }
  0x6f   : > { %575 = vrot.lane.b32.xlu1 %v3744_v51, %s3446_s25  ;;  %v4103_v51 = vld [vmem:[#allocation2 + $0x130] sm:$0xff] }
  0x70   : > { %793 = vrot.lane.b32.xlu0 %v3702_v33, %s3446_s25  ;;  %v924_v4 = vrot.slane %v4103_v51, 2 }
  0x73   : > { %640 = vrot.lane.b32.xlu1 %v3676_v22, %s3448_s27  ;;  %v925_v22 = vrot.slane %v4108_v6, 2 }
  0x74   : > { %865 = vrot.lane.b32.xlu0 %v3768_v62, %s3448_s27 }
  0x75   : > { %v926_v8 = vsel %vm518_vm2, %v924_v4, %v925_v22 }
  0x76   : > { %958 = vst.msk [vmem:[#allocation4 + $0x178] sm:$0xff] %vm426_vm4, %v926_v8 }
  0x77   : > { %463 = vrot.lane.b32.xlu1 %v3754_v57, %s3447_s26 }
  0x78   : > { %729 = vrot.lane.b32.xlu0 %v3778_v2, %s3447_s26 }
  0x7b   : > { %577 = vrot.lane.b32.xlu1 %v3765_v61, %s3446_s25  ;;  %v979_v61 = vld [vmem:[#allocation4 + $0xa0] sm:$0xff] }
  0x7c   : > { %795 = vrot.lane.b32.xlu0 %v3712_v39, %s3446_s25  ;;  %3198 = vmatprep.mubr.msk.f32.mxu1 %vm426_vm4, %v979_v61 }
  0x7f   : > { %642 = vrot.lane.b32.xlu1 %v3702_v33, %s3448_s27  ;;  %v982_v33 = vld [vmem:[#allocation4 + $0xb8] sm:$0xff] }
  0x80   : > { %867 = vrot.lane.b32.xlu0 %v3788_v7, %s3448_s27  ;;  %3199 = vmatmul.mubr.msk.f32.gmra.mrb[6].mxu1 %vm426_vm4, %v982_v33 }
  0x83   : > { %465 = vrot.lane.b32.xlu1 %v3768_v62, %s3447_s26 }
  0x84   : > { %731 = vrot.lane.b32.xlu0 %v3802_v14, %s3447_s26 }
  0x87   : > { %579 = vrot.lane.b32.xlu1 %v3778_v2, %s3446_s25  ;;  %v310_v2 = vld [vmem:[#allocation2 + $0xa8] sm:$0x3] }
  0x88   : > { %797 = vrot.lane.b32.xlu0 %v3733_v49, %s3446_s25  ;;  %v451_v18 = vrot.slane %v310_v2, 1 }
  0x8b   : > { %644 = vrot.lane.b32.xlu1 %v3712_v39, %s3448_s27  ;;  %v852_v39 = vrot.slane %v3808_v19, 1  ;;  %v452_v19 = vsel %vm361_vm3, %v450_v11, %v451_v18  ;;  %v997_v11 = vld [vmem:[#allocation4 + $0x130] sm:$0xff] }
  0x8c   : > { %869 = vrot.lane.b32.xlu0 %v3805_v15, %s3448_s27 }
  0x8d   : > { %v853_v25 = vsel %vm361_vm3, %v851_v9, %v852_v39 }
  0x8f   : > { %467 = vrot.lane.b32.xlu1 %v3788_v7, %s3447_s26 }
  0x90   : > { %733 = vrot.lane.b32.xlu0 %v3823_v23, %s3447_s26  ;;  %v547_v23 = vrot.slane %v3857_v43, 2 }
  0x92   : > { %v548_v30 = vsel %vm518_vm2, %v546_v26, %v547_v23 }
  0x93   : > { %581 = vrot.lane.b32.xlu1 %v3802_v14, %s3446_s25  ;;  %v544_v14 = vrot.slane %v310_v2, 2 }
  0x94   : > { %799 = vrot.lane.b32.xlu0 %v3791_v10, %s3446_s25 }
  0x95   : > { %v545_v10 = vsel %vm518_vm2, %v543_v29, %v544_v14 }
  0x97   : > { %646 = vrot.lane.b32.xlu1 %v3733_v49, %s3448_s27  ;;  %v985_v49 = vld [vmem:[#allocation4 + $0xd0] sm:$0xff] }
  0x98   : > { %871 = vrot.lane.b32.xlu0 %v853_v25, %s3448_s27  ;;  %3201 = vmatprep.mubr.msk.f32.mxu1 %vm426_vm4, %v985_v49  ;;  %v1000_v25 = vld [vmem:[#allocation4 + $0x148] sm:$0xff] }
  0x99   : > { %3202 = vmatmul.mubr.msk.f32.gmra.mrb[8].mxu1 %vm426_vm4, %v988_v56 }
  0x9a   : > { %3204 = vmatprep.mubr.msk.f32.mxu1 %vm426_vm4, %v991_v53 }
  0x9b   : > { %469 = vrot.lane.b32.xlu1 %v452_v19, %s3447_s26 }
  0x9c   : > { %735 = vrot.lane.b32.xlu0 %v548_v30, %s3447_s26 }
  0x9d   : > { %3205 = vmatmul.mubr.msk.f32.gmra.mrb[10].mxu1 %vm426_vm4, %v994_v17  ;;  %v854_v17 = vrot.slane %v4103_v51, 1 }
  0x9e   : > { %3207 = vmatprep.mubr.msk.f32.mxu1 %vm426_vm4, %v997_v11 }
  0x9f   : > { %583 = vrot.lane.b32.xlu1 %v545_v10, %s3446_s25 }
  0xa0   : > { %801 = vrot.lane.b32.xlu0 %v3771_v1, %s3446_s25 }
  0xa1   : > { %3208 = vmatmul.mubr.msk.f32.gmra.mrb[12].mxu1 %vm426_vm4, %v1000_v25 }
  0xa3   : > { %648 = vrot.lane.b32.xlu1 %v3735_v50, %s3448_s27 }
  0xa4   : > { %873 = vrot.lane.b32.xlu0 %v3870_v60, %s3448_s27 }
  0xa7   : > { %471 = vrot.lane.b32.xlu1 %v3908_v13, %s3447_s26 }
  0xa8   : > { %737 = vrot.lane.b32.xlu0 %v3884_v3, %s3447_s26 }
  0xab   : > { %585 = vrot.lane.b32.xlu1 %v548_v30, %s3446_s25 }
  0xac   : > { %803 = vrot.lane.b32.xlu0 %v3840_v35, %s3446_s25  ;;  %v786_v50 = vpop.permute.xlu1 %785 }
  0xae   : > { %v720_v43 = vpop.permute.xlu0 %719 }
  0xaf   : > { %650 = vrot.lane.b32.xlu1 %v3771_v1, %s3448_s27  ;;  %767 = vst.msk [vmem:[#allocation4 + $0x8] sm:$0xff] %vm501_vm5, %v720_v43 }
  0xb0   : > { %833 = vst.msk [vmem:[#allocation4 + $0x8] sm:$0xff] %vm615_vm6, %v786_v50  ;;  %875 = vrot.lane.b32.xlu0 %v3934_v37, %s3448_s27  ;;  %v568_v31 = vpop.permute.xlu1 %567 }
  0xb2   : > { %v454_v38 = vpop.permute.xlu0 %453 }
  0xb3   : > { %473 = vrot.lane.b32.xlu1 %v3870_v60, %s3447_s26  ;;  %502 = vst.msk [vmem:[#allocation4] sm:$0xff] %vm501_vm5, %v454_v38 }
  0xb4   : > { %616 = vst.msk [vmem:[#allocation4] sm:$0xff] %vm615_vm6, %v568_v31  ;;  %739 = vrot.lane.b32.xlu0 %v3943_v12, %s3447_s26  ;;  %v1003_v31 = vld [vmem:[#allocation4 + $0x160] sm:$0xff] }
  0xb5   : > { %v633_v1 = vpop.permute.xlu1 %632  ;;  %3210 = vmatprep.mubr.msk.f32.mxu1 %vm426_vm4, %v1003_v31 }
  0xb6   : > { %681 = vst.msk [vmem:[#allocation4] sm:$0xff] %vm680_vm7, %v633_v1  ;;  %v858_v42 = vpop.permute.xlu0 %857  ;;  %v1006_v1 = vld [vmem:[#allocation4 + $0x178] sm:$0xff] }
  0xb7   : > { %587 = vrot.lane.b32.xlu1 %v3884_v3, %s3446_s25  ;;  %905 = vst.msk [vmem:[#allocation4 + $0x8] sm:$0xff] %vm680_vm7, %v858_v42  ;;  %3211 = vmatmul.mubr.msk.f32.gmra.mrb[14].mxu1 %vm426_vm4, %v1006_v1 }
  0xb8   : > { %805 = vrot.lane.b32.xlu0 %v3879_v5, %s3446_s25 }
  0xb9   : > { %v4194_v44 = vpop.permute.xlu1 %455 }
  0xba   : > { %503 = vst.msk [vmem:[#allocation4 + $0x18] sm:$0xff] %vm501_vm5, %v4194_v44  ;;  %v722_v54 = vpop.permute.xlu0 %721 }
  0xbb   : > { %652 = vrot.lane.b32.xlu1 %v3840_v35, %s3448_s27  ;;  %768 = vst.msk [vmem:[#allocation4 + $0x20] sm:$0xff] %vm501_vm5, %v722_v54 }
  0xbc   : > { %877 = vrot.lane.b32.xlu0 %v3977_v20, %s3448_s27 }
  0xbd   : > { %v570_v3 = vpop.permute.xlu1 %569  ;;  %v959_v16 = vld [vmem:[#allocation4] sm:$0xff] }
  0xbe   : > { %617 = vst.msk [vmem:[#allocation4 + $0x18] sm:$0xff] %vm615_vm6, %v570_v3  ;;  %v788_v0 = vpop.permute.xlu0 %787  ;;  %v960_v58 = vld [vmem:[#allocation4 + $0x8] sm:$0xff]  ;;  %v855_v3 = vrot.slane %v4108_v6, 1 }
  0xbf   : > { %475 = vrot.lane.b32.xlu1 %v3934_v37, %s3447_s26  ;;  %834 = vst.msk [vmem:[#allocation4 + $0x20] sm:$0xff] %vm615_vm6, %v788_v0  ;;  %1171 = vmatprep.mubr.f32.mxu0 %v960_v58 }
  0xc0   : > { %741 = vrot.lane.b32.xlu0 %v3983_v28, %s3447_s26  ;;  %1172 = vmatmul.mubr.f32.vlgmr.msra.gmra.mrb[0].mxu0 %v959_v16 }
  0xc1   : > { %v635_v35 = vpop.permute.xlu1 %634 }
  0xc2   : > { %682 = vst.msk [vmem:[#allocation4 + $0x18] sm:$0xff] %vm680_vm7, %v635_v35  ;;  %v860_v4 = vpop.permute.xlu0 %859 }
  0xc3   : > { %589 = vrot.lane.b32.xlu1 %v3943_v12, %s3446_s25  ;;  %906 = vst.msk [vmem:[#allocation4 + $0x20] sm:$0xff] %vm680_vm7, %v860_v4 }
  0xc4   : > { %807 = vrot.lane.b32.xlu0 %v3936_v41, %s3446_s25 }
  0xc5   : > { %v4217_v22 = vpop.permute.xlu1 %457 }
  0xc6   : > { %504 = vst.msk [vmem:[#allocation4 + $0x30] sm:$0xff] %vm501_vm5, %v4217_v22  ;;  %v724_v8 = vpop.permute.xlu0 %723 }
  0xc7   : > { %654 = vrot.lane.b32.xlu1 %v3879_v5, %s3448_s27  ;;  %769 = vst.msk [vmem:[#allocation4 + $0x38] sm:$0xff] %vm501_vm5, %v724_v8 }
  0xc8   : > { %879 = vrot.lane.b32.xlu0 %v3986_v27, %s3448_s27 }
  0xc9   : > { %v572_v12 = vpop.permute.xlu1 %571  ;;  %v962_v61 = vld [vmem:[#allocation4 + $0x18] sm:$0xff] }
  0xca   : > { %618 = vst.msk [vmem:[#allocation4 + $0x30] sm:$0xff] %vm615_vm6, %v572_v12  ;;  %v790_v33 = vpop.permute.xlu0 %789  ;;  %v963_v2 = vld [vmem:[#allocation4 + $0x20] sm:$0xff] }
  0xcb   : > { %477 = vrot.lane.b32.xlu1 %v3977_v20, %s3447_s26  ;;  %835 = vst.msk [vmem:[#allocation4 + $0x38] sm:$0xff] %vm615_vm6, %v790_v33  ;;  %1176 = vmatprep.mubr.f32.mxu0 %v963_v2 }
  0xcc   : > { %743 = vrot.lane.b32.xlu0 %v3996_v32, %s3447_s26  ;;  %1177 = vmatmul.mubr.f32.gmra.mrb[2].mxu0 %v962_v61 }
  0xcd   : > { %v637_v5 = vpop.permute.xlu1 %636 }
  0xce   : > { %683 = vst.msk [vmem:[#allocation4 + $0x30] sm:$0xff] %vm680_vm7, %v637_v5  ;;  %v862_v9 = vpop.permute.xlu0 %861 }
  0xcf   : > { %591 = vrot.lane.b32.xlu1 %v3983_v28, %s3446_s25  ;;  %907 = vst.msk [vmem:[#allocation4 + $0x38] sm:$0xff] %vm680_vm7, %v862_v9 }
  0xd0   : > { %809 = vrot.lane.b32.xlu0 %v3949_v52, %s3446_s25 }
  0xd1   : > { %v4238_v39 = vpop.permute.xlu1 %459 }
  0xd2   : > { %505 = vst.msk [vmem:[#allocation4 + $0x48] sm:$0xff] %vm501_vm5, %v4238_v39  ;;  %v726_v18 = vpop.permute.xlu0 %725 }
  0xd3   : > { %656 = vrot.lane.b32.xlu1 %v3936_v41, %s3448_s27  ;;  %770 = vst.msk [vmem:[#allocation4 + $0x50] sm:$0xff] %vm501_vm5, %v726_v18 }
  0xd4   : > { %881 = vrot.lane.b32.xlu0 %v3999_v36, %s3448_s27 }
  0xd5   : > { %v574_v28 = vpop.permute.xlu1 %573  ;;  %v965_v26 = vld [vmem:[#allocation4 + $0x30] sm:$0xff] }
  0xd6   : > { %619 = vst.msk [vmem:[#allocation4 + $0x48] sm:$0xff] %vm615_vm6, %v574_v28  ;;  %v792_v23 = vpop.permute.xlu0 %791  ;;  %v966_v19 = vld [vmem:[#allocation4 + $0x38] sm:$0xff] }
  0xd7   : > { %479 = vrot.lane.b32.xlu1 %v3986_v27, %s3447_s26  ;;  %836 = vst.msk [vmem:[#allocation4 + $0x50] sm:$0xff] %vm615_vm6, %v792_v23  ;;  %1181 = vmatprep.mubr.f32.mxu0 %v966_v19 }
  0xd8   : > { %745 = vrot.lane.b32.xlu0 %v4012_v47, %s3447_s26  ;;  %1182 = vmatmul.mubr.f32.gmra.mrb[4].mxu0 %v965_v26 }
  0xd9   : > { %v639_v41 = vpop.permute.xlu1 %638 }
  0xda   : > { %684 = vst.msk [vmem:[#allocation4 + $0x48] sm:$0xff] %vm680_vm7, %v639_v41  ;;  %v864_v29 = vpop.permute.xlu0 %863 }
  0xdb   : > { %593 = vrot.lane.b32.xlu1 %v3996_v32, %s3446_s25  ;;  %908 = vst.msk [vmem:[#allocation4 + $0x50] sm:$0xff] %vm680_vm7, %v864_v29 }
  0xdc   : > { %811 = vrot.lane.b32.xlu0 %v4024_v59, %s3446_s25 }
  0xdd   : > { %v4261_v14 = vpop.permute.xlu1 %461 }
  0xde   : > { %506 = vst.msk [vmem:[#allocation4 + $0x60] sm:$0xff] %vm501_vm5, %v4261_v14  ;;  %v728_v30 = vpop.permute.xlu0 %727 }
  0xdf   : > { %658 = vrot.lane.b32.xlu1 %v3949_v52, %s3448_s27  ;;  %771 = vst.msk [vmem:[#allocation4 + $0x68] sm:$0xff] %vm501_vm5, %v728_v30 }
  0xe0   : > { %883 = vrot.lane.b32.xlu0 %v4048_v21, %s3448_s27 }
  0xe1   : > { %v576_v32 = vpop.permute.xlu1 %575  ;;  %v968_v10 = vld [vmem:[#allocation4 + $0x48] sm:$0xff] }
  0xe2   : > { %620 = vst.msk [vmem:[#allocation4 + $0x60] sm:$0xff] %vm615_vm6, %v576_v32  ;;  %v794_v49 = vpop.permute.xlu0 %793  ;;  %v969_v56 = vld [vmem:[#allocation4 + $0x50] sm:$0xff] }
  0xe3   : > { %481 = vrot.lane.b32.xlu1 %v3999_v36, %s3447_s26  ;;  %837 = vst.msk [vmem:[#allocation4 + $0x68] sm:$0xff] %vm615_vm6, %v794_v49  ;;  %1186 = vmatprep.mubr.f32.mxu0 %v969_v56 }
  0xe4   : > { %747 = vrot.lane.b32.xlu0 %v4065_v46, %s3447_s26  ;;  %1187 = vmatmul.mubr.f32.gmra.mrb[6].mxu0 %v968_v10 }
  0xe5   : > { %v641_v52 = vpop.permute.xlu1 %640 }
  0xe6   : > { %685 = vst.msk [vmem:[#allocation4 + $0x60] sm:$0xff] %vm680_vm7, %v641_v52  ;;  %v866_v50 = vpop.permute.xlu0 %865 }
  0xe7   : > { %595 = vrot.lane.b32.xlu1 %v4012_v47, %s3446_s25  ;;  %909 = vst.msk [vmem:[#allocation4 + $0x68] sm:$0xff] %vm680_vm7, %v866_v50 }
  0xe8   : > { %813 = vrot.lane.b32.xlu0 %v4073_v48, %s3446_s25 }
  0xe9   : > { %v4282_v43 = vpop.permute.xlu1 %463 }
  0xea   : > { %507 = vst.msk [vmem:[#allocation4 + $0x78] sm:$0xff] %vm501_vm5, %v4282_v43  ;;  %v730_v38 = vpop.permute.xlu0 %729 }
  0xeb   : > { %660 = vrot.lane.b32.xlu1 %v4024_v59, %s3448_s27  ;;  %772 = vst.msk [vmem:[#allocation4 + $0x80] sm:$0xff] %vm501_vm5, %v730_v38 }
  0xec   : > { %885 = vrot.lane.b32.xlu0 %v4081_v55, %s3448_s27 }
  0xed   : > { %v578_v47 = vpop.permute.xlu1 %577  ;;  %v971_v42 = vld [vmem:[#allocation4 + $0x60] sm:$0xff] }
  0xee   : > { %621 = vst.msk [vmem:[#allocation4 + $0x78] sm:$0xff] %vm615_vm6, %v578_v47  ;;  %v796_v53 = vpop.permute.xlu0 %795  ;;  %v972_v54 = vld [vmem:[#allocation4 + $0x68] sm:$0xff] }
  0xef   : > { %483 = vrot.lane.b32.xlu1 %v4048_v21, %s3447_s26  ;;  %838 = vst.msk [vmem:[#allocation4 + $0x80] sm:$0xff] %vm615_vm6, %v796_v53  ;;  %1191 = vmatprep.mubr.f32.mxu0 %v972_v54 }
  0xf0   : > { %749 = vrot.lane.b32.xlu0 %v4091_v63, %s3447_s26  ;;  %1192 = vmatmul.mubr.f32.gmra.mrb[8].mxu0 %v971_v42  ;;  %v856_v63 = vsel %vm361_vm3, %v854_v17, %v855_v3  ;;  %v1527_v17 = vld [vmem:[#allocation3 + $0x8] sm:$0x3] }
  0xf1   : > { %v643_v59 = vpop.permute.xlu1 %642 }
  0xf2   : > { %686 = vst.msk [vmem:[#allocation4 + $0x78] sm:$0xff] %vm680_vm7, %v643_v59  ;;  %v868_v16 = vpop.permute.xlu0 %867  ;;  %v1526_v59 = vld [vmem:[#allocation3] sm:$0xff] }
  0xf3   : > { %597 = vrot.lane.b32.xlu1 %v4065_v46, %s3446_s25  ;;  %910 = vst.msk [vmem:[#allocation4 + $0x80] sm:$0xff] %vm680_vm7, %v868_v16  ;;  %v1614_v16 = vrot.slane %v1526_v59, 1 }
  0xf4   : > { %815 = vrot.lane.b32.xlu0 %v4103_v51, %s3446_s25  ;;  %1566 = vst.msk [vmem:[#allocation4] sm:$0xff] %vm426_vm4, %v1526_v59 }
  0xf5   : > { %v4307_v0 = vpop.permute.xlu1 %465 }
  0xf6   : > { %508 = vst.msk [vmem:[#allocation4 + $0x90] sm:$0xff] %vm501_vm5, %v4307_v0  ;;  %v732_v58 = vpop.permute.xlu0 %731 }
  0xf7   : > { %662 = vrot.lane.b32.xlu1 %v4073_v48, %s3448_s27  ;;  %773 = vst.msk [vmem:[#allocation4 + $0x98] sm:$0xff] %vm501_vm5, %v732_v58 }
  0xf8   : > { %887 = vrot.lane.b32.xlu0 %v856_v63, %s3448_s27  ;;  %v1615_v63 = vrot.slane %v1527_v17, 1 }
  0xf9   : > { %v580_v46 = vpop.permute.xlu1 %579  ;;  %v974_v6 = vld [vmem:[#allocation4 + $0x78] sm:$0xff] }
  0xfa   : > { %622 = vst.msk [vmem:[#allocation4 + $0x90] sm:$0xff] %vm615_vm6, %v580_v46  ;;  %v798_v51 = vpop.permute.xlu0 %797  ;;  %v975_v35 = vld [vmem:[#allocation4 + $0x80] sm:$0xff]  ;;  %v1616_v46 = vsel %vm361_vm3, %v1614_v16, %v1615_v63 }
  0xfb   : > { %839 = vst.msk [vmem:[#allocation4 + $0x98] sm:$0xff] %vm615_vm6, %v798_v51  ;;  %1196 = vmatprep.mubr.f32.mxu0 %v975_v35  ;;  %1662 = vrot.lane.b32.xlu1 %v1616_v46, %s3447_s26  ;;  %v1726_v35 = vrot.slane %v1526_v59, 2 }
  0xfc   : > { %1197 = vmatmul.mubr.f32.gmra.mrb[10].mxu0 %v974_v6 }
  0xfd   : > { %v645_v4 = vpop.permute.xlu1 %644 }
  0xfe   : > { %687 = vst.msk [vmem:[#allocation4 + $0x90] sm:$0xff] %vm680_vm7, %v645_v4  ;;  %v870_v8 = vpop.permute.xlu0 %869  ;;  %v1727_v4 = vrot.slane %v1527_v17, 2 }
  0xff   : > { %911 = vst.msk [vmem:[#allocation4 + $0x98] sm:$0xff] %vm680_vm7, %v870_v8 }
 0x101   : > { %v4320_v48 = vpop.permute.xlu1 %467 }
 0x102   : > { %509 = vst.msk [vmem:[#allocation4 + $0xa8] sm:$0xff] %vm501_vm5, %v4320_v48  ;;  %v734_v12 = vpop.permute.xlu0 %733 }
 0x103   : > { %774 = vst.msk [vmem:[#allocation4 + $0xb0] sm:$0xff] %vm501_vm5, %v734_v12 }
 0x105   : > { %v582_v61 = vpop.permute.xlu1 %581  ;;  %v977_v33 = vld [vmem:[#allocation4 + $0x90] sm:$0xff] }
 0x106   : > { %623 = vst.msk [vmem:[#allocation4 + $0xa8] sm:$0xff] %vm615_vm6, %v582_v61  ;;  %v800_v2 = vpop.permute.xlu0 %799  ;;  %v978_v5 = vld [vmem:[#allocation4 + $0x98] sm:$0xff]  ;;  %v1728_v61 = vsel %vm518_vm2, %v1726_v35, %v1727_v4 }
 0x107   : > { %840 = vst.msk [vmem:[#allocation4 + $0xb0] sm:$0xff] %vm615_vm6, %v800_v2  ;;  %1201 = vmatprep.mubr.f32.mxu0 %v978_v5  ;;  %1774 = vrot.lane.b32.xlu1 %v1728_v61, %s3446_s25  ;;  %v1547_v2 = vld [vmem:[#allocation3 + $0xa8] sm:$0x3] }
 0x108   : > { %1202 = vmatmul.mubr.f32.gmra.mrb[12].mxu0 %v977_v33  ;;  %v1546_v33 = vld [vmem:[#allocation3 + $0xa0] sm:$0xff] }
 0x109   : > { %v647_v9 = vpop.permute.xlu1 %646 }
 0x10a   : > { %688 = vst.msk [vmem:[#allocation4 + $0xa8] sm:$0xff] %vm680_vm7, %v647_v9  ;;  %v872_v11 = vpop.permute.xlu0 %871 }
 0x10b   : > { %912 = vst.msk [vmem:[#allocation4 + $0xb0] sm:$0xff] %vm680_vm7, %v872_v11  ;;  %v1638_v11 = vrot.slane %v1546_v33, 1 }
 0x10d   : > { %v470_v18 = vpop.permute.xlu1 %469 }
 0x10e   : > { %510 = vst.msk [vmem:[#allocation4 + $0xc0] sm:$0xff] %vm501_vm5, %v470_v18  ;;  %v736_v25 = vpop.permute.xlu0 %735  ;;  %v1639_v18 = vrot.slane %v1547_v2, 1 }
 0x10f   : > { %775 = vst.msk [vmem:[#allocation4 + $0xc8] sm:$0xff] %vm501_vm5, %v736_v25 }
 0x111   : > { %v584_v28 = vpop.permute.xlu1 %583  ;;  %v980_v26 = vld [vmem:[#allocation4 + $0xa8] sm:$0xff] }
 0x112   : > { %624 = vst.msk [vmem:[#allocation4 + $0xc0] sm:$0xff] %vm615_vm6, %v584_v28  ;;  %v802_v23 = vpop.permute.xlu0 %801  ;;  %v981_v19 = vld [vmem:[#allocation4 + $0xb0] sm:$0xff] }
 0x113   : > { %841 = vst.msk [vmem:[#allocation4 + $0xc8] sm:$0xff] %vm615_vm6, %v802_v23  ;;  %1206 = vmatprep.mubr.f32.mxu0 %v981_v19 }
 0x114   : > { %1207 = vmatmul.mubr.f32.gmra.mrb[14].mxu0 %v980_v26  ;;  %v1544_v26 = vld [vmem:[#allocation3 + $0x90] sm:$0xff] }
 0x115   : > { %v649_v41 = vpop.permute.xlu1 %648  ;;  %2030 = vrot.lane.b32.xlu0 %v1544_v26, %s3446_s25 }
 0x116   : > { %689 = vst.msk [vmem:[#allocation4 + $0xc0] sm:$0xff] %vm680_vm7, %v649_v41  ;;  %v874_v29 = vpop.permute.xlu0 %873  ;;  %v1545_v41 = vld [vmem:[#allocation3 + $0x98] sm:$0x3] }
 0x117   : > { %913 = vst.msk [vmem:[#allocation4 + $0xc8] sm:$0xff] %vm680_vm7, %v874_v29  ;;  %v1640_v29 = vsel %vm361_vm3, %v1638_v11, %v1639_v18  ;;  %v2153_v11 = vrot.slane %v1545_v41, 2 }
 0x118   : > { %1678 = vrot.lane.b32.xlu1 %v1640_v29, %s3447_s26 }
 0x119   : > { %v4335_v30 = vpop.permute.xlu1 %471 }
 0x11a   : > { %511 = vst.msk [vmem:[#allocation4 + $0xd8] sm:$0xff] %vm501_vm5, %v4335_v30  ;;  %v738_v32 = vpop.permute.xlu0 %737 }
 0x11b   : > { %776 = vst.msk [vmem:[#allocation4 + $0xe0] sm:$0xff] %vm501_vm5, %v738_v32  ;;  %v2082_v32 = vrot.slane %v1544_v26, 1 }
 0x11d   : > { %v586_v10 = vpop.permute.xlu1 %585  ;;  %v983_v49 = vld [vmem:[#allocation4 + $0xc0] sm:$0xff] }
 0x11e   : > { %625 = vst.msk [vmem:[#allocation4 + $0xd8] sm:$0xff] %vm615_vm6, %v586_v10  ;;  %v804_v56 = vpop.permute.xlu0 %803  ;;  %v984_v52 = vld [vmem:[#allocation4 + $0xc8] sm:$0xff]  ;;  %v2083_v10 = vrot.slane %v1545_v41, 1  ;;  %v2270_v41 = vld [vmem:[%s5193_s3 + $0x100] sm:$0xff] }
 0x11f   : > { %842 = vst.msk [vmem:[#allocation4 + $0xe0] sm:$0xff] %vm615_vm6, %v804_v56  ;;  %1211 = vmatprep.mubr.f32.mxu0 %v984_v52  ;;  %v1750_v56 = vrot.slane %v1546_v33, 2  ;;  %v1751_v52 = vrot.slane %v1547_v2, 2 }
 0x120   : > { %1212 = vmatmul.mubr.f32.gmra.mrb[16].mxu0 %v983_v49  ;;  %1574 = vst.msk [vmem:[#allocation4 + $0xc0] sm:$0xff] %vm426_vm4, %v1546_v33 }
 0x121   : > { %v651_v50 = vpop.permute.xlu1 %650 }
 0x122   : > { %690 = vst.msk [vmem:[#allocation4 + $0xd8] sm:$0xff] %vm680_vm7, %v651_v50  ;;  %v876_v31 = vpop.permute.xlu0 %875  ;;  %v2084_v50 = vsel %vm361_vm3, %v2082_v32, %v2083_v10  ;;  %v2271_v32 = vld [vmem:[%s5193_s3 + $0x108] sm:$0xff] }
 0x123   : > { %914 = vst.msk [vmem:[#allocation4 + $0xe0] sm:$0xff] %vm680_vm7, %v876_v31  ;;  %2102 = vrot.lane.b32.xlu0 %v2084_v50, %s3448_s27 }
 0x125   : > { %v4344_v38 = vpop.permute.xlu1 %473 }
 0x126   : > { %512 = vst.msk [vmem:[#allocation4 + $0xf0] sm:$0xff] %vm501_vm5, %v4344_v38  ;;  %v740_v1 = vpop.permute.xlu0 %739 }
 0x127   : > { %777 = vst.msk [vmem:[#allocation4 + $0xf8] sm:$0xff] %vm501_vm5, %v740_v1  ;;  %v1752_v1 = vsel %vm518_vm2, %v1750_v56, %v1751_v52 }
 0x128   : > { %1790 = vrot.lane.b32.xlu1 %v1752_v1, %s3446_s25  ;;  %v2273_v1 = vld [vmem:[%s5193_s3 + $0x118] sm:$0xff] }
 0x129   : > { %v588_v47 = vpop.permute.xlu1 %587  ;;  %v986_v42 = vld [vmem:[#allocation4 + $0xd8] sm:$0xff] }
 0x12a   : > { %626 = vst.msk [vmem:[#allocation4 + $0xf0] sm:$0xff] %vm615_vm6, %v588_v47  ;;  %v806_v53 = vpop.permute.xlu0 %805  ;;  %v987_v54 = vld [vmem:[#allocation4 + $0xe0] sm:$0xff] }
 0x12b   : > { %843 = vst.msk [vmem:[#allocation4 + $0xf8] sm:$0xff] %vm615_vm6, %v806_v53  ;;  %1216 = vmatprep.mubr.f32.mxu0 %v987_v54 }
 0x12c   : > { %1217 = vmatmul.mubr.f32.gmra.mrb[18].mxu0 %v986_v42  ;;  %v4387_v42 = vld [vmem:[#allocation3 + $0x130] sm:$0xff] }
 0x12d   : > { %v653_v3 = vpop.permute.xlu1 %652  ;;  %2046 = vrot.lane.b32.xlu0 %v4387_v42, %s3446_s25 }
 0x12e   : > { %691 = vst.msk [vmem:[#allocation4 + $0xf0] sm:$0xff] %vm680_vm7, %v653_v3  ;;  %v878_v58 = vpop.permute.xlu0 %877 }
 0x12f   : > { %915 = vst.msk [vmem:[#allocation4 + $0xf8] sm:$0xff] %vm680_vm7, %v878_v58 }
 0x130   : > { %v4358_v51 = vpop.f32.mrb[0].mxu1 }
 0x131   : > { %v4356_v6 = vpop.permute.xlu1 %475  ;;  %v4362_v8 = vpop.f32.mrb[1].mxu1 }
 0x132   : > { %513 = vst.msk [vmem:[#allocation4 + $0x108] sm:$0xff] %vm501_vm5, %v4356_v6  ;;  %v742_v12 = vpop.permute.xlu0 %741 }
 0x133   : > { %778 = vst.msk [vmem:[#allocation4 + $0x110] sm:$0xff] %vm501_vm5, %v742_v12 }
 0x134   : > { %v4367_v9 = vpop.f32.mrb[2].mxu1 }
 0x135   : > { %v590_v5 = vpop.permute.xlu1 %589  ;;  %v989_v25 = vld [vmem:[#allocation4 + $0xf0] sm:$0xff]  ;;  %v4371_v28 = vpop.f32.mrb[3].mxu1 }
 0x136   : > { %627 = vst.msk [vmem:[#allocation4 + $0x108] sm:$0xff] %vm615_vm6, %v590_v5  ;;  %v808_v23 = vpop.permute.xlu0 %807  ;;  %v990_v19 = vld [vmem:[#allocation4 + $0xf8] sm:$0xff]  ;;  %v2152_v5 = vrot.slane %v1544_v26, 2 }
 0x137   : > { %844 = vst.msk [vmem:[#allocation4 + $0x110] sm:$0xff] %vm615_vm6, %v808_v23  ;;  %1221 = vmatprep.mubr.f32.mxu0 %v990_v19 }
 0x138   : > { %1222 = vmatmul.mubr.f32.gmra.mrb[20].mxu0 %v989_v25  ;;  %v4398_v46 = vpop.f32.mrb[4].mxu1  ;;  %v2154_v25 = vsel %vm518_vm2, %v2152_v5, %v2153_v11 }
 0x139   : > { %v655_v49 = vpop.permute.xlu1 %654  ;;  %v4402_v35 = vpop.f32.mrb[5].mxu1  ;;  %2181 = vst.msk [vmem:[#allocation4 + $0xb8] sm:$0xff] %vm426_vm4, %v2154_v25 }
 0x13a   : > { %692 = vst.msk [vmem:[#allocation4 + $0x108] sm:$0xff] %vm680_vm7, %v655_v49  ;;  %v880_v31 = vpop.permute.xlu0 %879  ;;  %v4423_v49 = vpack.c.bf16 %v2271_v32, %v2270_v41  ;;  %v1043_v32 = vld [vmem:[%s3489_s21] sm:$0xff] }
 0x13b   : > { %916 = vst.msk [vmem:[#allocation4 + $0x110] sm:$0xff] %vm680_vm7, %v880_v31  ;;  %v2272_v31 = vld [vmem:[%s5193_s3 + $0x110] sm:$0xff] }
 0x13c   : > { %3318 = vmatprep.subr.bf16.mxu0 %v4423_v49 }
 0x13d   : > { %v4383_v47 = vpop.permute.xlu1 %477  ;;  %3320 = vmatpush3.bf16.msra.mxu0 %v4423_v49 }
 0x13e   : > { %514 = vst.msk [vmem:[#allocation4 + $0x120] sm:$0xff] %vm501_vm5, %v4383_v47  ;;  %v744_v53 = vpop.permute.xlu0 %743 }
 0x13f   : > { %779 = vst.msk [vmem:[#allocation4 + $0x128] sm:$0xff] %vm501_vm5, %v744_v53  ;;  %v4435_v53 = vpack.c.bf16 %v2273_v1, %v2272_v31  ;;  %v1044_v1 = vld [vmem:[%s3489_s21 + $0x8] sm:$0xff] }
 0x141   : > { %v592_v54 = vpop.permute.xlu1 %591  ;;  %v992_v59 = vld [vmem:[#allocation4 + $0x108] sm:$0xff]  ;;  %3322 = vmatprep.subr.bf16.mxu0 %v4435_v53 }
 0x142   : > { %628 = vst.msk [vmem:[#allocation4 + $0x120] sm:$0xff] %vm615_vm6, %v592_v54  ;;  %v810_v17 = vpop.permute.xlu0 %809  ;;  %v993_v3 = vld [vmem:[#allocation4 + $0x110] sm:$0xff]  ;;  %3324 = vmatpush3.bf16.msra.mxu0 %v4435_v53 }
 0x143   : > { %845 = vst.msk [vmem:[#allocation4 + $0x128] sm:$0xff] %vm615_vm6, %v810_v17  ;;  %1226 = vmatprep.mubr.f32.mxu0 %v993_v3 }
 0x144   : > { %1227 = vmatmul.mubr.f32.gmra.mrb[22].mxu0 %v992_v59 }
 0x145   : > { %v657_v16 = vpop.permute.xlu1 %656 }
 0x146   : > { %693 = vst.msk [vmem:[#allocation4 + $0x120] sm:$0xff] %vm680_vm7, %v657_v16  ;;  %v882_v63 = vpop.permute.xlu0 %881 }
 0x147   : > { %917 = vst.msk [vmem:[#allocation4 + $0x128] sm:$0xff] %vm680_vm7, %v882_v63 }
 0x149   : > { %v4396_v58 = vpop.permute.xlu1 %479 }
 0x14a   : > { %515 = vst.msk [vmem:[#allocation4 + $0x138] sm:$0xff] %vm501_vm5, %v4396_v58  ;;  %v746_v4 = vpop.permute.xlu0 %745 }
 0x14b   : > { %780 = vst.msk [vmem:[#allocation4 + $0x140] sm:$0xff] %vm501_vm5, %v746_v4 }
 0x14d   : > { %v594_v12 = vpop.permute.xlu1 %593  ;;  %v995_v61 = vld [vmem:[#allocation4 + $0x120] sm:$0xff] }
 0x14e   : > { %629 = vst.msk [vmem:[#allocation4 + $0x138] sm:$0xff] %vm615_vm6, %v594_v12  ;;  %v812_v33 = vpop.permute.xlu0 %811  ;;  %v996_v2 = vld [vmem:[#allocation4 + $0x128] sm:$0xff] }
 0x14f   : > { %846 = vst.msk [vmem:[#allocation4 + $0x140] sm:$0xff] %vm615_vm6, %v812_v33  ;;  %1231 = vmatprep.mubr.f32.mxu0 %v996_v2 }
 0x150   : > { %1232 = vmatmul.mubr.f32.gmra.mrb[24].mxu0 %v995_v61 }
 0x151   : > { %v659_v18 = vpop.permute.xlu1 %658 }
 0x152   : > { %694 = vst.msk [vmem:[#allocation4 + $0x138] sm:$0xff] %vm680_vm7, %v659_v18  ;;  %v884_v23 = vpop.permute.xlu0 %883 }
 0x153   : > { %918 = vst.msk [vmem:[#allocation4 + $0x140] sm:$0xff] %vm680_vm7, %v884_v23  ;;  %v4441_v17 = vpop.f32.mrb[6].mxu1 }
 0x154   : > { %v4446_v3 = vpop.f32.mrb[7].mxu1 }
 0x155   : > { %v4411_v19 = vpop.permute.xlu1 %481 }
 0x156   : > { %516 = vst.msk [vmem:[#allocation4 + $0x150] sm:$0xff] %vm501_vm5, %v4411_v19  ;;  %v748_v29 = vpop.permute.xlu0 %747 }
 0x157   : > { %781 = vst.msk [vmem:[#allocation4 + $0x158] sm:$0xff] %vm501_vm5, %v748_v29 }
 0x159   : > { %v596_v26 = vpop.permute.xlu1 %595  ;;  %v998_v10 = vld [vmem:[#allocation4 + $0x138] sm:$0xff] }
 0x15a   : > { %630 = vst.msk [vmem:[#allocation4 + $0x150] sm:$0xff] %vm615_vm6, %v596_v26  ;;  %v814_v56 = vpop.permute.xlu0 %813  ;;  %v999_v52 = vld [vmem:[#allocation4 + $0x140] sm:$0xff] }
 0x15b   : > { %847 = vst.msk [vmem:[#allocation4 + $0x158] sm:$0xff] %vm615_vm6, %v814_v56  ;;  %1236 = vmatprep.mubr.f32.mxu0 %v999_v52 }
 0x15c   : > { %1237 = vmatmul.mubr.f32.gmra.mrb[26].mxu0 %v998_v10 }
 0x15d   : > { %v661_v50 = vpop.permute.xlu1 %660 }
 0x15e   : > { %695 = vst.msk [vmem:[#allocation4 + $0x150] sm:$0xff] %vm680_vm7, %v661_v50  ;;  %v886_v54 = vpop.permute.xlu0 %885 }
 0x15f   : > { %919 = vst.msk [vmem:[#allocation4 + $0x158] sm:$0xff] %vm680_vm7, %v886_v54 }
 0x161   : > { %v4439_v59 = vpop.permute.xlu1 %483 }
 0x162   : > { %517 = vst.msk [vmem:[#allocation4 + $0x168] sm:$0xff] %vm501_vm5, %v4439_v59  ;;  %v750_v16 = vpop.permute.xlu0 %749 }
 0x163   : > { %782 = vst.msk [vmem:[#allocation4 + $0x170] sm:$0xff] %vm501_vm5, %v750_v16 }
 0x165   : > { %v598_v63 = vpop.permute.xlu1 %597  ;;  %v1001_v4 = vld [vmem:[#allocation4 + $0x150] sm:$0xff] }
 0x166   : > { %631 = vst.msk [vmem:[#allocation4 + $0x168] sm:$0xff] %vm615_vm6, %v598_v63  ;;  %v816_v12 = vpop.permute.xlu0 %815  ;;  %v1002_v61 = vld [vmem:[#allocation4 + $0x158] sm:$0xff] }
 0x167   : > { %848 = vst.msk [vmem:[#allocation4 + $0x170] sm:$0xff] %vm615_vm6, %v816_v12  ;;  %1241 = vmatprep.mubr.f32.mxu0 %v1002_v61 }
 0x168   : > { %1242 = vmatmul.mubr.f32.gmra.mrb[28].mxu0 %v1001_v4 }
 0x169   : > { %v663_v33 = vpop.permute.xlu1 %662 }
 0x16a   : > { %696 = vst.msk [vmem:[#allocation4 + $0x168] sm:$0xff] %vm680_vm7, %v663_v33  ;;  %v888_v2 = vpop.permute.xlu0 %887 }
 0x16b   : > { %920 = vst.msk [vmem:[#allocation4 + $0x170] sm:$0xff] %vm680_vm7, %v888_v2 }
 0x16c   : > { %v4453_v18 = vpop.f32.mrb[8].mxu1 }
 0x16d   : > { %v4455_v25 = vpop.f32.mrb[9].mxu1  ;;  %v1663_v63 = vpop.permute.xlu1 %1662 }
 0x16e   : > { %1710 = vst.msk [vmem:[#allocation4] sm:$0xff] %vm501_vm5, %v1663_v63  ;;  %v2257_v63 = vld [vmem:[%s5193_s3 + $0x98] sm:$0xff] }
 0x170   : > { %v4457_v23 = vpop.f32.mrb[10].mxu1 }
 0x171   : > { %v1004_v5 = vld [vmem:[#allocation4 + $0x168] sm:$0xff]  ;;  %v4459_v29 = vpop.f32.mrb[11].mxu1 }
 0x172   : > { %v1005_v11 = vld [vmem:[#allocation4 + $0x170] sm:$0xff] }
 0x173   : > { %1246 = vmatprep.mubr.f32.mxu0 %v1005_v11 }
 0x174   : > { %1247 = vmatmul.mubr.f32.gmra.mrb[30].mxu0 %v1004_v5  ;;  %v4467_v5 = vpop.f32.mrb[12].mxu1 }
 0x175   : > { %v4469_v11 = vpop.f32.mrb[13].mxu1 }
 0x179   : > { %v1775_v61 = vpop.permute.xlu1 %1774 }
 0x17a   : > { %1822 = vst.msk [vmem:[#allocation4] sm:$0xff] %vm615_vm6, %v1775_v61  ;;  %v2240_v61 = vld [vmem:[%s5193_s3 + $0x10] sm:$0xff] }
 0x193   : > { %v3013_v26 = vpop.f32.mrb[0].mxu0 }
 0x194   : > { %v3014_v41 = vpop.f32.mrb[1].mxu0 }
 0x195   : > { %v3015_v10 = vadd.f32 %v3014_v41, %v3013_v26  ;;  %v2254_v26 = vld [vmem:[%s5193_s3 + $0x80] sm:$0xff]  ;;  %v1679_v41 = vpop.permute.xlu1 %1678 }
 0x196   : > { %1718 = vst.msk [vmem:[#allocation4 + $0xc0] sm:$0xff] %vm501_vm5, %v1679_v41  ;;  %v2259_v41 = vld [vmem:[%s5193_s3 + $0xa8] sm:$0xff] }
 0x197   : > { %v1174_v56 = vadd.f32 %v3015_v10, %v1043_v32  ;;  %v2238_v10 = vld [vmem:[%s5193_s3] sm:$0xff] }
 0x199   : > { %v1319_v52 = vadd.f32 %v4362_v8, %v1174_v56  ;;  %v2239_v56 = vld [vmem:[%s5193_s3 + $0x8] sm:$0xff] }
 0x19b   : > { %v2944_v50 = vmul.f32 -1.442695, %v1319_v52 }
 0x19d   : > { %3341 = vpow2.f32 %v2944_v50  ;;  %v3287_v50 = vpack.c.bf16 %v2239_v56, %v2238_v10  ;;  %v2242_v10 = vld [vmem:[%s5193_s3 + $0x20] sm:$0xff]  ;;  %v2243_v56 = vld [vmem:[%s5193_s3 + $0x28] sm:$0xff] }
 0x19f   : > { %v3016_v31 = vpop.f32.mrb[2].mxu0 }
 0x1a0   : > { %v3017_v54 = vpop.f32.mrb[3].mxu0 }
 0x1a1   : > { %v3018_v16 = vadd.f32 %v3017_v54, %v3016_v31 }
 0x1a3   : > { %v1179_v4 = vadd.f32 %v3018_v16, %v1044_v1  ;;  %v1045_v1 = vld [vmem:[%s3489_s21 + $0x10] sm:$0xff] }
 0x1a4   : > { %v2256_v16 = vld [vmem:[%s5193_s3 + $0x90] sm:$0xff] }
 0x1a5   : > { %v1324_v12 = vadd.f32 %v4358_v51, %v1179_v4  ;;  %v2255_v51 = vld [vmem:[%s5193_s3 + $0x88] sm:$0xff]  ;;  %v1791_v4 = vpop.permute.xlu1 %1790 }
 0x1a6   : > { %v3285_v32 = vpack.c.bf16 %v2255_v51, %v2254_v26  ;;  %1830 = vst.msk [vmem:[#allocation4 + $0xc0] sm:$0xff] %vm615_vm6, %v1791_v4  ;;  %v2258_v51 = vld [vmem:[%s5193_s3 + $0xa0] sm:$0xff] }
 0x1a7   : > { %v3342_v33 = vpop.eup %3341  ;;  %v2945_v2 = vmul.f32 -1.442695, %v1324_v12  ;;  %v3289_v12 = vpack.c.bf16 %v2257_v63, %v2256_v16  ;;  %v2260_v16 = vld [vmem:[%s5193_s3 + $0xb0] sm:$0xff]  ;;  %v2261_v63 = vld [vmem:[%s5193_s3 + $0xb8] sm:$0xff] }
 0x1a8   : > { %v1445_v8 = vadd.f32 1.0, %v3342_v33  ;;  %3286 = vmatprep.subr.bf16.mxu1 %v3285_v32  ;;  %v2241_v33 = vld [vmem:[%s5193_s3 + $0x18] sm:$0xff]  ;;  %v3293_v32 = vpack.c.bf16 %v2259_v41, %v2258_v51  ;;  %v3297_v4 = vpack.c.bf16 %v2261_v63, %v2260_v16  ;;  %v2262_v51 = vld [vmem:[%s5193_s3 + $0xc0] sm:$0xff]  ;;  %v2263_v41 = vld [vmem:[%s5193_s3 + $0xc8] sm:$0xff] }
 0x1a9   : > { %3343 = vpow2.f32 %v2945_v2  ;;  %3288 = vmatpush3.bf16.msra.mxu1 %v3287_v50  ;;  %v3295_v50 = vpack.c.bf16 %v2243_v56, %v2242_v10  ;;  %v2246_v10 = vld [vmem:[%s5193_s3 + $0x40] sm:$0xff]  ;;  %v2247_v56 = vld [vmem:[%s5193_s3 + $0x48] sm:$0xff] }
 0x1aa   : > { %3345 = vrcp.f32 %v1445_v8  ;;  %v3291_v8 = vpack.c.bf16 %v2241_v33, %v2240_v61  ;;  %3290 = vmatprep.subr.bf16.mxu1 %v3289_v12  ;;  %v2244_v12 = vld [vmem:[%s5193_s3 + $0x30] sm:$0xff] }
 0x1ab   : > { %v3019_v52 = vpop.f32.mrb[4].mxu0 }
 0x1ac   : > { %v3020_v31 = vpop.f32.mrb[5].mxu0 }
 0x1ad   : > { %v3021_v54 = vadd.f32 %v3020_v31, %v3019_v52  ;;  %3292 = vmatpush3.bf16.msra.mxu1 %v3291_v8 }
 0x1ae   : > { %3294 = vmatprep.subr.bf16.mxu1 %v3293_v32  ;;  %v3301_v32 = vpack.c.bf16 %v2263_v41, %v2262_v51 }
 0x1af   : > { %v1184_v2 = vadd.f32 %v3021_v54, %v1045_v1 }
 0x1b1   : > { %v1329_v26 = vadd.f32 %v4371_v28, %v1184_v2  ;;  %3296 = vmatpush3.bf16.msra.mxu1 %v3295_v50  ;;  %v1046_v2 = vld [vmem:[%s3489_s21 + $0x18] sm:$0xff] }
 0x1b2   : > { %3298 = vmatprep.subr.bf16.mxu1 %v3297_v4 }
 0x1b3   : > { %v3344_v52 = vpop.eup %3343  ;;  %v2946_v28 = vmul.f32 -1.442695, %v1329_v26 }
 0x1b4   : > { %v4511_v31 = vpop.eup %3345  ;;  %v1446_v1 = vadd.f32 1.0, %v3344_v52 }
 0x1b5   : > { %v1493_v54 = vmul.f32 %v4511_v31, %v3707_v34  ;;  %3347 = vpow2.f32 %v2946_v28  ;;  %v2245_v34 = vld [vmem:[%s5193_s3 + $0x38] sm:$0xff]  ;;  %v3303_v28 = vpack.c.bf16 %v2247_v56, %v2246_v10 }
 0x1b6   : > { %3349 = vrcp.f32 %v1446_v1  ;;  %v3299_v33 = vpack.c.bf16 %v2245_v34, %v2244_v12  ;;  %v2264_v1 = vld [vmem:[%s5193_s3 + $0xd0] sm:$0xff]  ;;  %v2249_v10 = vld [vmem:[%s5193_s3 + $0x58] sm:$0xff] }
 0x1b7   : > { %1510 = vst.msk [vmem:[#allocation3 + $0x11] sm:$0xff] %vm426_vm4, %v1493_v54  ;;  %v3022_v61 = vpop.f32.mrb[6].mxu0  ;;  %v2265_v54 = vld [vmem:[%s5193_s3 + $0xd8] sm:$0xff]  ;;  %v2248_v12 = vld [vmem:[%s5193_s3 + $0x50] sm:$0xff] }
 0x1b8   : > { %v3023_v8 = vpop.f32.mrb[7].mxu0  ;;  %3300 = vmatpush3.bf16.msra.mxu1 %v3299_v33  ;;  %v3305_v4 = vpack.c.bf16 %v2265_v54, %v2264_v1  ;;  %v2267_v1 = vld [vmem:[%s5193_s3 + $0xe8] sm:$0xff] }
 0x1b9   : > { %v3024_v26 = vadd.f32 %v3023_v8, %v3022_v61  ;;  %3302 = vmatprep.subr.bf16.mxu1 %v3301_v32  ;;  %v4553_v8 = vpop.f32.mrb[14].mxu1 }
 0x1ba   : > { %v4557_v32 = vpop.f32.mrb[15].mxu1 }
 0x1bb   : > { %v1189_v52 = vadd.f32 %v3024_v26, %v1046_v2 }
 0x1bc   : > { %3304 = vmatpush3.bf16.msra.mxu1 %v3303_v28  ;;  %v3307_v28 = vpack.c.bf16 %v2249_v10, %v2248_v12  ;;  %v2253_v10 = vld [vmem:[%s5193_s3 + $0x78] sm:$0xff] }
 0x1bd   : > { %v1334_v50 = vadd.f32 %v4367_v9, %v1189_v52  ;;  %3306 = vmatprep.subr.bf16.mxu1 %v3305_v4 }
 0x1be   : > { %v1528_v16 = vld [vmem:[#allocation3 + $0x10] sm:$0xff]  ;;  %v1529_v63 = vld [vmem:[#allocation3 + $0x18] sm:$0x3] }
 0x1bf   : > { %v3348_v34 = vpop.eup %3347  ;;  %v2947_v61 = vmul.f32 -1.442695, %v1334_v50  ;;  %1840 = vrot.lane.b32.xlu1 %v1528_v16, %s3448_s27  ;;  %v1617_v9 = vrot.slane %v1528_v16, 1  ;;  %v1729_v33 = vrot.slane %v1528_v16, 2  ;;  %1567 = vst.msk [vmem:[#allocation4 + $0x18] sm:$0xff] %vm426_vm4, %v1528_v16  ;;  %v1730_v2 = vrot.slane %v1529_v63, 2 }
 0x1c0   : > { %v4555_v26 = vpop.eup %3349  ;;  %v1447_v51 = vadd.f32 1.0, %v3348_v34  ;;  %v1618_v41 = vrot.slane %v1529_v63, 1  ;;  %v2266_v50 = vld [vmem:[%s5193_s3 + $0xe0] sm:$0xff]  ;;  %v2251_v63 = vld [vmem:[%s5193_s3 + $0x68] sm:$0xff]  ;;  %3308 = vmatpush3.bf16.msra.mxu1 %v3307_v28 }
 0x1c1   : > { %v1494_v56 = vmul.f32 %v4555_v26, %v3680_v24  ;;  %3351 = vpow2.f32 %v2947_v61  ;;  %v1731_v52 = vsel %vm518_vm2, %v1729_v33, %v1730_v2  ;;  %v3309_v16 = vpack.c.bf16 %v2267_v1, %v2266_v50  ;;  %v2250_v24 = vld [vmem:[%s5193_s3 + $0x60] sm:$0xff]  ;;  %v2268_v33 = vld [vmem:[%s5193_s3 + $0xf0] sm:$0xff]  ;;  %v2269_v2 = vld [vmem:[%s5193_s3 + $0xf8] sm:$0xff] }
 0x1c2   : > { %3353 = vrcp.f32 %v1447_v51  ;;  %1950 = vrot.lane.b32.xlu0 %v1731_v52, %s3447_s26  ;;  %v1619_v54 = vsel %vm361_vm3, %v1617_v9, %v1618_v41  ;;  %v3311_v12 = vpack.c.bf16 %v2251_v63, %v2250_v24  ;;  %v1047_v61 = vld [vmem:[%s3489_s21 + $0x20] sm:$0xff]  ;;  %v3313_v51 = vpack.c.bf16 %v2269_v2, %v2268_v33  ;;  %v2252_v41 = vld [vmem:[%s5193_s3 + $0x70] sm:$0xff] }
 0x1c3   : > { %1511 = vst.msk [vmem:[#allocation3 + $0x21] sm:$0xff] %vm426_vm4, %v1494_v56  ;;  %v3025_v4 = vpop.f32.mrb[8].mxu0  ;;  %1664 = vrot.lane.b32.xlu1 %v1619_v54, %s3447_s26  ;;  %1928 = vst.msk [vmem:[#allocation4 + $0x8] sm:$0xff] %vm426_vm4, %v1619_v54  ;;  %3310 = vmatprep.subr.bf16.mxu1 %v3309_v16  ;;  %v3315_v28 = vpack.c.bf16 %v2253_v10, %v2252_v41 }
 0x1c4   : > { %v3026_v34 = vpop.f32.mrb[9].mxu0  ;;  %3312 = vmatpush3.bf16.msra.mxu1 %v3311_v12 }
 0x1c5   : > { %v3027_v9 = vadd.f32 %v3026_v34, %v3025_v4  ;;  %3314 = vmatprep.subr.bf16.mxu1 %v3313_v51 }
 0x1c7   : > { %1776 = vrot.lane.b32.xlu1 %v1731_v52, %s3446_s25  ;;  %v1194_v56 = vadd.f32 %v3027_v9, %v1047_v61 }
 0x1c8   : > { %3316 = vmatpush3.bf16.msra.mxu1 %v3315_v28 }
 0x1c9   : > { %v1339_v50 = vadd.f32 %v4402_v35, %v1194_v56  ;;  %3325 = vmatprep.subr.bf16.mxu1 %v4423_v49 }
 0x1ca   : > { %v1530_v1 = vld [vmem:[#allocation3 + $0x20] sm:$0xff]  ;;  %v1531_v54 = vld [vmem:[#allocation3 + $0x28] sm:$0x3] }
 0x1cb   : > { %v3352_v16 = vpop.eup %3351  ;;  %v2948_v24 = vmul.f32 -1.442695, %v1339_v50  ;;  %2016 = vrot.lane.b32.xlu0 %v1530_v1, %s3446_s25  ;;  %1568 = vst.msk [vmem:[#allocation4 + $0x30] sm:$0xff] %vm426_vm4, %v1530_v1  ;;  %1842 = vrot.lane.b32.xlu1 %v1530_v1, %s3448_s27  ;;  %v1620_v63 = vrot.slane %v1530_v1, 1  ;;  %v1621_v4 = vrot.slane %v1531_v54, 1  ;;  %v1732_v34 = vrot.slane %v1530_v1, 2 }
 0x1cc   : > { %v4600_v52 = vpop.eup %3353  ;;  %v1448_v12 = vadd.f32 1.0, %v3352_v16  ;;  %v1733_v61 = vrot.slane %v1531_v54, 2 }
 0x1cd   : > { %v1495_v35 = vmul.f32 %v4600_v52, %v3718_v40  ;;  %3355 = vpow2.f32 %v2948_v24  ;;  %v1622_v9 = vsel %vm361_vm3, %v1620_v63, %v1621_v4  ;;  %v1048_v40 = vld [vmem:[%s3489_s21 + $0x28] sm:$0xff] }
 0x1ce   : > { %3357 = vrcp.f32 %v1448_v12  ;;  %1929 = vst.msk [vmem:[#allocation4 + $0x20] sm:$0xff] %vm426_vm4, %v1622_v9  ;;  %v1734_v33 = vsel %vm518_vm2, %v1732_v34, %v1733_v61 }
 0x1cf   : > { %1512 = vst.msk [vmem:[#allocation3 + $0x31] sm:$0xff] %vm426_vm4, %v1495_v35  ;;  %v3028_v2 = vpop.f32.mrb[10].mxu0  ;;  %2088 = vrot.lane.b32.xlu0 %v1622_v9, %s3448_s27  ;;  %1666 = vrot.lane.b32.xlu1 %v1622_v9, %s3447_s26  ;;  %2174 = vst.msk [vmem:[#allocation4 + $0x10] sm:$0xff] %vm426_vm4, %v1734_v33 }
 0x1d0   : > { %v3029_v51 = vpop.f32.mrb[11].mxu0 }
 0x1d1   : > { %v3030_v41 = vadd.f32 %v3029_v51, %v3028_v2 }
 0x1d3   : > { %v1199_v10 = vadd.f32 %v3030_v41, %v1048_v40  ;;  %1952 = vrot.lane.b32.xlu0 %v1734_v33, %s3447_s26  ;;  %1778 = vrot.lane.b32.xlu1 %v1734_v33, %s3446_s25  ;;  %v1049_v40 = vld [vmem:[%s3489_s21 + $0x30] sm:$0xff] }
 0x1d5   : > { %v1344_v56 = vadd.f32 %v4398_v46, %v1199_v10 }
 0x1d6   : > { %v2192_v28 = vld [vmem:[#allocation4 + $0x10] sm:$0xff]  ;;  %v1533_v1 = vld [vmem:[#allocation3 + $0x38] sm:$0x3] }
 0x1d7   : > { %v1532_v50 = vld [vmem:[#allocation3 + $0x30] sm:$0xff]  ;;  %v3356_v54 = vpop.eup %3355  ;;  %v2949_v16 = vmul.f32 -1.442695, %v1344_v56  ;;  %3221 = vmatprep.mubr.msk.f32.mxu0 %vm426_vm4, %v2192_v28  ;;  %v1624_v63 = vrot.slane %v1533_v1, 1  ;;  %v1736_v46 = vrot.slane %v1533_v1, 2 }
 0x1d8   : > { %2018 = vrot.lane.b32.xlu0 %v1532_v50, %s3446_s25  ;;  %1569 = vst.msk [vmem:[#allocation4 + $0x48] sm:$0xff] %vm426_vm4, %v1532_v50  ;;  %v1623_v24 = vrot.slane %v1532_v50, 1  ;;  %v1735_v4 = vrot.slane %v1532_v50, 2  ;;  %v4619_v34 = vpop.eup %3357  ;;  %v1449_v12 = vadd.f32 1.0, %v3356_v54  ;;  %1844 = vrot.lane.b32.xlu1 %v1532_v50, %s3448_s27 }
 0x1d9   : > { %v1496_v61 = vmul.f32 %v4619_v34, %v3730_v45  ;;  %3359 = vpow2.f32 %v2949_v16 }
 0x1da   : > { %v1625_v35 = vsel %vm361_vm3, %v1623_v24, %v1624_v63  ;;  %3361 = vrcp.f32 %v1449_v12  ;;  %v1737_v9 = vsel %vm518_vm2, %v1735_v4, %v1736_v46 }
 0x1db   : > { %1930 = vst.msk [vmem:[#allocation4 + $0x38] sm:$0xff] %vm426_vm4, %v1625_v35  ;;  %1513 = vst.msk [vmem:[#allocation3 + $0x41] sm:$0xff] %vm426_vm4, %v1496_v61  ;;  %v3031_v33 = vpop.f32.mrb[12].mxu0 }
 0x1dc   : > { %2090 = vrot.lane.b32.xlu0 %v1625_v35, %s3448_s27  ;;  %2175 = vst.msk [vmem:[#allocation4 + $0x28] sm:$0xff] %vm426_vm4, %v1737_v9  ;;  %1668 = vrot.lane.b32.xlu1 %v1625_v35, %s3447_s26  ;;  %v3032_v2 = vpop.f32.mrb[13].mxu0 }
 0x1dd   : > { %v3033_v45 = vadd.f32 %v3032_v2, %v3031_v33 }
 0x1df   : > { %v1204_v51 = vadd.f32 %v3033_v45, %v1049_v40 }
 0x1e0   : > { %1954 = vrot.lane.b32.xlu0 %v1737_v9, %s3447_s26  ;;  %1780 = vrot.lane.b32.xlu1 %v1737_v9, %s3446_s25  ;;  %v1050_v9 = vld [vmem:[%s3489_s21 + $0x38] sm:$0xff] }
 0x1e1   : > { %v1349_v41 = vadd.f32 %v4446_v3, %v1204_v51 }
 0x1e2   : > { %v1534_v56 = vld [vmem:[#allocation3 + $0x40] sm:$0xff]  ;;  %v1535_v28 = vld [vmem:[#allocation3 + $0x48] sm:$0x3] }
 0x1e3   : > { %v2195_v10 = vld [vmem:[#allocation4 + $0x28] sm:$0xff]  ;;  %v3360_v50 = vpop.eup %3359  ;;  %v2950_v1 = vmul.f32 -1.442695, %v1349_v41  ;;  %1570 = vst.msk [vmem:[#allocation4 + $0x60] sm:$0xff] %vm426_vm4, %v1534_v56  ;;  %v1626_v54 = vrot.slane %v1534_v56, 1  ;;  %v1627_v16 = vrot.slane %v1535_v28, 1 }
 0x1e4   : > { %3222 = vmatmul.mubr.msk.f32.vlgmr.msra.gmra.mrb[32].mxu0 %vm426_vm4, %v2195_v10  ;;  %2020 = vrot.lane.b32.xlu0 %v1534_v56, %s3446_s25  ;;  %v1738_v24 = vrot.slane %v1534_v56, 2  ;;  %v4638_v63 = vpop.eup %3361  ;;  %v1450_v4 = vadd.f32 1.0, %v3360_v50  ;;  %v1739_v3 = vrot.slane %v1535_v28, 2 }
 0x1e5   : > { %1846 = vrot.lane.b32.xlu1 %v1534_v56, %s3448_s27  ;;  %v1497_v12 = vmul.f32 %v4638_v63, %v3754_v57  ;;  %3363 = vpow2.f32 %v2950_v1  ;;  %v1628_v46 = vsel %vm361_vm3, %v1626_v54, %v1627_v16 }
 0x1e6   : > { %3365 = vrcp.f32 %v1450_v4  ;;  %1931 = vst.msk [vmem:[#allocation4 + $0x50] sm:$0xff] %vm426_vm4, %v1628_v46  ;;  %v1740_v61 = vsel %vm518_vm2, %v1738_v24, %v1739_v3 }
 0x1e7   : > { %1514 = vst.msk [vmem:[#allocation3 + $0x51] sm:$0xff] %vm426_vm4, %v1497_v12  ;;  %v3034_v35 = vpop.f32.mrb[14].mxu0  ;;  %2176 = vst.msk [vmem:[#allocation4 + $0x40] sm:$0xff] %vm426_vm4, %v1740_v61 }
 0x1e8   : > { %2092 = vrot.lane.b32.xlu0 %v1628_v46, %s3448_s27  ;;  %v3035_v33 = vpop.f32.mrb[15].mxu0 }
 0x1e9   : > { %1670 = vrot.lane.b32.xlu1 %v1628_v46, %s3447_s26  ;;  %v3036_v57 = vadd.f32 %v3035_v33, %v3034_v35  ;;  %v2085_v33 = vrot.slane %v4387_v42, 1 }
 0x1eb   : > { %v1209_v2 = vadd.f32 %v3036_v57, %v1050_v9 }
 0x1ec   : > { %1956 = vrot.lane.b32.xlu0 %v1740_v61, %s3447_s26 }
 0x1ed   : > { %1782 = vrot.lane.b32.xlu1 %v1740_v61, %s3446_s25  ;;  %v1354_v40 = vadd.f32 %v4441_v17, %v1209_v2  ;;  %v1051_v61 = vld [vmem:[%s3489_s21 + $0x40] sm:$0xff] }
 0x1ee   : > { %v2198_v45 = vld [vmem:[#allocation4 + $0x40] sm:$0xff]  ;;  %v1536_v51 = vld [vmem:[#allocation3 + $0x50] sm:$0xff]  ;;  %v1537_v41 = vld [vmem:[#allocation3 + $0x58] sm:$0x3] }
 0x1ef   : > { %v3364_v10 = vpop.eup %3363  ;;  %v2951_v56 = vmul.f32 -1.442695, %v1354_v40  ;;  %3224 = vmatprep.mubr.msk.f32.mxu0 %vm426_vm4, %v2198_v45  ;;  %1571 = vst.msk [vmem:[#allocation4 + $0x78] sm:$0xff] %vm426_vm4, %v1536_v51  ;;  %v1629_v28 = vrot.slane %v1536_v51, 1  ;;  %v1630_v50 = vrot.slane %v1537_v41, 1  ;;  %v1741_v1 = vrot.slane %v1536_v51, 2 }
 0x1f0   : > { %2022 = vrot.lane.b32.xlu0 %v1536_v51, %s3446_s25  ;;  %v4657_v54 = vpop.eup %3365  ;;  %v1451_v16 = vadd.f32 1.0, %v3364_v10  ;;  %v1742_v17 = vrot.slane %v1537_v41, 2 }
 0x1f1   : > { %1848 = vrot.lane.b32.xlu1 %v1536_v51, %s3448_s27  ;;  %v1498_v24 = vmul.f32 %v4657_v54, %v3768_v62  ;;  %3367 = vpow2.f32 %v2951_v56  ;;  %v1631_v4 = vsel %vm361_vm3, %v1629_v28, %v1630_v50 }
 0x1f2   : > { %3369 = vrcp.f32 %v1451_v16  ;;  %1932 = vst.msk [vmem:[#allocation4 + $0x68] sm:$0xff] %vm426_vm4, %v1631_v4  ;;  %v1743_v3 = vsel %vm518_vm2, %v1741_v1, %v1742_v17  ;;  %v1565_v16 = vld [vmem:[#allocation3 + $0x138] sm:$0x3] }
 0x1f3   : > { %1515 = vst.msk [vmem:[#allocation3 + $0x61] sm:$0xff] %vm426_vm4, %v1498_v24  ;;  %v3037_v12 = vpop.f32.mrb[16].mxu0  ;;  %2177 = vst.msk [vmem:[#allocation4 + $0x58] sm:$0xff] %vm426_vm4, %v1743_v3 }
 0x1f4   : > { %2094 = vrot.lane.b32.xlu0 %v1631_v4, %s3448_s27  ;;  %v3038_v46 = vpop.f32.mrb[17].mxu0 }
 0x1f5   : > { %1672 = vrot.lane.b32.xlu1 %v1631_v4, %s3447_s26  ;;  %v3039_v62 = vadd.f32 %v3038_v46, %v3037_v12  ;;  %v2086_v4 = vrot.slane %v1565_v16, 1  ;;  %v1052_v46 = vld [vmem:[%s3489_s21 + $0x48] sm:$0xff] }
 0x1f7   : > { %v1214_v35 = vadd.f32 %v3039_v62, %v1051_v61  ;;  %v4690_v12 = vsel %vm361_vm3, %v2085_v33, %v2086_v4 }
 0x1f8   : > { %1958 = vrot.lane.b32.xlu0 %v1743_v3, %s3447_s26 }
 0x1f9   : > { %1784 = vrot.lane.b32.xlu1 %v1743_v3, %s3446_s25  ;;  %v1359_v9 = vadd.f32 %v4455_v25, %v1214_v35  ;;  %v2155_v25 = vrot.slane %v4387_v42, 2 }
 0x1fa   : > { %v2201_v57 = vld [vmem:[#allocation4 + $0x58] sm:$0xff]  ;;  %v1538_v2 = vld [vmem:[#allocation3 + $0x60] sm:$0xff]  ;;  %v1539_v40 = vld [vmem:[#allocation3 + $0x68] sm:$0x3] }
 0x1fb   : > { %v3368_v45 = vpop.eup %3367  ;;  %v2952_v51 = vmul.f32 -1.442695, %v1359_v9  ;;  %3225 = vmatmul.mubr.msk.f32.gmra.mrb[34].mxu0 %vm426_vm4, %v2201_v57  ;;  %1572 = vst.msk [vmem:[#allocation4 + $0x90] sm:$0xff] %vm426_vm4, %v1538_v2  ;;  %v1632_v41 = vrot.slane %v1538_v2, 1  ;;  %v1633_v10 = vrot.slane %v1539_v40, 1  ;;  %v1744_v56 = vrot.slane %v1538_v2, 2 }
 0x1fc   : > { %2024 = vrot.lane.b32.xlu0 %v1538_v2, %s3446_s25  ;;  %v4677_v28 = vpop.eup %3369  ;;  %v1452_v50 = vadd.f32 1.0, %v3368_v45  ;;  %v1745_v1 = vrot.slane %v1539_v40, 2 }
 0x1fd   : > { %1850 = vrot.lane.b32.xlu1 %v1538_v2, %s3448_s27  ;;  %v1499_v17 = vmul.f32 %v4677_v28, %v3788_v7  ;;  %3371 = vpow2.f32 %v2952_v51  ;;  %v1634_v24 = vsel %vm361_vm3, %v1632_v41, %v1633_v10  ;;  %v2156_v7 = vrot.slane %v1565_v16, 2 }
 0x1fe   : > { %3373 = vrcp.f32 %v1452_v50  ;;  %1933 = vst.msk [vmem:[#allocation4 + $0x80] sm:$0xff] %vm426_vm4, %v1634_v24  ;;  %v1746_v3 = vsel %vm518_vm2, %v1744_v56, %v1745_v1 }
 0x1ff   : > { %1516 = vst.msk [vmem:[#allocation3 + $0x71] sm:$0xff] %vm426_vm4, %v1499_v17  ;;  %v3040_v42 = vpop.f32.mrb[18].mxu0  ;;  %2178 = vst.msk [vmem:[#allocation4 + $0x70] sm:$0xff] %vm426_vm4, %v1746_v3  ;;  %v2157_v35 = vsel %vm518_vm2, %v2155_v25, %v2156_v7 }
 0x200   : > { %2096 = vrot.lane.b32.xlu0 %v1634_v24, %s3448_s27  ;;  %v3041_v61 = vpop.f32.mrb[19].mxu0  ;;  %2189 = vst.msk [vmem:[#allocation4 + $0x178] sm:$0xff] %vm426_vm4, %v2157_v35 }
 0x201   : > { %1674 = vrot.lane.b32.xlu1 %v1634_v24, %s3447_s26  ;;  %v3042_v62 = vadd.f32 %v3041_v61, %v3040_v42 }
 0x203   : > { %v1219_v9 = vadd.f32 %v3042_v62, %v1052_v46 }
 0x204   : > { %1960 = vrot.lane.b32.xlu0 %v1746_v3, %s3447_s26 }
 0x205   : > { %1786 = vrot.lane.b32.xlu1 %v1746_v3, %s3446_s25  ;;  %v1364_v57 = vadd.f32 %v4453_v18, %v1219_v9  ;;  %v1053_v3 = vld [vmem:[%s3489_s21 + $0x50] sm:$0xff] }
 0x206   : > { %v2204_v2 = vld [vmem:[#allocation4 + $0x70] sm:$0xff]  ;;  %v1541_v40 = vld [vmem:[#allocation3 + $0x78] sm:$0x3] }
 0x207   : > { %v1540_v33 = vld [vmem:[#allocation3 + $0x70] sm:$0xff]  ;;  %v3372_v45 = vpop.eup %3371  ;;  %v2953_v51 = vmul.f32 -1.442695, %v1364_v57  ;;  %3227 = vmatprep.mubr.msk.f32.mxu0 %vm426_vm4, %v2204_v2  ;;  %v1636_v10 = vrot.slane %v1541_v40, 1  ;;  %v1748_v18 = vrot.slane %v1541_v40, 2 }
 0x208   : > { %2026 = vrot.lane.b32.xlu0 %v1540_v33, %s3446_s25  ;;  %1573 = vst.msk [vmem:[#allocation4 + $0xa8] sm:$0xff] %vm426_vm4, %v1540_v33  ;;  %v1635_v41 = vrot.slane %v1540_v33, 1  ;;  %v1747_v56 = vrot.slane %v1540_v33, 2  ;;  %v4702_v25 = vpop.eup %3373  ;;  %v1453_v50 = vadd.f32 1.0, %v3372_v45 }
 0x209   : > { %1852 = vrot.lane.b32.xlu1 %v1540_v33, %s3448_s27  ;;  %v1500_v1 = vmul.f32 %v4702_v25, %v3805_v15  ;;  %3375 = vpow2.f32 %v2953_v51 }
 0x20a   : > { %v1637_v16 = vsel %vm361_vm3, %v1635_v41, %v1636_v10  ;;  %3377 = vrcp.f32 %v1453_v50  ;;  %v1749_v17 = vsel %vm518_vm2, %v1747_v56, %v1748_v18  ;;  %v1054_v18 = vld [vmem:[%s3489_s21 + $0x58] sm:$0xff] }
 0x20b   : > { %1934 = vst.msk [vmem:[#allocation4 + $0x98] sm:$0xff] %vm426_vm4, %v1637_v16  ;;  %1517 = vst.msk [vmem:[#allocation3 + $0x81] sm:$0xff] %vm426_vm4, %v1500_v1  ;;  %v3043_v24 = vpop.f32.mrb[20].mxu0 }
 0x20c   : > { %2098 = vrot.lane.b32.xlu0 %v1637_v16, %s3448_s27  ;;  %2179 = vst.msk [vmem:[#allocation4 + $0x88] sm:$0xff] %vm426_vm4, %v1749_v17  ;;  %v3044_v4 = vpop.f32.mrb[21].mxu0 }
 0x20d   : > { %1676 = vrot.lane.b32.xlu1 %v1637_v16, %s3447_s26  ;;  %v3045_v42 = vadd.f32 %v3044_v4, %v3043_v24  ;;  %v2213_v24 = vld [vmem:[#allocation4 + $0xb8] sm:$0xff] }
 0x20f   : > { %v1224_v7 = vadd.f32 %v3045_v42, %v1053_v3 }
 0x210   : > { %1962 = vrot.lane.b32.xlu0 %v1749_v17, %s3447_s26 }
 0x211   : > { %1788 = vrot.lane.b32.xlu1 %v1749_v17, %s3446_s25  ;;  %v1369_v46 = vadd.f32 %v4459_v29, %v1224_v7 }
 0x212   : > { %v1542_v62 = vld [vmem:[#allocation3 + $0x80] sm:$0xff]  ;;  %v1543_v35 = vld [vmem:[#allocation3 + $0x88] sm:$0x3] }
 0x213   : > { %v2207_v61 = vld [vmem:[#allocation4 + $0x88] sm:$0xff]  ;;  %v3376_v9 = vpop.eup %3375  ;;  %v2954_v57 = vmul.f32 -1.442695, %v1369_v46  ;;  %v1906_v2 = vrot.slane %v1542_v62, 1  ;;  %v1944_v33 = vrot.slane %v1542_v62, 2  ;;  %v1907_v40 = vrot.slane %v1543_v35, 1 }
 0x214   : > { %3228 = vmatmul.mubr.msk.f32.gmra.mrb[36].mxu0 %vm426_vm4, %v2207_v61  ;;  %2028 = vrot.lane.b32.xlu0 %v1542_v62, %s3446_s25  ;;  %v4720_v45 = vpop.eup %3377  ;;  %v1454_v51 = vadd.f32 1.0, %v3376_v9  ;;  %v1945_v41 = vrot.slane %v1543_v35, 2 }
 0x215   : > { %1854 = vrot.lane.b32.xlu1 %v1542_v62, %s3448_s27  ;;  %v1501_v29 = vmul.f32 %v4720_v45, %v3908_v13  ;;  %3379 = vpow2.f32 %v2954_v57  ;;  %v1908_v10 = vsel %vm361_vm3, %v1906_v2, %v1907_v40 }
 0x216   : > { %3381 = vrcp.f32 %v1454_v51  ;;  %1935 = vst.msk [vmem:[#allocation4 + $0xb0] sm:$0xff] %vm426_vm4, %v1908_v10  ;;  %v1946_v56 = vsel %vm518_vm2, %v1944_v33, %v1945_v41  ;;  %v4745_v51 = vpop.permute.xlu0 %2030 }
 0x217   : > { %1518 = vst.msk [vmem:[#allocation3 + $0xb1] sm:$0xff] %vm426_vm4, %v1501_v29  ;;  %v3046_v50 = vpop.f32.mrb[22].mxu0  ;;  %2180 = vst.msk [vmem:[#allocation4 + $0xa0] sm:$0xff] %vm426_vm4, %v1946_v56 }
 0x218   : > { %2100 = vrot.lane.b32.xlu0 %v1908_v10, %s3448_s27  ;;  %v3047_v1 = vpop.f32.mrb[23].mxu0  ;;  %v1055_v10 = vld [vmem:[%s3489_s21 + $0x60] sm:$0xff] }
 0x219   : > { %v3048_v16 = vadd.f32 %v3047_v1, %v3046_v50 }
 0x21a   : > { %v4752_v50 = vpop.permute.xlu0 %2102 }
 0x21b   : > { %v1229_v17 = vadd.f32 %v3048_v16, %v1054_v18 }
 0x21c   : > { %1964 = vrot.lane.b32.xlu0 %v1946_v56, %s3447_s26 }
 0x21d   : > { %v1374_v13 = vadd.f32 %v4457_v23, %v1229_v17 }
 0x21e   : > { %v2210_v4 = vld [vmem:[#allocation4 + $0xa0] sm:$0xff]  ;;  %v1548_v3 = vld [vmem:[#allocation3 + $0xb0] sm:$0xff]  ;;  %v1549_v42 = vld [vmem:[#allocation3 + $0xb8] sm:$0x3] }
 0x21f   : > { %v3380_v7 = vpop.eup %3379  ;;  %v2955_v46 = vmul.f32 -1.442695, %v1374_v13  ;;  %3230 = vmatprep.mubr.msk.f32.mxu0 %vm426_vm4, %v2210_v4  ;;  %v1641_v61 = vrot.slane %v1548_v3, 1  ;;  %v1753_v62 = vrot.slane %v1548_v3, 2  ;;  %1856 = vrot.lane.b32.xlu1 %v1548_v3, %s3448_s27  ;;  %1575 = vst.msk [vmem:[#allocation4 + $0xd8] sm:$0xff] %vm426_vm4, %v1548_v3  ;;  %v1754_v35 = vrot.slane %v1549_v42, 2 }
 0x220   : > { %v4737_v9 = vpop.eup %3381  ;;  %v1455_v57 = vadd.f32 1.0, %v3380_v7  ;;  %v1642_v23 = vrot.slane %v1549_v42, 1  ;;  %3231 = vmatmul.mubr.msk.f32.gmra.mrb[38].mxu0 %vm426_vm4, %v2213_v24 }
 0x221   : > { %v1502_v2 = vmul.f32 %v4737_v9, %v3870_v60  ;;  %3383 = vpow2.f32 %v2955_v46  ;;  %v1755_v33 = vsel %vm518_vm2, %v1753_v62, %v1754_v35  ;;  %v4764_v62 = vpop.permute.xlu0 %2046 }
 0x222   : > { %3385 = vrcp.f32 %v1455_v57  ;;  %1966 = vrot.lane.b32.xlu0 %v1755_v33, %s3447_s26  ;;  %v1643_v40 = vsel %vm361_vm3, %v1641_v61, %v1642_v23 }
 0x223   : > { %1519 = vst.msk [vmem:[#allocation3 + $0xc1] sm:$0xff] %vm426_vm4, %v1502_v2  ;;  %v3049_v41 = vpop.f32.mrb[24].mxu0  ;;  %1680 = vrot.lane.b32.xlu1 %v1643_v40, %s3447_s26  ;;  %1936 = vst.msk [vmem:[#allocation4 + $0xc8] sm:$0xff] %vm426_vm4, %v1643_v40 }
 0x224   : > { %v3050_v29 = vpop.f32.mrb[25].mxu0 }
 0x225   : > { %v3051_v60 = vadd.f32 %v3050_v29, %v3049_v41 }
 0x227   : > { %v1234_v56 = vadd.f32 %v3051_v60, %v1055_v10  ;;  %1792 = vrot.lane.b32.xlu1 %v1755_v33, %s3446_s25 }
 0x229   : > { %v1379_v18 = vadd.f32 %v4469_v11, %v1234_v56 }
 0x22a   : > { %v1550_v1 = vld [vmem:[#allocation3 + $0xc0] sm:$0xff]  ;;  %v1551_v16 = vld [vmem:[#allocation3 + $0xc8] sm:$0x3] }
 0x22b   : > { %v3384_v17 = vpop.eup %3383  ;;  %v2956_v13 = vmul.f32 -1.442695, %v1379_v18  ;;  %2032 = vrot.lane.b32.xlu0 %v1550_v1, %s3446_s25  ;;  %1576 = vst.msk [vmem:[#allocation4 + $0xf0] sm:$0xff] %vm426_vm4, %v1550_v1  ;;  %1858 = vrot.lane.b32.xlu1 %v1550_v1, %s3448_s27  ;;  %v1644_v24 = vrot.slane %v1550_v1, 1  ;;  %v1645_v4 = vrot.slane %v1551_v16, 1  ;;  %v1756_v3 = vrot.slane %v1550_v1, 2 }
 0x22c   : > { %v4758_v42 = vpop.eup %3385  ;;  %v1456_v7 = vadd.f32 1.0, %v3384_v17  ;;  %v1757_v46 = vrot.slane %v1551_v16, 2 }
 0x22d   : > { %v1503_v11 = vmul.f32 %v4758_v42, %v3934_v37  ;;  %3387 = vpow2.f32 %v2956_v13  ;;  %v1646_v61 = vsel %vm361_vm3, %v1644_v24, %v1645_v4  ;;  %v1056_v37 = vld [vmem:[%s3489_s21 + $0x68] sm:$0xff] }
 0x22e   : > { %3389 = vrcp.f32 %v1456_v7  ;;  %1937 = vst.msk [vmem:[#allocation4 + $0xe0] sm:$0xff] %vm426_vm4, %v1646_v61  ;;  %v1758_v35 = vsel %vm518_vm2, %v1756_v3, %v1757_v46 }
 0x22f   : > { %1520 = vst.msk [vmem:[#allocation3 + $0xd1] sm:$0xff] %vm426_vm4, %v1503_v11  ;;  %v3052_v57 = vpop.f32.mrb[26].mxu0  ;;  %2104 = vrot.lane.b32.xlu0 %v1646_v61, %s3448_s27  ;;  %1682 = vrot.lane.b32.xlu1 %v1646_v61, %s3447_s26  ;;  %2182 = vst.msk [vmem:[#allocation4 + $0xd0] sm:$0xff] %vm426_vm4, %v1758_v35 }
 0x230   : > { %v3053_v23 = vpop.f32.mrb[27].mxu0 }
 0x231   : > { %v3054_v2 = vadd.f32 %v3053_v23, %v3052_v57  ;;  %v1841_v33 = vpop.permute.xlu1 %1840  ;;  %v1057_v57 = vld [vmem:[%s3489_s21 + $0x70] sm:$0xff] }
 0x232   : > { %1888 = vst.msk [vmem:[#allocation4] sm:$0xff] %vm680_vm7, %v1841_v33 }
 0x233   : > { %v1239_v40 = vadd.f32 %v3054_v2, %v1056_v37  ;;  %1968 = vrot.lane.b32.xlu0 %v1758_v35, %s3447_s26  ;;  %1794 = vrot.lane.b32.xlu1 %v1758_v35, %s3446_s25 }
 0x234   : > { %v1951_v41 = vpop.permute.xlu0 %1950 }
 0x235   : > { %v1384_v29 = vadd.f32 %v4467_v5, %v1239_v40  ;;  %1998 = vst.msk [vmem:[#allocation4 + $0x8] sm:$0xff] %vm501_vm5, %v1951_v41  ;;  %v1665_v10 = vpop.permute.xlu1 %1664 }
 0x236   : > { %1711 = vst.msk [vmem:[#allocation4 + $0x18] sm:$0xff] %vm501_vm5, %v1665_v10  ;;  %v2216_v60 = vld [vmem:[#allocation4 + $0xd0] sm:$0xff]  ;;  %v1553_v18 = vld [vmem:[#allocation3 + $0xd8] sm:$0x3] }
 0x237   : > { %v1552_v56 = vld [vmem:[#allocation3 + $0xd0] sm:$0xff]  ;;  %v3388_v1 = vpop.eup %3387  ;;  %v2957_v16 = vmul.f32 -1.442695, %v1384_v29  ;;  %3233 = vmatprep.mubr.msk.f32.mxu0 %vm426_vm4, %v2216_v60  ;;  %v1648_v13 = vrot.slane %v1553_v18, 1  ;;  %v1760_v3 = vrot.slane %v1553_v18, 2 }
 0x238   : > { %2034 = vrot.lane.b32.xlu0 %v1552_v56, %s3446_s25  ;;  %1577 = vst.msk [vmem:[#allocation4 + $0x108] sm:$0xff] %vm426_vm4, %v1552_v56  ;;  %v1647_v17 = vrot.slane %v1552_v56, 1  ;;  %v1759_v24 = vrot.slane %v1552_v56, 2  ;;  %v4781_v5 = vpop.eup %3389  ;;  %v1457_v4 = vadd.f32 1.0, %v3388_v1  ;;  %1860 = vrot.lane.b32.xlu1 %v1552_v56, %s3448_s27 }
 0x239   : > { %v1504_v7 = vmul.f32 %v4781_v5, %v3977_v20  ;;  %3391 = vpow2.f32 %v2957_v16  ;;  %v1777_v46 = vpop.permute.xlu1 %1776 }
 0x23a   : > { %v1649_v11 = vsel %vm361_vm3, %v1647_v17, %v1648_v13  ;;  %3393 = vrcp.f32 %v1457_v4  ;;  %1823 = vst.msk [vmem:[#allocation4 + $0x18] sm:$0xff] %vm615_vm6, %v1777_v46  ;;  %v1761_v61 = vsel %vm518_vm2, %v1759_v24, %v1760_v3 }
 0x23b   : > { %1938 = vst.msk [vmem:[#allocation4 + $0xf8] sm:$0xff] %vm426_vm4, %v1649_v11  ;;  %1521 = vst.msk [vmem:[#allocation3 + $0xe1] sm:$0xff] %vm426_vm4, %v1504_v7  ;;  %v3055_v35 = vpop.f32.mrb[28].mxu0 }
 0x23c   : > { %2106 = vrot.lane.b32.xlu0 %v1649_v11, %s3448_s27  ;;  %2183 = vst.msk [vmem:[#allocation4 + $0xe8] sm:$0xff] %vm426_vm4, %v1761_v61  ;;  %1684 = vrot.lane.b32.xlu1 %v1649_v11, %s3447_s26  ;;  %v3056_v20 = vpop.f32.mrb[29].mxu0 }
 0x23d   : > { %v3057_v37 = vadd.f32 %v3056_v20, %v3055_v35  ;;  %v2017_v23 = vpop.permute.xlu0 %2016  ;;  %v1843_v2 = vpop.permute.xlu1 %1842 }
 0x23e   : > { %2064 = vst.msk [vmem:[#allocation4 + $0x8] sm:$0xff] %vm615_vm6, %v2017_v23 }
 0x23f   : > { %1889 = vst.msk [vmem:[#allocation4 + $0x18] sm:$0xff] %vm680_vm7, %v1843_v2  ;;  %v1244_v33 = vadd.f32 %v3057_v37, %v1057_v57 }
 0x240   : > { %1970 = vrot.lane.b32.xlu0 %v1761_v61, %s3447_s26  ;;  %1796 = vrot.lane.b32.xlu1 %v1761_v61, %s3446_s25 }
 0x241   : > { %v1389_v40 = vadd.f32 %v4557_v32, %v1244_v33  ;;  %v2089_v41 = vpop.permute.xlu0 %2088  ;;  %v1667_v29 = vpop.permute.xlu1 %1666  ;;  %v2190_v33 = vld [vmem:[#allocation4] sm:$0xff] }
 0x242   : > { %2136 = vst.msk [vmem:[#allocation4 + $0x8] sm:$0xff] %vm680_vm7, %v2089_v41  ;;  %v1554_v60 = vld [vmem:[#allocation3 + $0xe0] sm:$0xff]  ;;  %v1555_v56 = vld [vmem:[#allocation3 + $0xe8] sm:$0x3] }
 0x243   : > { %1712 = vst.msk [vmem:[#allocation4 + $0x30] sm:$0xff] %vm501_vm5, %v1667_v29  ;;  %v2219_v10 = vld [vmem:[#allocation4 + $0xe8] sm:$0xff]  ;;  %v3392_v18 = vpop.eup %3391  ;;  %v2958_v1 = vmul.f32 -1.442695, %v1389_v40  ;;  %v1650_v16 = vrot.slane %v1554_v60, 1  ;;  %v1651_v17 = vrot.slane %v1555_v56, 1 }
 0x244   : > { %3234 = vmatmul.mubr.msk.f32.gmra.mrb[40].mxu0 %vm426_vm4, %v2219_v10  ;;  %2036 = vrot.lane.b32.xlu0 %v1554_v60, %s3446_s25  ;;  %1578 = vst.msk [vmem:[#allocation4 + $0x120] sm:$0xff] %vm426_vm4, %v1554_v60  ;;  %v1762_v32 = vrot.slane %v1554_v60, 2  ;;  %v4805_v13 = vpop.eup %3393  ;;  %v1458_v24 = vadd.f32 1.0, %v3392_v18  ;;  %v1763_v4 = vrot.slane %v1555_v56, 2 }
 0x245   : > { %1862 = vrot.lane.b32.xlu1 %v1554_v60, %s3448_s27  ;;  %v1505_v3 = vmul.f32 %v4805_v13, %v3986_v27  ;;  %3395 = vpow2.f32 %v2958_v1  ;;  %v1953_v7 = vpop.permute.xlu0 %1952  ;;  %v1779_v46 = vpop.permute.xlu1 %1778  ;;  %v1652_v11 = vsel %vm361_vm3, %v1650_v16, %v1651_v17  ;;  %v1058_v27 = vld [vmem:[%s3489_s21 + $0x78] sm:$0xff] }
 0x246   : > { %3397 = vrcp.f32 %v1458_v24  ;;  %1999 = vst.msk [vmem:[#allocation4 + $0x20] sm:$0xff] %vm501_vm5, %v1953_v7  ;;  %v1764_v61 = vsel %vm518_vm2, %v1762_v32, %v1763_v4 }
 0x247   : > { %1824 = vst.msk [vmem:[#allocation4 + $0x30] sm:$0xff] %vm615_vm6, %v1779_v46  ;;  %v3058_v35 = vpop.f32.mrb[30].mxu0 }
 0x248   : > { %1939 = vst.msk [vmem:[#allocation4 + $0x110] sm:$0xff] %vm426_vm4, %v1652_v11  ;;  %1522 = vst.msk [vmem:[#allocation3 + $0xf1] sm:$0xff] %vm426_vm4, %v1505_v3  ;;  %2108 = vrot.lane.b32.xlu0 %v1652_v11, %s3448_s27  ;;  %v3059_v20 = vpop.f32.mrb[31].mxu0 }
 0x249   : > { %2184 = vst.msk [vmem:[#allocation4 + $0x100] sm:$0xff] %vm426_vm4, %v1764_v61  ;;  %1686 = vrot.lane.b32.xlu1 %v1652_v11, %s3447_s26  ;;  %v3060_v57 = vadd.f32 %v3059_v20, %v3058_v35  ;;  %v2191_v23 = vld [vmem:[#allocation4 + $0x8] sm:$0xff]  ;;  %v2193_v35 = vld [vmem:[#allocation4 + $0x18] sm:$0xff] }
 0x24a   : > { %v2019_v37 = vpop.permute.xlu0 %2018  ;;  %v1845_v2 = vpop.permute.xlu1 %1844  ;;  %2402 = vmatprep.mubr.f32.mxu1 %v2191_v23 }
 0x24b   : > { %2065 = vst.msk [vmem:[#allocation4 + $0x20] sm:$0xff] %vm615_vm6, %v2019_v37  ;;  %v1249_v40 = vadd.f32 %v3060_v57, %v1058_v27  ;;  %2403 = vmatmul.mubr.f32.vlgmr.msra.gmra.mrb[16].mxu1 %v2190_v33 }
 0x24c   : > { %1890 = vst.msk [vmem:[#allocation4 + $0x30] sm:$0xff] %vm680_vm7, %v1845_v2  ;;  %1972 = vrot.lane.b32.xlu0 %v1764_v61, %s3447_s26  ;;  %3327 = vmatpush3.bf16.msra.mxu1 %v4423_v49 }
 0x24d   : > { %1798 = vrot.lane.b32.xlu1 %v1764_v61, %s3446_s25  ;;  %v1394_v41 = vadd.f32 %v4553_v8, %v1249_v40  ;;  %3326 = vmatprep.subr.bf16.mxu1 %v4435_v53 }
 0x24e   : > { %v2091_v29 = vpop.permute.xlu0 %2090  ;;  %v1669_v10 = vpop.permute.xlu1 %1668 }
 0x24f   : > { %2137 = vst.msk [vmem:[#allocation4 + $0x20] sm:$0xff] %vm680_vm7, %v2091_v29  ;;  %v1556_v60 = vld [vmem:[#allocation3 + $0xf0] sm:$0xff]  ;;  %v1557_v56 = vld [vmem:[#allocation3 + $0xf8] sm:$0x3]  ;;  %v3396_v18 = vpop.eup %3395  ;;  %v2959_v1 = vmul.f32 -1.442695, %v1394_v41 }
 0x250   : > { %1713 = vst.msk [vmem:[#allocation4 + $0x48] sm:$0xff] %vm501_vm5, %v1669_v10  ;;  %2038 = vrot.lane.b32.xlu0 %v1556_v60, %s3446_s25  ;;  %v1653_v16 = vrot.slane %v1556_v60, 1  ;;  %v1654_v49 = vrot.slane %v1557_v56, 1  ;;  %v1765_v17 = vrot.slane %v1556_v60, 2  ;;  %v4831_v8 = vpop.eup %3397  ;;  %v1459_v32 = vadd.f32 1.0, %v3396_v18  ;;  %3328 = vmatpush3.bf16.msra.mxu1 %v4435_v53 }
 0x251   : > { %1579 = vst.msk [vmem:[#allocation4 + $0x138] sm:$0xff] %vm426_vm4, %v1556_v60  ;;  %1864 = vrot.lane.b32.xlu1 %v1556_v60, %s3448_s27  ;;  %v1766_v24 = vrot.slane %v1557_v56, 2  ;;  %v1506_v4 = vmul.f32 %v4831_v8, %v3999_v36  ;;  %3399 = vpow2.f32 %v2959_v1 }
 0x252   : > { %v1955_v3 = vpop.permute.xlu0 %1954  ;;  %v1655_v7 = vsel %vm361_vm3, %v1653_v16, %v1654_v49  ;;  %3401 = vrcp.f32 %v1459_v32  ;;  %v1781_v46 = vpop.permute.xlu1 %1780 }
 0x253   : > { %2000 = vst.msk [vmem:[#allocation4 + $0x38] sm:$0xff] %vm501_vm5, %v1955_v3  ;;  %v1767_v11 = vsel %vm518_vm2, %v1765_v17, %v1766_v24  ;;  %v2196_v32 = vld [vmem:[#allocation4 + $0x30] sm:$0xff] }
 0x254   : > { %1940 = vst.msk [vmem:[#allocation4 + $0x128] sm:$0xff] %vm426_vm4, %v1655_v7  ;;  %1523 = vst.msk [vmem:[#allocation3 + $0x101] sm:$0xff] %vm426_vm4, %v1506_v4  ;;  %2110 = vrot.lane.b32.xlu0 %v1655_v7, %s3448_s27 }
 0x255   : > { %1825 = vst.msk [vmem:[#allocation4 + $0x48] sm:$0xff] %vm615_vm6, %v1781_v46  ;;  %1688 = vrot.lane.b32.xlu1 %v1655_v7, %s3447_s26 }
 0x256   : > { %2185 = vst.msk [vmem:[#allocation4 + $0x118] sm:$0xff] %vm426_vm4, %v1767_v11  ;;  %v2021_v36 = vpop.permute.xlu0 %2020  ;;  %v2194_v53 = vld [vmem:[#allocation4 + $0x20] sm:$0xff] }
 0x257   : > { %2066 = vst.msk [vmem:[#allocation4 + $0x38] sm:$0xff] %vm615_vm6, %v2021_v36  ;;  %v1847_v61 = vpop.permute.xlu1 %1846  ;;  %2407 = vmatprep.mubr.f32.mxu1 %v2194_v53 }
 0x258   : > { %1891 = vst.msk [vmem:[#allocation4 + $0x48] sm:$0xff] %vm680_vm7, %v1847_v61  ;;  %1974 = vrot.lane.b32.xlu0 %v1767_v11, %s3447_s26  ;;  %2408 = vmatmul.mubr.f32.gmra.mrb[18].mxu1 %v2193_v35 }
 0x259   : > { %1800 = vrot.lane.b32.xlu1 %v1767_v11, %s3446_s25 }
 0x25a   : > { %v2093_v27 = vpop.permute.xlu0 %2092 }
 0x25b   : > { %2138 = vst.msk [vmem:[#allocation4 + $0x38] sm:$0xff] %vm680_vm7, %v2093_v27  ;;  %v1671_v20 = vpop.permute.xlu1 %1670  ;;  %v1558_v57 = vld [vmem:[#allocation3 + $0x100] sm:$0xff]  ;;  %v1559_v37 = vld [vmem:[#allocation3 + $0x108] sm:$0x3]  ;;  %v3400_v23 = vpop.eup %3399 }
 0x25c   : > { %1714 = vst.msk [vmem:[#allocation4 + $0x60] sm:$0xff] %vm501_vm5, %v1671_v20  ;;  %2040 = vrot.lane.b32.xlu0 %v1558_v57, %s3446_s25  ;;  %v1656_v2 = vrot.slane %v1558_v57, 1  ;;  %v1657_v33 = vrot.slane %v1559_v37, 1  ;;  %v1768_v40 = vrot.slane %v1558_v57, 2  ;;  %v1769_v41 = vrot.slane %v1559_v37, 2  ;;  %v4854_v29 = vpop.eup %3401 }
 0x25d   : > { %1580 = vst.msk [vmem:[#allocation4 + $0x150] sm:$0xff] %vm426_vm4, %v1558_v57  ;;  %v1460_v10 = vadd.f32 1.0, %v3400_v23  ;;  %1866 = vrot.lane.b32.xlu1 %v1558_v57, %s3448_s27  ;;  %v1507_v60 = vmul.f32 %v4854_v29, %v4048_v21 }
 0x25e   : > { %v1957_v56 = vpop.permute.xlu0 %1956  ;;  %v1658_v18 = vsel %vm361_vm3, %v1656_v2, %v1657_v33  ;;  %v1770_v1 = vsel %vm518_vm2, %v1768_v40, %v1769_v41 }
 0x25f   : > { %3403 = vrcp.f32 %v1460_v10  ;;  %2001 = vst.msk [vmem:[#allocation4 + $0x50] sm:$0xff] %vm501_vm5, %v1957_v56  ;;  %v1783_v16 = vpop.permute.xlu1 %1782  ;;  %v2199_v40 = vld [vmem:[#allocation4 + $0x48] sm:$0xff] }
 0x260   : > { %1941 = vst.msk [vmem:[#allocation4 + $0x140] sm:$0xff] %vm426_vm4, %v1658_v18  ;;  %2186 = vst.msk [vmem:[#allocation4 + $0x130] sm:$0xff] %vm426_vm4, %v1770_v1  ;;  %2112 = vrot.lane.b32.xlu0 %v1658_v18, %s3448_s27 }
 0x261   : > { %1524 = vst.msk [vmem:[#allocation3 + $0x111] sm:$0xff] %vm426_vm4, %v1507_v60  ;;  %1690 = vrot.lane.b32.xlu1 %v1658_v18, %s3447_s26 }
 0x262   : > { %1826 = vst.msk [vmem:[#allocation4 + $0x60] sm:$0xff] %vm615_vm6, %v1783_v16  ;;  %v2023_v21 = vpop.permute.xlu0 %2022  ;;  %v2197_v49 = vld [vmem:[#allocation4 + $0x38] sm:$0xff] }
 0x263   : > { %2067 = vst.msk [vmem:[#allocation4 + $0x50] sm:$0xff] %vm615_vm6, %v2023_v21  ;;  %v1849_v17 = vpop.permute.xlu1 %1848  ;;  %2412 = vmatprep.mubr.f32.mxu1 %v2197_v49 }
 0x264   : > { %1892 = vst.msk [vmem:[#allocation4 + $0x60] sm:$0xff] %vm680_vm7, %v1849_v17  ;;  %1976 = vrot.lane.b32.xlu0 %v1770_v1, %s3447_s26  ;;  %2413 = vmatmul.mubr.f32.gmra.mrb[20].mxu1 %v2196_v32 }
 0x265   : > { %1802 = vrot.lane.b32.xlu1 %v1770_v1, %s3446_s25 }
 0x266   : > { %v2095_v24 = vpop.permute.xlu0 %2094 }
 0x267   : > { %2139 = vst.msk [vmem:[#allocation4 + $0x50] sm:$0xff] %vm680_vm7, %v2095_v24  ;;  %v1673_v4 = vpop.permute.xlu1 %1672 }
 0x268   : > { %v1560_v3 = vld [vmem:[#allocation3 + $0x110] sm:$0xff]  ;;  %v1561_v7 = vld [vmem:[#allocation3 + $0x118] sm:$0x3]  ;;  %1715 = vst.msk [vmem:[#allocation4 + $0x78] sm:$0xff] %vm501_vm5, %v1673_v4 }
 0x269   : > { %2042 = vrot.lane.b32.xlu0 %v1560_v3, %s3446_s25  ;;  %1581 = vst.msk [vmem:[#allocation4 + $0x168] sm:$0xff] %vm426_vm4, %v1560_v3  ;;  %v1659_v46 = vrot.slane %v1560_v3, 1  ;;  %v1660_v11 = vrot.slane %v1561_v7, 1  ;;  %v1771_v36 = vrot.slane %v1560_v3, 2  ;;  %v1772_v53 = vrot.slane %v1561_v7, 2  ;;  %v4876_v61 = vpop.eup %3403  ;;  %1868 = vrot.lane.b32.xlu1 %v1560_v3, %s3448_s27 }
 0x26a   : > { %v1508_v35 = vmul.f32 %v4876_v61, %v4081_v55  ;;  %v1959_v27 = vpop.permute.xlu0 %1958 }
 0x26b   : > { %v1661_v20 = vsel %vm361_vm3, %v1659_v46, %v1660_v11  ;;  %v1773_v57 = vsel %vm518_vm2, %v1771_v36, %v1772_v53  ;;  %2002 = vst.msk [vmem:[#allocation4 + $0x68] sm:$0xff] %vm501_vm5, %v1959_v27  ;;  %v1785_v37 = vpop.permute.xlu1 %1784  ;;  %v2202_v46 = vld [vmem:[#allocation4 + $0x60] sm:$0xff] }
 0x26c   : > { %1942 = vst.msk [vmem:[#allocation4 + $0x158] sm:$0xff] %vm426_vm4, %v1661_v20  ;;  %2187 = vst.msk [vmem:[#allocation4 + $0x148] sm:$0xff] %vm426_vm4, %v1773_v57 }
 0x26d   : > { %1525 = vst.msk [vmem:[#allocation3 + $0x121] sm:$0xff] %vm426_vm4, %v1508_v35  ;;  %2114 = vrot.lane.b32.xlu0 %v1661_v20, %s3448_s27  ;;  %1692 = vrot.lane.b32.xlu1 %v1661_v20, %s3447_s26 }
 0x26e   : > { %1827 = vst.msk [vmem:[#allocation4 + $0x78] sm:$0xff] %vm615_vm6, %v1785_v37  ;;  %v2025_v23 = vpop.permute.xlu0 %2024  ;;  %v2200_v2 = vld [vmem:[#allocation4 + $0x50] sm:$0xff] }
 0x26f   : > { %2068 = vst.msk [vmem:[#allocation4 + $0x68] sm:$0xff] %vm615_vm6, %v2025_v23  ;;  %v1851_v33 = vpop.permute.xlu1 %1850  ;;  %2417 = vmatprep.mubr.f32.mxu1 %v2200_v2 }
 0x270   : > { %1893 = vst.msk [vmem:[#allocation4 + $0x78] sm:$0xff] %vm680_vm7, %v1851_v33  ;;  %2418 = vmatmul.mubr.f32.gmra.mrb[22].mxu1 %v2199_v40 }
 0x271   : > { %1978 = vrot.lane.b32.xlu0 %v1773_v57, %s3447_s26  ;;  %1804 = vrot.lane.b32.xlu1 %v1773_v57, %s3446_s25 }
 0x272   : > { %v2097_v41 = vpop.permute.xlu0 %2096 }
 0x273   : > { %2140 = vst.msk [vmem:[#allocation4 + $0x68] sm:$0xff] %vm680_vm7, %v2097_v41  ;;  %v1675_v10 = vpop.permute.xlu1 %1674 }
 0x274   : > { %v1562_v60 = vld [vmem:[#allocation3 + $0x120] sm:$0xff]  ;;  %v1563_v56 = vld [vmem:[#allocation3 + $0x128] sm:$0x3]  ;;  %1716 = vst.msk [vmem:[#allocation4 + $0x90] sm:$0xff] %vm501_vm5, %v1675_v10 }
 0x275   : > { %v1909_v18 = vrot.slane %v1562_v60, 1  ;;  %v1947_v1 = vrot.slane %v1562_v60, 2  ;;  %2044 = vrot.lane.b32.xlu0 %v1562_v60, %s3446_s25  ;;  %v1910_v16 = vrot.slane %v1563_v56, 1  ;;  %v1948_v21 = vrot.slane %v1563_v56, 2  ;;  %1870 = vrot.lane.b32.xlu1 %v1562_v60, %s3448_s27 }
 0x276   : > { %v1961_v49 = vpop.permute.xlu0 %1960 }
 0x277   : > { %v1911_v17 = vsel %vm361_vm3, %v1909_v18, %v1910_v16  ;;  %v1949_v32 = vsel %vm518_vm2, %v1947_v1, %v1948_v21  ;;  %2003 = vst.msk [vmem:[#allocation4 + $0x80] sm:$0xff] %vm501_vm5, %v1961_v49  ;;  %v1787_v24 = vpop.permute.xlu1 %1786  ;;  %v2205_v57 = vld [vmem:[#allocation4 + $0x78] sm:$0xff] }
 0x278   : > { %1943 = vst.msk [vmem:[#allocation4 + $0x170] sm:$0xff] %vm426_vm4, %v1911_v17  ;;  %2188 = vst.msk [vmem:[#allocation4 + $0x160] sm:$0xff] %vm426_vm4, %v1949_v32 }
 0x279   : > { %1828 = vst.msk [vmem:[#allocation4 + $0x90] sm:$0xff] %vm615_vm6, %v1787_v24  ;;  %2116 = vrot.lane.b32.xlu0 %v1911_v17, %s3448_s27  ;;  %2662 = vrot.lane.b32.xlu1 %v4081_v55, %s3447_s26 }
 0x27a   : > { %v2027_v4 = vpop.permute.xlu0 %2026  ;;  %v2203_v3 = vld [vmem:[#allocation4 + $0x68] sm:$0xff] }
 0x27b   : > { %2069 = vst.msk [vmem:[#allocation4 + $0x80] sm:$0xff] %vm615_vm6, %v2027_v4  ;;  %v1853_v7 = vpop.permute.xlu1 %1852  ;;  %2422 = vmatprep.mubr.f32.mxu1 %v2203_v3 }
 0x27c   : > { %1894 = vst.msk [vmem:[#allocation4 + $0x90] sm:$0xff] %vm680_vm7, %v1853_v7  ;;  %2423 = vmatmul.mubr.f32.gmra.mrb[24].mxu1 %v2202_v46 }
 0x27d   : > { %1980 = vrot.lane.b32.xlu0 %v1949_v32, %s3447_s26 }
 0x27e   : > { %v2099_v11 = vpop.permute.xlu0 %2098 }
 0x27f   : > { %2141 = vst.msk [vmem:[#allocation4 + $0x80] sm:$0xff] %vm680_vm7, %v2099_v11  ;;  %v1677_v36 = vpop.permute.xlu1 %1676 }
 0x280   : > { %1717 = vst.msk [vmem:[#allocation4 + $0xa8] sm:$0xff] %vm501_vm5, %v1677_v36 }
 0x281   : > { %2118 = vrot.lane.b32.xlu0 %v4690_v12, %s3448_s27 }
 0x282   : > { %v1963_v55 = vpop.permute.xlu0 %1962 }
 0x283   : > { %2004 = vst.msk [vmem:[#allocation4 + $0x98] sm:$0xff] %vm501_vm5, %v1963_v55  ;;  %v1789_v53 = vpop.permute.xlu1 %1788  ;;  %v2208_v2 = vld [vmem:[#allocation4 + $0x90] sm:$0xff] }
 0x284   : > { %1829 = vst.msk [vmem:[#allocation4 + $0xa8] sm:$0xff] %vm615_vm6, %v1789_v53 }
 0x285   : > { %2660 = vrot.lane.b32.xlu0 %v3805_v15, %s3447_s26 }
 0x286   : > { %v2029_v35 = vpop.permute.xlu0 %2028  ;;  %v2206_v27 = vld [vmem:[#allocation4 + $0x80] sm:$0xff] }
 0x287   : > { %2070 = vst.msk [vmem:[#allocation4 + $0x98] sm:$0xff] %vm615_vm6, %v2029_v35  ;;  %v1855_v20 = vpop.permute.xlu1 %1854  ;;  %2427 = vmatprep.mubr.f32.mxu1 %v2206_v27 }
 0x288   : > { %1895 = vst.msk [vmem:[#allocation4 + $0xa8] sm:$0xff] %vm680_vm7, %v1855_v20  ;;  %2428 = vmatmul.mubr.f32.gmra.mrb[26].mxu1 %v2205_v57 }
 0x28a   : > { %v2101_v12 = vpop.permute.xlu0 %2100 }
 0x28b   : > { %2142 = vst.msk [vmem:[#allocation4 + $0x98] sm:$0xff] %vm680_vm7, %v2101_v12 }
 0x28e   : > { %v1965_v37 = vpop.permute.xlu0 %1964 }
 0x28f   : > { %2005 = vst.msk [vmem:[#allocation4 + $0xb0] sm:$0xff] %vm501_vm5, %v1965_v37  ;;  %v2211_v10 = vld [vmem:[#allocation4 + $0xa8] sm:$0xff] }
 0x290   : > { %2071 = vst.msk [vmem:[#allocation4 + $0xb0] sm:$0xff] %vm615_vm6, %v4745_v51 }
 0x291   : > { %2143 = vst.msk [vmem:[#allocation4 + $0xb0] sm:$0xff] %vm680_vm7, %v4752_v50  ;;  %v1857_v15 = vpop.permute.xlu1 %1856 }
 0x292   : > { %v2209_v23 = vld [vmem:[#allocation4 + $0x98] sm:$0xff]  ;;  %1896 = vst.msk [vmem:[#allocation4 + $0xc0] sm:$0xff] %vm680_vm7, %v1857_v15 }
 0x293   : > { %2432 = vmatprep.mubr.f32.mxu1 %v2209_v23 }
 0x294   : > { %2433 = vmatmul.mubr.f32.gmra.mrb[28].mxu1 %v2208_v2  ;;  %v1967_v33 = vpop.permute.xlu0 %1966 }
 0x295   : > { %2006 = vst.msk [vmem:[#allocation4 + $0xc8] sm:$0xff] %vm501_vm5, %v1967_v33  ;;  %v1681_v40 = vpop.permute.xlu1 %1680 }
 0x296   : > { %1719 = vst.msk [vmem:[#allocation4 + $0xd8] sm:$0xff] %vm501_vm5, %v1681_v40 }
 0x298   : > { %v2212_v41 = vld [vmem:[#allocation4 + $0xb0] sm:$0xff] }
 0x299   : > { %2437 = vmatprep.mubr.f32.mxu1 %v2212_v41  ;;  %v1793_v51 = vpop.permute.xlu1 %1792  ;;  %v2214_v32 = vld [vmem:[#allocation4 + $0xc0] sm:$0xff] }
 0x29a   : > { %2438 = vmatmul.mubr.f32.gmra.mrb[30].mxu1 %v2211_v10  ;;  %1831 = vst.msk [vmem:[#allocation4 + $0xd8] sm:$0xff] %vm615_vm6, %v1793_v51 }
 0x29d   : > { %v2033_v50 = vpop.permute.xlu0 %2032  ;;  %v1859_v60 = vpop.permute.xlu1 %1858 }
 0x29e   : > { %2072 = vst.msk [vmem:[#allocation4 + $0xc8] sm:$0xff] %vm615_vm6, %v2033_v50 }
 0x29f   : > { %1897 = vst.msk [vmem:[#allocation4 + $0xd8] sm:$0xff] %vm680_vm7, %v1859_v60 }
 0x2a1   : > { %v2105_v56 = vpop.permute.xlu0 %2104  ;;  %v1683_v18 = vpop.permute.xlu1 %1682 }
 0x2a2   : > { %2144 = vst.msk [vmem:[#allocation4 + $0xc8] sm:$0xff] %vm680_vm7, %v2105_v56 }
 0x2a3   : > { %1720 = vst.msk [vmem:[#allocation4 + $0xf0] sm:$0xff] %vm501_vm5, %v1683_v18 }
 0x2a5   : > { %v1969_v1 = vpop.permute.xlu0 %1968  ;;  %v1795_v16 = vpop.permute.xlu1 %1794 }
 0x2a6   : > { %2007 = vst.msk [vmem:[#allocation4 + $0xe0] sm:$0xff] %vm501_vm5, %v1969_v1  ;;  %v2217_v53 = vld [vmem:[#allocation4 + $0xd8] sm:$0xff] }
 0x2a7   : > { %1832 = vst.msk [vmem:[#allocation4 + $0xf0] sm:$0xff] %vm615_vm6, %v1795_v16 }
 0x2a9   : > { %v2215_v49 = vld [vmem:[#allocation4 + $0xc8] sm:$0xff] }
 0x2aa   : > { %v2035_v21 = vpop.permute.xlu0 %2034  ;;  %v1861_v17 = vpop.permute.xlu1 %1860  ;;  %2442 = vmatprep.mubr.f32.mxu1 %v2215_v49 }
 0x2ab   : > { %2073 = vst.msk [vmem:[#allocation4 + $0xe0] sm:$0xff] %vm615_vm6, %v2035_v21  ;;  %2443 = vmatmul.mubr.f32.gmra.mrb[32].mxu1 %v2214_v32 }
 0x2ac   : > { %1898 = vst.msk [vmem:[#allocation4 + $0xf0] sm:$0xff] %vm680_vm7, %v1861_v17 }
 0x2ae   : > { %v2107_v24 = vpop.permute.xlu0 %2106  ;;  %v1685_v4 = vpop.permute.xlu1 %1684 }
 0x2af   : > { %2145 = vst.msk [vmem:[#allocation4 + $0xe0] sm:$0xff] %vm680_vm7, %v2107_v24 }
 0x2b0   : > { %1721 = vst.msk [vmem:[#allocation4 + $0x108] sm:$0xff] %vm501_vm5, %v1685_v4 }
 0x2b2   : > { %v1971_v3 = vpop.permute.xlu0 %1970  ;;  %v1797_v7 = vpop.permute.xlu1 %1796 }
 0x2b3   : > { %2008 = vst.msk [vmem:[#allocation4 + $0xf8] sm:$0xff] %vm501_vm5, %v1971_v3  ;;  %v2220_v2 = vld [vmem:[#allocation4 + $0xf0] sm:$0xff] }
 0x2b4   : > { %1833 = vst.msk [vmem:[#allocation4 + $0x108] sm:$0xff] %vm615_vm6, %v1797_v7 }
 0x2b6   : > { %v2037_v46 = vpop.permute.xlu0 %2036  ;;  %v2218_v11 = vld [vmem:[#allocation4 + $0xe0] sm:$0xff] }
 0x2b7   : > { %v4942_v36 = vpop.f32.mrb[32].mxu0  ;;  %2074 = vst.msk [vmem:[#allocation4 + $0xf8] sm:$0xff] %vm615_vm6, %v2037_v46  ;;  %v1863_v55 = vpop.permute.xlu1 %1862  ;;  %2447 = vmatprep.mubr.f32.mxu1 %v2218_v11 }
 0x2b8   : > { %1899 = vst.msk [vmem:[#allocation4 + $0x108] sm:$0xff] %vm680_vm7, %v1863_v55  ;;  %v4946_v35 = vpop.f32.mrb[33].mxu0  ;;  %2448 = vmatmul.mubr.f32.gmra.mrb[34].mxu1 %v2217_v53 }
 0x2ba   : > { %v2109_v27 = vpop.permute.xlu0 %2108 }
 0x2bb   : > { %2146 = vst.msk [vmem:[#allocation4 + $0xf8] sm:$0xff] %vm680_vm7, %v2109_v27  ;;  %v1687_v20 = vpop.permute.xlu1 %1686 }
 0x2bc   : > { %1722 = vst.msk [vmem:[#allocation4 + $0x120] sm:$0xff] %vm501_vm5, %v1687_v20 }
 0x2be   : > { %v1973_v57 = vpop.permute.xlu0 %1972 }
 0x2bf   : > { %2009 = vst.msk [vmem:[#allocation4 + $0x110] sm:$0xff] %vm501_vm5, %v1973_v57  ;;  %v1799_v12 = vpop.permute.xlu1 %1798  ;;  %v2223_v18 = vld [vmem:[#allocation4 + $0x108] sm:$0xff] }
 0x2c0   : > { %1834 = vst.msk [vmem:[#allocation4 + $0x120] sm:$0xff] %vm615_vm6, %v1799_v12 }
 0x2c2   : > { %v2039_v37 = vpop.permute.xlu0 %2038  ;;  %v2221_v15 = vld [vmem:[#allocation4 + $0xf8] sm:$0xff] }
 0x2c3   : > { %2075 = vst.msk [vmem:[#allocation4 + $0x110] sm:$0xff] %vm615_vm6, %v2039_v37  ;;  %v1865_v23 = vpop.permute.xlu1 %1864  ;;  %2452 = vmatprep.mubr.f32.mxu1 %v2221_v15 }
 0x2c4   : > { %1900 = vst.msk [vmem:[#allocation4 + $0x120] sm:$0xff] %vm680_vm7, %v1865_v23  ;;  %2453 = vmatmul.mubr.f32.gmra.mrb[36].mxu1 %v2220_v2 }
 0x2c6   : > { %v2111_v33 = vpop.permute.xlu0 %2110 }
 0x2c7   : > { %2147 = vst.msk [vmem:[#allocation4 + $0x110] sm:$0xff] %vm680_vm7, %v2111_v33  ;;  %v1689_v40 = vpop.permute.xlu1 %1688 }
 0x2c8   : > { %1723 = vst.msk [vmem:[#allocation4 + $0x138] sm:$0xff] %vm501_vm5, %v1689_v40 }
 0x2ca   : > { %v1975_v41 = vpop.permute.xlu0 %1974 }
 0x2cb   : > { %2010 = vst.msk [vmem:[#allocation4 + $0x128] sm:$0xff] %vm501_vm5, %v1975_v41  ;;  %v1801_v10 = vpop.permute.xlu1 %1800  ;;  %v2226_v3 = vld [vmem:[#allocation4 + $0x120] sm:$0xff] }
 0x2cc   : > { %1835 = vst.msk [vmem:[#allocation4 + $0x138] sm:$0xff] %vm615_vm6, %v1801_v10 }
 0x2ce   : > { %v2041_v51 = vpop.permute.xlu0 %2040  ;;  %v2224_v50 = vld [vmem:[#allocation4 + $0x110] sm:$0xff]  ;;  %v4958_v60 = vpop.f32.mrb[34].mxu0 }
 0x2cf   : > { %2076 = vst.msk [vmem:[#allocation4 + $0x128] sm:$0xff] %vm615_vm6, %v2041_v51  ;;  %v1867_v56 = vpop.permute.xlu1 %1866  ;;  %2457 = vmatprep.mubr.f32.mxu1 %v2224_v50  ;;  %v4962_v1 = vpop.f32.mrb[35].mxu0 }
 0x2d0   : > { %1901 = vst.msk [vmem:[#allocation4 + $0x138] sm:$0xff] %vm680_vm7, %v1867_v56  ;;  %2458 = vmatmul.mubr.f32.gmra.mrb[38].mxu1 %v2223_v18  ;;  %v2222_v56 = vld [vmem:[#allocation4 + $0x100] sm:$0xff]  ;;  %v2228_v18 = vld [vmem:[#allocation4 + $0x130] sm:$0xff] }
 0x2d2   : > { %v2113_v16 = vpop.permute.xlu0 %2112 }
 0x2d3   : > { %2148 = vst.msk [vmem:[#allocation4 + $0x128] sm:$0xff] %vm680_vm7, %v2113_v16  ;;  %v1691_v21 = vpop.permute.xlu1 %1690  ;;  %v2231_v16 = vld [vmem:[#allocation4 + $0x148] sm:$0xff] }
 0x2d4   : > { %1724 = vst.msk [vmem:[#allocation4 + $0x150] sm:$0xff] %vm501_vm5, %v1691_v21  ;;  %v2234_v21 = vld [vmem:[#allocation4 + $0x160] sm:$0xff] }
 0x2d6   : > { %v1977_v49 = vpop.permute.xlu0 %1976 }
 0x2d7   : > { %2011 = vst.msk [vmem:[#allocation4 + $0x140] sm:$0xff] %vm501_vm5, %v1977_v49  ;;  %v1803_v17 = vpop.permute.xlu1 %1802  ;;  %v2229_v12 = vld [vmem:[#allocation4 + $0x138] sm:$0xff] }
 0x2d8   : > { %1836 = vst.msk [vmem:[#allocation4 + $0x150] sm:$0xff] %vm615_vm6, %v1803_v17  ;;  %v2237_v49 = vld [vmem:[#allocation4 + $0x178] sm:$0xff] }
 0x2da   : > { %v2227_v24 = vld [vmem:[#allocation4 + $0x128] sm:$0xff] }
 0x2db   : > { %v2043_v32 = vpop.permute.xlu0 %2042  ;;  %v1869_v4 = vpop.permute.xlu1 %1868  ;;  %2462 = vmatprep.mubr.f32.mxu1 %v2227_v24 }
 0x2dc   : > { %2077 = vst.msk [vmem:[#allocation4 + $0x140] sm:$0xff] %vm615_vm6, %v2043_v32  ;;  %2463 = vmatmul.mubr.f32.gmra.mrb[40].mxu1 %v2226_v3 }
 0x2dd   : > { %1902 = vst.msk [vmem:[#allocation4 + $0x150] sm:$0xff] %vm680_vm7, %v1869_v4  ;;  %v2274_v4 = vld [vmem:[%s3494_s24] sm:$0xff] }
 0x2df   : > { %v2115_v7 = vpop.permute.xlu0 %2114  ;;  %v1693_v46 = vpop.permute.xlu1 %1692 }
 0x2e0   : > { %2149 = vst.msk [vmem:[#allocation4 + $0x140] sm:$0xff] %vm680_vm7, %v2115_v7 }
 0x2e1   : > { %1725 = vst.msk [vmem:[#allocation4 + $0x168] sm:$0xff] %vm501_vm5, %v1693_v46 }
 0x2e3   : > { %v1979_v11 = vpop.permute.xlu0 %1978  ;;  %v1805_v55 = vpop.permute.xlu1 %1804 }
 0x2e4   : > { %2012 = vst.msk [vmem:[#allocation4 + $0x158] sm:$0xff] %vm501_vm5, %v1979_v11  ;;  %v2232_v40 = vld [vmem:[#allocation4 + $0x150] sm:$0xff] }
 0x2e5   : > { %1837 = vst.msk [vmem:[#allocation4 + $0x168] sm:$0xff] %vm615_vm6, %v1805_v55 }
 0x2e7   : > { %v2045_v53 = vpop.permute.xlu0 %2044  ;;  %v2230_v27 = vld [vmem:[#allocation4 + $0x140] sm:$0xff]  ;;  %v4974_v20 = vpop.f32.mrb[36].mxu0 }
 0x2e8   : > { %2078 = vst.msk [vmem:[#allocation4 + $0x158] sm:$0xff] %vm615_vm6, %v2045_v53  ;;  %v1871_v57 = vpop.permute.xlu1 %1870  ;;  %2467 = vmatprep.mubr.f32.mxu1 %v2230_v27  ;;  %v4978_v37 = vpop.f32.mrb[37].mxu0  ;;  %v2275_v53 = vld [vmem:[%s3494_s24 + $0x8] sm:$0xff] }
 0x2e9   : > { %1903 = vst.msk [vmem:[#allocation4 + $0x168] sm:$0xff] %vm680_vm7, %v1871_v57  ;;  %2468 = vmatmul.mubr.f32.gmra.mrb[42].mxu1 %v2229_v12 }
 0x2eb   : > { %v2117_v15 = vpop.permute.xlu0 %2116 }
 0x2ec   : > { %2150 = vst.msk [vmem:[#allocation4 + $0x158] sm:$0xff] %vm680_vm7, %v2117_v15 }
 0x2ef   : > { %v1981_v23 = vpop.permute.xlu0 %1980 }
 0x2f0   : > { %2013 = vst.msk [vmem:[#allocation4 + $0x170] sm:$0xff] %vm501_vm5, %v1981_v23  ;;  %v2235_v50 = vld [vmem:[#allocation4 + $0x168] sm:$0xff] }
 0x2f1   : > { %2079 = vst.msk [vmem:[#allocation4 + $0x170] sm:$0xff] %vm615_vm6, %v4764_v62  ;;  %v2225_v62 = vld [vmem:[#allocation4 + $0x118] sm:$0xff] }
 0x2f3   : > { %v2119_v2 = vpop.permute.xlu0 %2118  ;;  %v2233_v33 = vld [vmem:[#allocation4 + $0x158] sm:$0xff]  ;;  %v4985_v41 = vpop.f32.mrb[38].mxu0 }
 0x2f4   : > { %2151 = vst.msk [vmem:[#allocation4 + $0x170] sm:$0xff] %vm680_vm7, %v2119_v2  ;;  %2472 = vmatprep.mubr.f32.mxu1 %v2233_v33  ;;  %v4987_v10 = vpop.f32.mrb[39].mxu0  ;;  %v2276_v33 = vld [vmem:[%s3494_s24 + $0x10] sm:$0xff] }
 0x2f5   : > { %2473 = vmatmul.mubr.f32.gmra.mrb[44].mxu1 %v2232_v40 }
 0x2fb   : > { %v2236_v51 = vld [vmem:[#allocation4 + $0x170] sm:$0xff] }
 0x2fc   : > { %2477 = vmatprep.mubr.f32.mxu1 %v2236_v51 }
 0x2fd   : > { %2478 = vmatmul.mubr.f32.gmra.mrb[46].mxu1 %v2235_v50 }
 0x2fe   : > { %3236 = vmatprep.mubr.msk.f32.mxu1 %vm426_vm4, %v2222_v56 }
 0x301   : > { %3237 = vmatmul.mubr.msk.f32.vlgmr.msra.gmra.mrb[48].mxu1 %vm426_vm4, %v2225_v62 }
 0x302   : > { %3239 = vmatprep.mubr.msk.f32.mxu1 %vm426_vm4, %v2228_v18  ;;  %v2277_v18 = vld [vmem:[%s3494_s24 + $0x18] sm:$0xff] }
 0x305   : > { %3240 = vmatmul.mubr.msk.f32.gmra.mrb[50].mxu1 %vm426_vm4, %v2231_v16 }
 0x306   : > { %3242 = vmatprep.mubr.msk.f32.mxu1 %vm426_vm4, %v2234_v21 }
 0x309   : > { %3243 = vmatmul.mubr.msk.f32.gmra.mrb[52].mxu1 %vm426_vm4, %v2237_v49 }
 0x317   : > { %v4995_v17 = vpop.f32.mrb[40].mxu0 }
 0x318   : > { %v4997_v32 = vpop.f32.mrb[41].mxu0 }
 0x31e   : > { %v3113_v24 = vpop.f32.mrb[16].mxu1 }
 0x31f   : > { %v3114_v3 = vpop.f32.mrb[17].mxu1 }
 0x320   : > { %v3115_v7 = vadd.f32 %v3114_v3, %v3113_v24  ;;  %v2278_v3 = vld [vmem:[%s3494_s24 + $0x20] sm:$0xff] }
 0x322   : > { %v2405_v46 = vadd.f32 %v3115_v7, %v2274_v4 }
 0x324   : > { %v2550_v11 = vadd.f32 %v4946_v35, %v2405_v46 }
 0x326   : > { %3405 = vtanh.f32 %v2550_v11 }
 0x32b   : > { %v3116_v55 = vpop.f32.mrb[18].mxu1 }
 0x32c   : > { %v3117_v27 = vpop.f32.mrb[19].mxu1 }
 0x32d   : > { %v3118_v57 = vadd.f32 %v3117_v27, %v3116_v55  ;;  %v2279_v27 = vld [vmem:[%s3494_s24 + $0x28] sm:$0xff] }
 0x32f   : > { %v2410_v12 = vadd.f32 %v3118_v57, %v2275_v53 }
 0x330   : > { %v3406_v15 = vpop.eup %3405 }
 0x331   : > { %v2555_v23 = vadd.f32 %v4942_v36, %v2410_v12  ;;  %2698 = vrot.lane.b32.xlu0 %v3406_v15, %s3447_s26 }
 0x333   : > { %3407 = vtanh.f32 %v2555_v23 }
 0x337   : > { %v3119_v2 = vpop.f32.mrb[20].mxu1 }
 0x338   : > { %v3120_v40 = vpop.f32.mrb[21].mxu1 }
 0x339   : > { %v3121_v51 = vadd.f32 %v3120_v40, %v3119_v2 }
 0x33b   : > { %v2415_v50 = vadd.f32 %v3121_v51, %v2276_v33  ;;  %v2280_v33 = vld [vmem:[%s3494_s24 + $0x30] sm:$0xff] }
 0x33d   : > { %v3408_v35 = vpop.eup %3407  ;;  %v2560_v56 = vadd.f32 %v4962_v1, %v2415_v50 }
 0x33e   : > { %2700 = vrot.lane.b32.xlu1 %v3408_v35, %s3447_s26 }
 0x33f   : > { %3409 = vtanh.f32 %v2560_v56 }
 0x343   : > { %v3122_v62 = vpop.f32.mrb[22].mxu1 }
 0x344   : > { %v3123_v16 = vpop.f32.mrb[23].mxu1 }
 0x345   : > { %v3124_v21 = vadd.f32 %v3123_v16, %v3122_v62  ;;  %v2281_v62 = vld [vmem:[%s3494_s24 + $0x38] sm:$0xff] }
 0x347   : > { %v2420_v36 = vadd.f32 %v3124_v21, %v2277_v18 }
 0x349   : > { %v3410_v49 = vpop.eup %3409  ;;  %v2565_v24 = vadd.f32 %v4958_v60, %v2420_v36 }
 0x34a   : > { %2702 = vrot.lane.b32.xlu0 %v3410_v49, %s3447_s26 }
 0x34b   : > { %3411 = vtanh.f32 %v2565_v24 }
 0x34f   : > { %v3125_v4 = vpop.f32.mrb[24].mxu1 }
 0x350   : > { %v3126_v7 = vpop.f32.mrb[25].mxu1 }
 0x351   : > { %v3127_v46 = vadd.f32 %v3126_v7, %v3125_v4  ;;  %v2282_v4 = vld [vmem:[%s3494_s24 + $0x40] sm:$0xff] }
 0x353   : > { %v2425_v1 = vadd.f32 %v3127_v46, %v2278_v3 }
 0x355   : > { %v3412_v11 = vpop.eup %3411  ;;  %v2570_v55 = vadd.f32 %v4978_v37, %v2425_v1 }
 0x356   : > { %2704 = vrot.lane.b32.xlu1 %v3412_v11, %s3447_s26  ;;  %v2283_v11 = vld [vmem:[%s3494_s24 + $0x48] sm:$0xff] }
 0x357   : > { %3413 = vtanh.f32 %v2570_v55 }
 0x35b   : > { %v3128_v53 = vpop.f32.mrb[26].mxu1 }
 0x35c   : > { %v3129_v57 = vpop.f32.mrb[27].mxu1 }
 0x35d   : > { %v3130_v60 = vadd.f32 %v3129_v57, %v3128_v53 }
 0x35f   : > { %v2430_v12 = vadd.f32 %v3130_v60, %v2279_v27 }
 0x361   : > { %v3414_v15 = vpop.eup %3413  ;;  %v2575_v23 = vadd.f32 %v4974_v20, %v2430_v12 }
 0x362   : > { %2706 = vrot.lane.b32.xlu0 %v3414_v15, %s3447_s26 }
 0x363   : > { %3415 = vtanh.f32 %v2575_v23 }
 0x367   : > { %v3131_v2 = vpop.f32.mrb[28].mxu1 }
 0x368   : > { %v3132_v40 = vpop.f32.mrb[29].mxu1 }
 0x369   : > { %v3133_v51 = vadd.f32 %v3132_v40, %v3131_v2 }
 0x36b   : > { %v2435_v37 = vadd.f32 %v3133_v51, %v2280_v33 }
 0x36d   : > { %v3416_v50 = vpop.eup %3415  ;;  %v2580_v35 = vadd.f32 %v4987_v10, %v2435_v37  ;;  %v3134_v56 = vpop.f32.mrb[30].mxu1 }
 0x36e   : > { %v3135_v18 = vpop.f32.mrb[31].mxu1  ;;  %2708 = vrot.lane.b32.xlu1 %v3416_v50, %s3447_s26 }
 0x36f   : > { %3417 = vtanh.f32 %v2580_v35  ;;  %v3136_v16 = vadd.f32 %v3135_v18, %v3134_v56 }
 0x371   : > { %v2440_v20 = vadd.f32 %v3136_v16, %v2281_v62 }
 0x373   : > { %v2585_v21 = vadd.f32 %v4985_v41, %v2440_v20  ;;  %v2285_v20 = vld [vmem:[%s3494_s24 + $0x58] sm:$0xff] }
 0x375   : > { %3419 = vtanh.f32 %v2585_v21 }
 0x379   : > { %v3418_v36 = vpop.eup %3417 }
 0x37a   : > { %2710 = vrot.lane.b32.xlu0 %v3418_v36, %s3447_s26  ;;  %v2284_v36 = vld [vmem:[%s3494_s24 + $0x50] sm:$0xff] }
 0x37e   : > { %v3137_v24 = vpop.f32.mrb[32].mxu1 }
 0x37f   : > { %v3420_v49 = vpop.eup %3419  ;;  %v3138_v3 = vpop.f32.mrb[33].mxu1 }
 0x380   : > { %2712 = vrot.lane.b32.xlu1 %v3420_v49, %s3447_s26  ;;  %v3139_v10 = vadd.f32 %v3138_v3, %v3137_v24 }
 0x382   : > { %v2445_v7 = vadd.f32 %v3139_v10, %v2282_v4  ;;  %v2287_v10 = vld [vmem:[%s3494_s24 + $0x68] sm:$0xff] }
 0x384   : > { %v2590_v46 = vadd.f32 %v4997_v32, %v2445_v7 }
 0x386   : > { %3421 = vtanh.f32 %v2590_v46 }
 0x38b   : > { %v3140_v1 = vpop.f32.mrb[34].mxu1 }
 0x38c   : > { %v3141_v55 = vpop.f32.mrb[35].mxu1 }
 0x38d   : > { %v3142_v53 = vadd.f32 %v3141_v55, %v3140_v1  ;;  %v2286_v1 = vld [vmem:[%s3494_s24 + $0x60] sm:$0xff] }
 0x38f   : > { %v2450_v41 = vadd.f32 %v3142_v53, %v2283_v11 }
 0x390   : > { %v3422_v27 = vpop.eup %3421 }
 0x391   : > { %v2595_v57 = vadd.f32 %v4995_v17, %v2450_v41  ;;  %2714 = vrot.lane.b32.xlu0 %v3422_v27, %s3447_s26  ;;  %v2289_v27 = vld [vmem:[%s3494_s24 + $0x78] sm:$0xff] }
 0x393   : > { %3423 = vtanh.f32 %v2595_v57 }
 0x397   : > { %v3143_v60 = vpop.f32.mrb[36].mxu1 }
 0x398   : > { %v3144_v12 = vpop.f32.mrb[37].mxu1 }
 0x399   : > { %v3145_v15 = vadd.f32 %v3144_v12, %v3143_v60  ;;  %v2288_v12 = vld [vmem:[%s3494_s24 + $0x70] sm:$0xff] }
 0x39b   : > { %v2455_v3 = vadd.f32 %v3145_v15, %v2284_v36 }
 0x39d   : > { %v3424_v23 = vpop.eup %3423 }
 0x39e   : > { %2716 = vrot.lane.b32.xlu1 %v3424_v23, %s3447_s26 }
 0x3a3   : > { %v3146_v32 = vpop.f32.mrb[38].mxu1 }
 0x3a4   : > { %v3147_v2 = vpop.f32.mrb[39].mxu1 }
 0x3a5   : > { %v3148_v33 = vadd.f32 %v3147_v2, %v3146_v32 }
 0x3a7   : > { %v2460_v24 = vadd.f32 %v3148_v33, %v2285_v20 }
 0x3af   : > { %v3149_v40 = vpop.f32.mrb[40].mxu1 }
 0x3b0   : > { %v3150_v51 = vpop.f32.mrb[41].mxu1 }
 0x3b1   : > { %v3151_v37 = vadd.f32 %v3150_v51, %v3149_v40 }
 0x3b3   : > { %v2465_v41 = vadd.f32 %v3151_v37, %v2286_v1  ;;  %v2661_v37 = vpop.permute.xlu0 %2660 }
 0x3b7   : > { %v2699_v20 = vpop.permute.xlu0 %2698 }
 0x3bc   : > { %v3152_v50 = vpop.f32.mrb[42].mxu1 }
 0x3bd   : > { %v3153_v17 = vpop.f32.mrb[43].mxu1 }
 0x3be   : > { %v3154_v35 = vadd.f32 %v3153_v17, %v3152_v50  ;;  %v5035_v17 = vpop.permute.xlu1 %2662 }
 0x3c0   : > { %v2470_v55 = vadd.f32 %v3154_v35, %v2287_v10 }
 0x3c8   : > { %v3155_v56 = vpop.f32.mrb[44].mxu1 }
 0x3c9   : > { %v3156_v62 = vpop.f32.mrb[45].mxu1 }
 0x3ca   : > { %v3157_v18 = vadd.f32 %v3156_v62, %v3155_v56  ;;  %v2701_v62 = vpop.permute.xlu1 %2700 }
 0x3cb   : > { %v2747_v36 = vmul.f32 %v4555_v26, %v2701_v62 }
 0x3cc   : > { %v2475_v15 = vadd.f32 %v3157_v18, %v2288_v12  ;;  %v2645_v18 = vsub.f32 1.0, %v4555_v26 }
 0x3ce   : > { %v2667_v10 = vmul.f32 %v2645_v18, %v4217_v22 }
 0x3d0   : > { %v3158_v16 = vpop.f32.mrb[46].mxu1 }
 0x3d1   : > { %v3159_v21 = vpop.f32.mrb[47].mxu1 }
 0x3d2   : > { %v3160_v49 = vadd.f32 %v3159_v21, %v3158_v16  ;;  %v2644_v21 = vsub.f32 1.0, %v4511_v31 }
 0x3d4   : > { %v3238_v4 = vpop.f32.mrb[48].mxu1  ;;  %v2480_v32 = vadd.f32 %v3160_v49, %v2289_v27  ;;  %v2666_v1 = vmul.f32 %v2644_v21, %v4194_v44 }
 0x3d5   : > { %v2605_v7 = vadd.f32 %v3238_v4, %v2460_v24  ;;  %v2599_v46 = vpop.f32.mrb[49].mxu1  ;;  %v2746_v24 = vmul.f32 %v4511_v31, %v2699_v20  ;;  %v2705_v4 = vpop.permute.xlu1 %2704 }
 0x3d6   : > { %v2600_v11 = vadd.f32 %v2599_v46, %v2455_v3  ;;  %v2647_v46 = vsub.f32 1.0, %v4619_v34  ;;  %v2749_v26 = vmul.f32 %v4619_v34, %v2705_v4 }
 0x3d7   : > { %3425 = vtanh.f32 %v2605_v7  ;;  %v2703_v7 = vpop.permute.xlu0 %2702 }
 0x3d8   : > { %3427 = vtanh.f32 %v2600_v11  ;;  %v3241_v53 = vpop.f32.mrb[50].mxu1  ;;  %v2646_v11 = vsub.f32 1.0, %v4600_v52  ;;  %v2748_v31 = vmul.f32 %v4600_v52, %v2703_v7  ;;  %v2669_v22 = vmul.f32 %v2647_v46, %v4261_v14 }
 0x3d9   : > { %v2615_v57 = vadd.f32 %v3241_v53, %v2470_v55  ;;  %v2609_v60 = vpop.f32.mrb[51].mxu1  ;;  %v2763_v55 = vadd.f32 %v2747_v36, %v2667_v10  ;;  %v2762_v53 = vadd.f32 %v2746_v24, %v2666_v1  ;;  %v2655_v36 = vsub.f32 1.0, %v4781_v5 }
 0x3da   : > { %v2610_v23 = vadd.f32 %v2609_v60, %v2465_v41  ;;  %v2668_v44 = vmul.f32 %v2646_v11, %v4238_v39  ;;  %v2648_v60 = vsub.f32 1.0, %v4638_v63  ;;  %v2765_v12 = vadd.f32 %v2749_v26, %v2669_v22 }
 0x3db   : > { %3429 = vtanh.f32 %v2615_v57  ;;  %v2707_v27 = vpop.permute.xlu0 %2706  ;;  %v2649_v57 = vsub.f32 1.0, %v4657_v54 }
 0x3dc   : > { %3431 = vtanh.f32 %v2610_v23  ;;  %v3244_v2 = vpop.f32.mrb[52].mxu1  ;;  %v2764_v23 = vadd.f32 %v2748_v31, %v2668_v44  ;;  %v2750_v52 = vmul.f32 %v4638_v63, %v2707_v27 }
 0x3dd   : > { %v2625_v33 = vadd.f32 %v3244_v2, %v2480_v32  ;;  %v2619_v40 = vpop.f32.mrb[53].mxu1  ;;  %v2671_v32 = vmul.f32 %v2649_v57, %v4307_v0  ;;  %v2670_v2 = vmul.f32 %v2648_v60, %v4282_v43 }
 0x3de   : > { %v2620_v51 = vadd.f32 %v2619_v40, %v2475_v15  ;;  %v2650_v15 = vsub.f32 1.0, %v4677_v28 }
 0x3df   : > { %3433 = vtanh.f32 %v2625_v33  ;;  %v2651_v33 = vsub.f32 1.0, %v4702_v25 }
 0x3e0   : > { %3435 = vtanh.f32 %v2620_v51  ;;  %v2709_v41 = vpop.permute.xlu1 %2708  ;;  %v2766_v51 = vadd.f32 %v2750_v52, %v2670_v2  ;;  %v2672_v0 = vmul.f32 %v2650_v15, %v4320_v48  ;;  %v2653_v48 = vsub.f32 1.0, %v4737_v9 }
 0x3e1   : > { %v3426_v50 = vpop.eup %3425  ;;  %v2751_v34 = vmul.f32 %v4657_v54, %v2709_v41 }
 0x3e2   : > { %v3428_v35 = vpop.eup %3427  ;;  %2720 = vrot.lane.b32.xlu1 %v3426_v50, %s3447_s26  ;;  %v2673_v50 = vmul.f32 %v2661_v37, %v2651_v33  ;;  %v2675_v20 = vmul.f32 %v2653_v48, %v4344_v38 }
 0x3e3   : > { %2718 = vrot.lane.b32.xlu0 %v3428_v35, %s3447_s26  ;;  %v2767_v40 = vadd.f32 %v2751_v34, %v2671_v32 }
 0x3e5   : > { %v3430_v56 = vpop.eup %3429 }
 0x3e6   : > { %v3432_v16 = vpop.eup %3431  ;;  %2724 = vrot.lane.b32.xlu1 %v3430_v56, %s3447_s26  ;;  %v2652_v56 = vsub.f32 1.0, %v4720_v45 }
 0x3e7   : > { %2722 = vrot.lane.b32.xlu0 %v3432_v16, %s3447_s26 }
 0x3e9   : > { %v3434_v49 = vpop.eup %3433 }
 0x3ea   : > { %v3436_v3 = vpop.eup %3435  ;;  %2728 = vrot.lane.b32.xlu1 %v3434_v49, %s3447_s26  ;;  %v2654_v49 = vsub.f32 1.0, %v4758_v42 }
 0x3eb   : > { %2726 = vrot.lane.b32.xlu0 %v3436_v3, %s3447_s26  ;;  %v2657_v3 = vsub.f32 1.0, %v4831_v8 }
 0x3ec   : > { %v2711_v14 = vpop.permute.xlu0 %2710  ;;  %v2676_v10 = vmul.f32 %v2654_v49, %v4356_v6  ;;  %v2658_v6 = vsub.f32 1.0, %v4854_v29 }
 0x3ed   : > { %v2752_v63 = vmul.f32 %v4677_v28, %v2711_v14  ;;  %v2679_v11 = vmul.f32 %v2657_v3, %v4411_v19 }
 0x3ee   : > { %2796 = vrot.lane.b32.xlu1 %v2763_v55, %s3448_s27 }
 0x3ef   : > { %2794 = vrot.lane.b32.xlu0 %v2762_v53, %s3448_s27  ;;  %v2768_v35 = vadd.f32 %v2752_v63, %v2672_v0 }
 0x3f2   : > { %2800 = vrot.lane.b32.xlu1 %v2765_v12, %s3448_s27  ;;  %v2713_v39 = vpop.permute.xlu1 %2712 }
 0x3f3   : > { %2798 = vrot.lane.b32.xlu0 %v2764_v23, %s3448_s27  ;;  %v2753_v54 = vmul.f32 %v4702_v25, %v2713_v39  ;;  %v2674_v25 = vmul.f32 %v2652_v56, %v4335_v30 }
 0x3f5   : > { %v2769_v43 = vadd.f32 %v2753_v54, %v2673_v50 }
 0x3f6   : > { %2804 = vrot.lane.b32.xlu1 %v2767_v40, %s3448_s27 }
 0x3f7   : > { %2802 = vrot.lane.b32.xlu0 %v2766_v51, %s3448_s27 }
 0x3fa   : > { %2808 = vrot.lane.b32.xlu1 %v2769_v43, %s3448_s27 }
 0x3fb   : > { %2806 = vrot.lane.b32.xlu0 %v2768_v35, %s3448_s27 }
 0x403   : > { %v2715_v62 = vpop.permute.xlu0 %2714 }
 0x404   : > { %v2754_v28 = vmul.f32 %v4720_v45, %v2715_v62  ;;  %v2677_v45 = vmul.f32 %v2655_v36, %v4383_v47 }
 0x406   : > { %v2770_v37 = vadd.f32 %v2754_v28, %v2674_v25 }
 0x408   : > { %2810 = vrot.lane.b32.xlu0 %v2770_v37, %s3448_s27 }
 0x410   : > { %v2717_v16 = vpop.permute.xlu1 %2716 }
 0x411   : > { %v2755_v18 = vmul.f32 %v4737_v9, %v2717_v16  ;;  %v2656_v9 = vsub.f32 1.0, %v4805_v13 }
 0x413   : > { %v2771_v21 = vadd.f32 %v2755_v18, %v2675_v20  ;;  %v2678_v47 = vmul.f32 %v2656_v9, %v4396_v58  ;;  %v2680_v58 = vmul.f32 %v2658_v6, %v4439_v59 }
 0x415   : > { %2812 = vrot.lane.b32.xlu1 %v2771_v21, %s3448_s27 }
 0x454   : > { %v2721_v30 = vpop.permute.xlu1 %2720 }
 0x455   : > { %v2757_v24 = vmul.f32 %v4781_v5, %v2721_v30  ;;  %v2719_v4 = vpop.permute.xlu0 %2718 }
 0x456   : > { %v2756_v38 = vmul.f32 %v4758_v42, %v2719_v4  ;;  %v2659_v42 = vsub.f32 1.0, %v4876_v61 }
 0x457   : > { %v2773_v7 = vadd.f32 %v2757_v24, %v2677_v45 }
 0x458   : > { %v2772_v46 = vadd.f32 %v2756_v38, %v2676_v10  ;;  %v2725_v1 = vpop.permute.xlu1 %2724  ;;  %v2681_v19 = vmul.f32 %v5035_v17, %v2659_v42 }
 0x459   : > { %v2759_v55 = vmul.f32 %v4831_v8, %v2725_v1  ;;  %v2723_v26 = vpop.permute.xlu0 %2722  ;;  %2816 = vrot.lane.b32.xlu1 %v2773_v7, %s3448_s27 }
 0x45a   : > { %v2758_v5 = vmul.f32 %v4805_v13, %v2723_v26  ;;  %2814 = vrot.lane.b32.xlu0 %v2772_v46, %s3448_s27 }
 0x45b   : > { %v2775_v53 = vadd.f32 %v2759_v55, %v2679_v11 }
 0x45c   : > { %v2774_v31 = vadd.f32 %v2758_v5, %v2678_v47  ;;  %v2729_v41 = vpop.permute.xlu1 %2728 }
 0x45d   : > { %v2761_v8 = vmul.f32 %v4876_v61, %v2729_v41  ;;  %v2727_v22 = vpop.permute.xlu0 %2726  ;;  %2820 = vrot.lane.b32.xlu1 %v2775_v53, %s3448_s27 }
 0x45e   : > { %v2760_v13 = vmul.f32 %v4854_v29, %v2727_v22  ;;  %2818 = vrot.lane.b32.xlu0 %v2774_v31, %s3448_s27 }
 0x45f   : > { %v2777_v27 = vadd.f32 %v2761_v8, %v2681_v19 }
 0x460   : > { %v2776_v57 = vadd.f32 %v2760_v13, %v2680_v58  ;;  %v2797_v44 = vpop.permute.xlu1 %2796 }
 0x461   : > { %2844 = vst.msk [vmem:[#allocation2 + $0x21] sm:$0xff] %vm426_vm4, %v2797_v44  ;;  %v2795_v60 = vpop.permute.xlu0 %2794  ;;  %2824 = vrot.lane.b32.xlu1 %v2777_v27, %s3448_s27  ;;  %2864 = vst.msk [vmem:[%s5194_s4 + $0x8] sm:$0xff] (!%p2976_p5), %vm426_vm4, %v2797_v44 }
 0x462   : > { %2843 = vst.msk [vmem:[#allocation2 + $0x11] sm:$0xff] %vm426_vm4, %v2795_v60  ;;  %2822 = vrot.lane.b32.xlu0 %v2776_v57, %s3448_s27  ;;  %2863 = vst.msk [vmem:[%s5194_s4] sm:$0xff] (!%p2976_p5), %vm426_vm4, %v2795_v60 }
 0x464   : > { %v2801_v61 = vpop.permute.xlu1 %2800 }
 0x465   : > { %2846 = vst.msk [vmem:[#allocation2 + $0x41] sm:$0xff] %vm426_vm4, %v2801_v61  ;;  %v2799_v59 = vpop.permute.xlu0 %2798  ;;  %2866 = vst.msk [vmem:[%s5194_s4 + $0x18] sm:$0xff] (!%p2976_p5), %vm426_vm4, %v2801_v61 }
 0x466   : > { %2845 = vst.msk [vmem:[#allocation2 + $0x31] sm:$0xff] %vm426_vm4, %v2799_v59  ;;  %2865 = vst.msk [vmem:[%s5194_s4 + $0x10] sm:$0xff] (!%p2976_p5), %vm426_vm4, %v2799_v59 }
 0x468   : > { %v2805_v29 = vpop.permute.xlu1 %2804 }
 0x469   : > { %2848 = vst.msk [vmem:[#allocation2 + $0x61] sm:$0xff] %vm426_vm4, %v2805_v29  ;;  %v2803_v17 = vpop.permute.xlu0 %2802  ;;  %2868 = vst.msk [vmem:[%s5194_s4 + $0x28] sm:$0xff] (!%p2976_p5), %vm426_vm4, %v2805_v29 }
 0x46a   : > { %2847 = vst.msk [vmem:[#allocation2 + $0x51] sm:$0xff] %vm426_vm4, %v2803_v17  ;;  %2867 = vst.msk [vmem:[%s5194_s4 + $0x20] sm:$0xff] (!%p2976_p5), %vm426_vm4, %v2803_v17 }
 0x46c   : > { %v2809_v12 = vpop.permute.xlu1 %2808 }
 0x46d   : > { %2850 = vst.msk [vmem:[#allocation2 + $0x81] sm:$0xff] %vm426_vm4, %v2809_v12  ;;  %v2807_v34 = vpop.permute.xlu0 %2806  ;;  %2870 = vst.msk [vmem:[%s5194_s4 + $0x38] sm:$0xff] (!%p2976_p5), %vm426_vm4, %v2809_v12 }
 0x46e   : > { %2849 = vst.msk [vmem:[#allocation2 + $0x71] sm:$0xff] %vm426_vm4, %v2807_v34  ;;  %2869 = vst.msk [vmem:[%s5194_s4 + $0x30] sm:$0xff] (!%p2976_p5), %vm426_vm4, %v2807_v34 }
 0x47a   : > { %v2811_v23 = vpop.permute.xlu0 %2810 }
 0x47b   : > { %2851 = vst.msk [vmem:[#allocation2 + $0xb1] sm:$0xff] %vm426_vm4, %v2811_v23  ;;  %2871 = vst.msk [vmem:[%s5194_s4 + $0x40] sm:$0xff] (!%p2976_p5), %vm426_vm4, %v2811_v23 }
 0x487   : > { %v2813_v52 = vpop.permute.xlu1 %2812 }
 0x488   : > { %2852 = vst.msk [vmem:[#allocation2 + $0xc1] sm:$0xff] %vm426_vm4, %v2813_v52  ;;  %2872 = vst.msk [vmem:[%s5194_s4 + $0x48] sm:$0xff] (!%p2976_p5), %vm426_vm4, %v2813_v52 }
 0x4cb   : > { %v2817_v32 = vpop.permute.xlu1 %2816 }
 0x4cc   : > { %2854 = vst.msk [vmem:[#allocation2 + $0xe1] sm:$0xff] %vm426_vm4, %v2817_v32  ;;  %v2815_v14 = vpop.permute.xlu0 %2814  ;;  %2874 = vst.msk [vmem:[%s5194_s4 + $0x58] sm:$0xff] (!%p2976_p5), %vm426_vm4, %v2817_v32 }
 0x4cd   : > { %2853 = vst.msk [vmem:[#allocation2 + $0xd1] sm:$0xff] %vm426_vm4, %v2815_v14  ;;  %2873 = vst.msk [vmem:[%s5194_s4 + $0x50] sm:$0xff] (!%p2976_p5), %vm426_vm4, %v2815_v14 }
 0x4cf   : > { %v2821_v2 = vpop.permute.xlu1 %2820  ;;  %2862 = sbr.rel (%p2976_p5) target bundleno = 1238 (0x4d6), region = 44 }
 0x4d0   : > { %2856 = vst.msk [vmem:[#allocation2 + $0x101] sm:$0xff] %vm426_vm4, %v2821_v2  ;;  %v2819_v15 = vpop.permute.xlu0 %2818  ;;  %2876 = vst.msk [vmem:[%s5194_s4 + $0x68] sm:$0xff] (!%p2976_p5), %vm426_vm4, %v2821_v2 }
 0x4d1   : > { %2855 = vst.msk [vmem:[#allocation2 + $0xf1] sm:$0xff] %vm426_vm4, %v2819_v15  ;;  %2875 = vst.msk [vmem:[%s5194_s4 + $0x60] sm:$0xff] (!%p2976_p5), %vm426_vm4, %v2819_v15 }
 0x4d3   : > { %v2825_v39 = vpop.permute.xlu1 %2824 }
 0x4d4   : > { %2858 = vst.msk [vmem:[#allocation2 + $0x121] sm:$0xff] %vm426_vm4, %v2825_v39  ;;  %v2823_v33 = vpop.permute.xlu0 %2822  ;;  %2878 = vst.msk [vmem:[%s5194_s4 + $0x78] sm:$0xff] (!%p2976_p5), %vm426_vm4, %v2825_v39 }
 0x4d5   : > { %2857 = vst.msk [vmem:[#allocation2 + $0x111] sm:$0xff] %vm426_vm4, %v2823_v33  ;;  %2877 = vst.msk [vmem:[%s5194_s4 + $0x70] sm:$0xff] (!%p2976_p5), %vm426_vm4, %v2823_v33 }
 0x4d6 PF: > { %s14_s15 = sadd.s32 1, %s3443_s15  }
 0x4d7   : > { %p11_p6 = scmp.ge.s32.totalorder %s14_s15, 6  }
 0x4d9   :  { %13 = sbr.rel (!%p11_p6) target bundleno = 1 (0x1), region = 75 }

</bundles_post_ra>
